<compile_context>
chip_gen: v7x
topology: tpu7x:2x2x1
jax: 0.10.0
libtpu: 0.0.40
codegen_flags: <defaults>
</compile_context>

<pallas_src>
import functools

import jax
import jax.numpy as jnp
from jax import lax
from jax.experimental import pallas as pl
from jax.experimental.pallas import tpu as pltpu


# ------------------------------ tiling helpers ------------------------------ #

_VMEM_BUDGET_BYTES = 40 * 1024 * 1024   # stay well under v7x's 64 MiB physical VMEM


def _pick_row_tile(H, target):
    """Largest divisor of H that is <= target (mild preference for mult-of-8)."""
    target = max(1, min(target, H))
    divs = [d for d in range(1, target + 1) if H % d == 0]
    best = max(divs)
    best8 = max([d for d in divs if d % 8 == 0], default=0)
    return best8 if best8 * 2 >= best else best


def _fused_vmem_bytes(H, W, Cin, C2, C4, pad, th):
    """Rough per-core VMEM footprint of the fused kernel (bytes)."""
    Hp, Wp = H + 2 * pad, W + 2 * pad
    bf, f4 = 2, 4
    b = 0
    b += 2 * H * W * Cin * bf                       # resident x image block (2 pipeline bufs)
    b += 2 * Cin * C2 * bf                          # w1
    b += 2 * 3 * (3 * C2) * C2 * bf                 # K-packed w2
    b += 2 * C2 * C4 * bf                           # w3
    b += Hp * Wp * C2 * bf                          # padded conv1-activation scratch
    b += 2 * th * W * C4 * bf                       # bf16 output tile (2 pipeline bufs)
    b += H * W * C2 * f4                            # conv1 f32 accumulator (t == 0 only)
    b += th * W * (3 * C2 + 2 * C2 + 2 * C4) * f4   # per-tile temporaries (slab/acc/y3)
    return b


def _choose_row_tile(H, W, Cin, C2, C4, pad, block_h, budget=_VMEM_BUDGET_BYTES):
    th = _pick_row_tile(H, block_h)
    while th > 1 and _fused_vmem_bytes(H, W, Cin, C2, C4, pad, th) > budget:
        th = _pick_row_tile(H, th - 1)
    return th


# ------------------------------- fused kernel ------------------------------- #

def _bottleneck_kernel(x_ref, w1_ref, s1_ref, b1_ref,
                       w2p_ref, s2_ref, b2_ref,
                       w3_ref, s3_ref, b3_ref,
                       o_ref, xpad_ref, *, dilation, pad, th, H, W, Wp):
    t = pl.program_id(1)
    Cin = x_ref.shape[3]
    C2 = w1_ref.shape[1]
    C4 = o_ref.shape[3]

    # Once per image: conv1 (1x1) + bn1 + relu for the whole image, written
    # straight into the padded-activation scratch (no HBM a1 round trip).
    # Only the halo border strips are zeroed (interior fully overwritten), and
    # they are zeroed per image so batch-axis megacore sharding stays correct.
    @pl.when(t == 0)
    def _conv1_into_padded_scratch():
        zrow = jnp.zeros((pad, Wp, C2), xpad_ref.dtype)
        xpad_ref[pl.ds(0, pad), :, :] = zrow
        xpad_ref[pl.ds(pad + H, pad), :, :] = zrow
        zcol = jnp.zeros((H, pad, C2), xpad_ref.dtype)
        xpad_ref[pl.ds(pad, H), pl.ds(0, pad), :] = zcol
        xpad_ref[pl.ds(pad, H), pl.ds(pad + W, pad), :] = zcol

        x2d = x_ref[...].reshape(H * W, Cin)
        a1 = jnp.dot(x2d, w1_ref[...], preferred_element_type=jnp.float32)
        a1 = jnp.maximum(a1 * s1_ref[...] + b1_ref[...], 0.0)
        xpad_ref[pl.ds(pad, H), pl.ds(pad, W), :] = (
            a1.astype(xpad_ref.dtype).reshape(H, W, C2))

    row0 = t * th
    if th % 8 == 0:
        row0 = pl.multiple_of(row0, 8)

    # conv2 (3x3, dilated): K-pack the three kh taps of each kernel column
    # (K = 3*C2) and slice to width W on the *input* side -> 3 MXU matmuls per
    # tile, no MXU work lands on padding columns.
    acc = jnp.zeros((th * W, C2), jnp.float32)
    for kw in range(3):
        off = kw * dilation
        slab = jnp.concatenate(
            [xpad_ref[pl.ds(row0 + kh * dilation, th), pl.ds(off, W), :]
             for kh in range(3)],
            axis=-1).reshape(th * W, 3 * C2)
        acc = acc + jnp.dot(slab, w2p_ref[kw], preferred_element_type=jnp.float32)

    # bn2 + relu (f32), conv3 (1x1) straight from on-chip data, bn3 + skip + relu.
    y2 = jnp.maximum(acc * s2_ref[...] + b2_ref[...], 0.0).astype(w3_ref.dtype)
    y3 = jnp.dot(y2, w3_ref[...], preferred_element_type=jnp.float32)
    res = x_ref[:, pl.ds(row0, th), :, :].astype(jnp.float32).reshape(th * W, C4)
    out = jnp.maximum(y3 * s3_ref[...] + b3_ref[...] + res, 0.0)
    o_ref[...] = out.astype(o_ref.dtype).reshape(1, th, W, C4)


def fused_bottleneck(x, w1, s1, b1, w2p, s2, b2, w3, s3, b3, *, dilation,
                     block_h=32):
    """x: (N,H,W,4p) bf16; w1: (4p,p); w2p: (3, 3p, p); w3: (p, 4p) -> (N,H,W,4p) bf16."""
    N, H, W, Cin = x.shape
    C2 = w1.shape[1]
    C4 = w3.shape[1]
    pad = dilation
    Hp, Wp = H + 2 * pad, W + 2 * pad
    th = _choose_row_tile(H, W, Cin, C2, C4, pad, block_h)
    est = _fused_vmem_bytes(H, W, Cin, C2, C4, pad, th)
    vmem_limit = int(min(max(est + est // 2, 32 << 20), 56 << 20))

    kernel = functools.partial(_bottleneck_kernel, dilation=dilation, pad=pad,
                               th=th, H=H, W=W, Wp=Wp)
    return pl.pallas_call(
        kernel,
        out_shape=jax.ShapeDtypeStruct((N, H, W, C4), jnp.bfloat16),
        grid=(N, H // th),
        in_specs=[
            pl.BlockSpec((1, H, W, Cin), lambda n, t: (n, 0, 0, 0)),   # x: per-image resident
            pl.BlockSpec((Cin, C2), lambda n, t: (0, 0)),              # w1 (resident)
            pl.BlockSpec((1, C2), lambda n, t: (0, 0)),
            pl.BlockSpec((1, C2), lambda n, t: (0, 0)),
            pl.BlockSpec((3, 3 * C2, C2), lambda n, t: (0, 0, 0)),     # K-packed w2 (resident)
            pl.BlockSpec((1, C2), lambda n, t: (0, 0)),
            pl.BlockSpec((1, C2), lambda n, t: (0, 0)),
            pl.BlockSpec((C2, C4), lambda n, t: (0, 0)),               # w3 (resident)
            pl.BlockSpec((1, C4), lambda n, t: (0, 0)),
            pl.BlockSpec((1, C4), lambda n, t: (0, 0)),
        ],
        out_specs=pl.BlockSpec((1, th, W, C4), lambda n, t: (n, t, 0, 0)),
        scratch_shapes=[pltpu.VMEM((Hp, Wp, C2), x.dtype)],            # padded conv1 act (persists)
        compiler_params=pltpu.CompilerParams(
            dimension_semantics=("parallel", "arbitrary"),
            vmem_limit_bytes=vmem_limit),
    )(x, w1, s1.reshape(1, C2), b1.reshape(1, C2),
      w2p, s2.reshape(1, C2), b2.reshape(1, C2),
      w3, s3.reshape(1, C4), b3.reshape(1, C4))


# ----------------------------- full forward pass ---------------------------- #

def bottleneck_forward(x_nchw, params, *, stride=1, dilation=1, block_h=32):
    """Pallas implementation of Bottleneck.forward (downsample=None, eval-mode BN)."""
    if stride != 1:
        raise NotImplementedError("stride > 1 not implemented")  # TODO(synk)
    N, Cin, H, W = x_nchw.shape
    planes = params["w1"].shape[1]
    assert Cin == 4 * planes, "downsample=None requires inplanes == 4 * planes"
    pad = (3 * dilation - 1) // 2
    if pad != dilation:
        # Module padding formula gives out_size != in_size for dilation >= 3,
        # which breaks the residual add with downsample=None.
        raise NotImplementedError("residual add requires dilation in {1, 2}")

    cd = jnp.bfloat16
    x = jnp.transpose(x_nchw, (0, 2, 3, 1)).astype(cd)                 # NHWC bf16
    w1 = params["w1"].astype(cd)
    # K-pack w2: (kh, kw, Cin, Cout) -> (kw, kh*Cin, Cout); kernel uses one slice per kw.
    w2p = jnp.transpose(params["w2"].astype(cd), (1, 0, 2, 3)).reshape(
        3, 3 * planes, planes)
    w3 = params["w3"].astype(cd)

    y = fused_bottleneck(x, w1, params["s1"], params["b1"],
                         w2p, params["s2"], params["b2"],
                         w3, params["s3"], params["b3"],
                         dilation=dilation, block_h=block_h)
    # Single-module wrapper returns NCHW f32 to match the PyTorch signature.
    # (When chaining Bottlenecks, keep NHWC bf16 and skip this transpose.)
    return jnp.transpose(y, (0, 3, 1, 2)).astype(jnp.float32)


# ----------------------------- parameter setup ------------------------------ #

def make_params(key, inplanes, planes, eps=1e-5):
    ks = jax.random.split(key, 16)
    i = iter(range(16))

    def bn_fold(cout):
        gamma = 1.0 + 0.1 * jax.random.normal(ks[next(i)], (cout,), jnp.float32)
        beta = 0.1 * jax.random.normal(ks[next(i)], (cout,), jnp.float32)
        mean = 0.1 * jax.random.normal(ks[next(i)], (cout,), jnp.float32)
        var = jax.random.uniform(ks[next(i)], (cout,), jnp.float32, 0.5, 1.5)
        scale = gamma * lax.rsqrt(var + eps)
        bias = beta - mean * scale
        return scale, bias

    # conv weights in kernel layout: 1x1 -> (Cin, Cout); 3x3 -> (kh, kw, Cin, Cout).
    w1 = 0.1 * jax.random.normal(ks[next(i)], (inplanes, planes), jnp.float32)
    s1, b1 = bn_fold(planes)
    w2 = 0.1 * jax.random.normal(ks[next(i)], (3, 3, planes, planes), jnp.float32)
    s2, b2 = bn_fold(planes)
    w3 = 0.1 * jax.random.normal(ks[next(i)], (planes, 4 * planes), jnp.float32)
    s3, b3 = bn_fold(4 * planes)
    return dict(w1=w1, s1=s1, b1=b1, w2=w2, s2=s2, b2=b2, w3=w3, s3=s3, b3=b3)


# ------------------------------ pure-JAX reference -------------------------- #

def reference_forward(x_nchw, params, *, stride=1, dilation=1):
    """Same math / same bf16 quantization points as the Pallas pipeline."""
    cd, f32 = jnp.bfloat16, jnp.float32
    x = jnp.transpose(x_nchw, (0, 2, 3, 1)).astype(cd).astype(f32)
    w1 = params["w1"].astype(cd).astype(f32)
    w2 = params["w2"].astype(cd).astype(f32)
    w3 = params["w3"].astype(cd).astype(f32)

    o = jnp.einsum("nhwc,cf->nhwf", x, w1)
    o = jnp.maximum(o * params["s1"] + params["b1"], 0.0).astype(cd).astype(f32)
    pad = (3 * dilation - 1) // 2
    o = lax.conv_general_dilated(
        o, w2, (stride, stride), [(pad, pad), (pad, pad)],
        rhs_dilation=(dilation, dilation),
        dimension_numbers=("NHWC", "HWIO", "NHWC"))
    o = jnp.maximum(o * params["s2"] + params["b2"], 0.0).astype(cd).astype(f32)
    o = jnp.einsum("nhwc,cf->nhwf", o, w3)
    o = jnp.maximum(o * params["s3"] + params["b3"] + x, 0.0)
    return jnp.transpose(o, (0, 3, 1, 2))


# ----------------------------------- main ----------------------------------- #

if __name__ == "__main__":
    key = jax.random.PRNGKey(0)
    kx, kp = jax.random.split(key)

    planes = 64
    inplanes = 4 * planes          # required for residual add (downsample=None)
    N, H, W = 2, 16, 16

    x = jax.random.normal(kx, (N, inplanes, H, W), jnp.float32)   # NCHW
    params = make_params(kp, inplanes, planes)

    fwd = jax.jit(functools.partial(bottleneck_forward,
                                    stride=1, dilation=1, block_h=32))
    y = jax.block_until_ready(fwd(x, params))

    y_ref = reference_forward(x, params, stride=1, dilation=1)
    # Kernel emits bf16; quantize the reference output the same way for the check.
    y_ref = y_ref.astype(jnp.bfloat16).astype(jnp.float32)
    assert y.shape == (N, inplanes, H, W)
    max_err = float(jnp.max(jnp.abs(y - y_ref)))
    assert bool(jnp.allclose(y, y_ref, rtol=2e-2, atol=2e-2)), max_err

    print("KERNEL_OK")
</pallas_src>

<mosaic_0001>
module attributes {stable_mosaic.version = 11 : i64} {
  func.func @_bottleneck_kernel(%arg0: i32, %arg1: i32, %arg2: memref<1x16x16x256xbf16, #tpu.memory_space<vmem>>, %arg3: memref<256x64xbf16, #tpu.memory_space<vmem>>, %arg4: memref<1x64xf32, #tpu.memory_space<vmem>>, %arg5: memref<1x64xf32, #tpu.memory_space<vmem>>, %arg6: memref<3x192x64xbf16, #tpu.memory_space<vmem>>, %arg7: memref<1x64xf32, #tpu.memory_space<vmem>>, %arg8: memref<1x64xf32, #tpu.memory_space<vmem>>, %arg9: memref<64x256xbf16, #tpu.memory_space<vmem>>, %arg10: memref<1x256xf32, #tpu.memory_space<vmem>>, %arg11: memref<1x256xf32, #tpu.memory_space<vmem>>, %arg12: memref<1x16x16x256xbf16, #tpu.memory_space<vmem>>, %arg13: memref<18x18x64xbf16, #tpu.memory_space<vmem>>) attributes {dimension_semantics = [#tpu.dimension_semantics<parallel>, #tpu.dimension_semantics<arbitrary>], iteration_bounds = array<i64: 2, 1>, scalar_prefetch = 0 : i64, scratch_operands = 1 : i64, tpu.core_type = #tpu.core_type<tc>, window_params = [{transform_indices = @transform_0, window_bounds = array<i64: 1, 16, 16, 256>}, {pipeline_mode = #tpu.pipeline_mode<synchronous>, transform_indices = @transform_1, window_bounds = array<i64: 256, 64>}, {pipeline_mode = #tpu.pipeline_mode<synchronous>, transform_indices = @transform_2, window_bounds = array<i64: 1, 64>}, {pipeline_mode = #tpu.pipeline_mode<synchronous>, transform_indices = @transform_3, window_bounds = array<i64: 1, 64>}, {pipeline_mode = #tpu.pipeline_mode<synchronous>, transform_indices = @transform_4, window_bounds = array<i64: 3, 192, 64>}, {pipeline_mode = #tpu.pipeline_mode<synchronous>, transform_indices = @transform_5, window_bounds = array<i64: 1, 64>}, {pipeline_mode = #tpu.pipeline_mode<synchronous>, transform_indices = @transform_6, window_bounds = array<i64: 1, 64>}, {pipeline_mode = #tpu.pipeline_mode<synchronous>, transform_indices = @transform_7, window_bounds = array<i64: 64, 256>}, {pipeline_mode = #tpu.pipeline_mode<synchronous>, transform_indices = @transform_8, window_bounds = array<i64: 1, 256>}, {pipeline_mode = #tpu.pipeline_mode<synchronous>, transform_indices = @transform_9, window_bounds = array<i64: 1, 256>}, {transform_indices = @transform_10, window_bounds = array<i64: 1, 16, 16, 256>}]} {
    %c0_i32 = arith.constant 0 : i32
    %0 = arith.cmpi eq, %arg1, %c0_i32 : i32
    %1 = arith.extui %0 : i1 to i32
    %c0_i32_0 = arith.constant 0 : i32
    %2 = arith.cmpi ne, %1, %c0_i32_0 : i32
    scf.if %2 {
      %cst_55 = arith.constant 0.000000e+00 : bf16
      %78 = vector.broadcast %cst_55 : bf16 to vector<1x18x64xbf16>
      %c0_56 = arith.constant 0 : index
      %c0_57 = arith.constant 0 : index
      %c0_58 = arith.constant 0 : index
      %79 = vector.load %arg13[%c0_56, %c0_57, %c0_58] : memref<18x18x64xbf16, #tpu.memory_space<vmem>>, vector<1x18x64xbf16>
      tpu.vector_store %arg13[%c0_56, %c0_57, %c0_58], %78 {strides = array<i32>} : memref<18x18x64xbf16, #tpu.memory_space<vmem>>, vector<1x18x64xbf16>,
      %c17 = arith.constant 17 : index
      %c0_59 = arith.constant 0 : index
      %c0_60 = arith.constant 0 : index
      %80 = vector.load %arg13[%c17, %c0_59, %c0_60] : memref<18x18x64xbf16, #tpu.memory_space<vmem>>, vector<1x18x64xbf16>
      tpu.vector_store %arg13[%c17, %c0_59, %c0_60], %78 {strides = array<i32>} : memref<18x18x64xbf16, #tpu.memory_space<vmem>>, vector<1x18x64xbf16>,
      %cst_61 = arith.constant 0.000000e+00 : bf16
      %81 = vector.broadcast %cst_61 : bf16 to vector<16x1x64xbf16>
      %c1_62 = arith.constant 1 : index
      %c0_63 = arith.constant 0 : index
      %c0_64 = arith.constant 0 : index
      %82 = vector.load %arg13[%c1_62, %c0_63, %c0_64] : memref<18x18x64xbf16, #tpu.memory_space<vmem>>, vector<16x1x64xbf16>
      tpu.vector_store %arg13[%c1_62, %c0_63, %c0_64], %81 {strides = array<i32>} : memref<18x18x64xbf16, #tpu.memory_space<vmem>>, vector<16x1x64xbf16>,
      %c1_65 = arith.constant 1 : index
      %c17_66 = arith.constant 17 : index
      %c0_67 = arith.constant 0 : index
      %83 = vector.load %arg13[%c1_65, %c17_66, %c0_67] : memref<18x18x64xbf16, #tpu.memory_space<vmem>>, vector<16x1x64xbf16>
      tpu.vector_store %arg13[%c1_65, %c17_66, %c0_67], %81 {strides = array<i32>} : memref<18x18x64xbf16, #tpu.memory_space<vmem>>, vector<16x1x64xbf16>,
      %c0_68 = arith.constant 0 : index
      %c0_69 = arith.constant 0 : index
      %c0_70 = arith.constant 0 : index
      %c0_71 = arith.constant 0 : index
      %84 = vector.load %arg2[%c0_68, %c0_69, %c0_70, %c0_71] : memref<1x16x16x256xbf16, #tpu.memory_space<vmem>>, vector<1x16x16x256xbf16>
      %85 = vector.shape_cast %84 : vector<1x16x16x256xbf16> to vector<256x256xbf16>
      %c0_72 = arith.constant 0 : index
      %c0_73 = arith.constant 0 : index
      %86 = vector.load %arg3[%c0_72, %c0_73] : memref<256x64xbf16, #tpu.memory_space<vmem>>, vector<256x64xbf16>
      %cst_74 = arith.constant dense<0.000000e+00> : vector<256x64xf32>
      %87 = tpu.matmul %85, %86, %cst_74 {dimension_numbers = #tpu.dot_dimension_numbers<[1], [0], [0], [1], [0, 0, 1, 1], [], []>} : vector<256x256xbf16>, vector<256x64xbf16>, vector<256x64xf32> -> vector<256x64xf32>
      %c0_75 = arith.constant 0 : index
      %c0_76 = arith.constant 0 : index
      %88 = vector.load %arg4[%c0_75, %c0_76] : memref<1x64xf32, #tpu.memory_space<vmem>>, vector<1x64xf32>
      %89 = vector.broadcast %88 : vector<1x64xf32> to vector<256x64xf32>
      %90 = arith.mulf %87, %89 : vector<256x64xf32>
      %c0_77 = arith.constant 0 : index
      %c0_78 = arith.constant 0 : index
      %91 = vector.load %arg5[%c0_77, %c0_78] : memref<1x64xf32, #tpu.memory_space<vmem>>, vector<1x64xf32>
      %92 = vector.broadcast %91 : vector<1x64xf32> to vector<256x64xf32>
      %93 = arith.addf %90, %92 : vector<256x64xf32>
      %cst_79 = arith.constant 0.000000e+00 : f32
      %94 = vector.broadcast %cst_79 : f32 to vector<256x64xf32>
      %95 = arith.maximumf %93, %94 : vector<256x64xf32>
      %96 = arith.truncf %95 : vector<256x64xf32> to vector<256x64xbf16>
      %97 = vector.shape_cast %96 : vector<256x64xbf16> to vector<16x16x64xbf16>
      %c1_80 = arith.constant 1 : index
      %c1_81 = arith.constant 1 : index
      %c0_82 = arith.constant 0 : index
      %98 = vector.load %arg13[%c1_80, %c1_81, %c0_82] : memref<18x18x64xbf16, #tpu.memory_space<vmem>>, vector<16x16x64xbf16>
      tpu.vector_store %arg13[%c1_80, %c1_81, %c0_82], %97 {strides = array<i32>} : memref<18x18x64xbf16, #tpu.memory_space<vmem>>, vector<16x16x64xbf16>,
    } else {
    }
    %c16_i32 = arith.constant 16 : i32
    %3 = arith.muli %arg1, %c16_i32 : i32
    %4 = tpu.assume_multiple %3, 8 : i32
    %cst = arith.constant 0.000000e+00 : f32
    %5 = vector.broadcast %cst : f32 to vector<256x64xf32>
    %c0_i32_1 = arith.constant 0 : i32
    %6 = arith.addi %4, %c0_i32_1 : i32
    %7 = arith.index_cast %6 : i32 to index
    %c0 = arith.constant 0 : index
    %c0_2 = arith.constant 0 : index
    %8 = vector.load %arg13[%7, %c0, %c0_2] : memref<18x18x64xbf16, #tpu.memory_space<vmem>>, vector<16x16x64xbf16>
    %c1_i32 = arith.constant 1 : i32
    %9 = arith.addi %4, %c1_i32 : i32
    %10 = arith.index_cast %9 : i32 to index
    %c0_3 = arith.constant 0 : index
    %c0_4 = arith.constant 0 : index
    %11 = vector.load %arg13[%10, %c0_3, %c0_4] : memref<18x18x64xbf16, #tpu.memory_space<vmem>>, vector<16x16x64xbf16>
    %c2_i32 = arith.constant 2 : i32
    %12 = arith.addi %4, %c2_i32 : i32
    %13 = arith.index_cast %12 : i32 to index
    %c0_5 = arith.constant 0 : index
    %c0_6 = arith.constant 0 : index
    %14 = vector.load %arg13[%13, %c0_5, %c0_6] : memref<18x18x64xbf16, #tpu.memory_space<vmem>>, vector<16x16x64xbf16>
    %15 = tpu.concatenate %8, %11, %14 in 2 : vector<16x16x64xbf16>, vector<16x16x64xbf16>, vector<16x16x64xbf16> -> vector<16x16x192xbf16>
    %16 = vector.shape_cast %15 : vector<16x16x192xbf16> to vector<256x192xbf16>
    %c0_7 = arith.constant 0 : index
    %c0_8 = arith.constant 0 : index
    %c0_9 = arith.constant 0 : index
    %17 = vector.load %arg6[%c0_7, %c0_8, %c0_9] : memref<3x192x64xbf16, #tpu.memory_space<vmem>>, vector<1x192x64xbf16>
    %18 = vector.shape_cast %17 : vector<1x192x64xbf16> to vector<192x64xbf16>
    %cst_10 = arith.constant dense<0.000000e+00> : vector<256x64xf32>
    %19 = tpu.matmul %16, %18, %cst_10 {dimension_numbers = #tpu.dot_dimension_numbers<[1], [0], [0], [1], [0, 0, 1, 1], [], []>} : vector<256x192xbf16>, vector<192x64xbf16>, vector<256x64xf32> -> vector<256x64xf32>
    %20 = arith.addf %5, %19 : vector<256x64xf32>
    %c0_i32_11 = arith.constant 0 : i32
    %21 = arith.addi %4, %c0_i32_11 : i32
    %22 = arith.index_cast %21 : i32 to index
    %c1 = arith.constant 1 : index
    %c0_12 = arith.constant 0 : index
    %23 = vector.load %arg13[%22, %c1, %c0_12] : memref<18x18x64xbf16, #tpu.memory_space<vmem>>, vector<16x16x64xbf16>
    %c1_i32_13 = arith.constant 1 : i32
    %24 = arith.addi %4, %c1_i32_13 : i32
    %25 = arith.index_cast %24 : i32 to index
    %c1_14 = arith.constant 1 : index
    %c0_15 = arith.constant 0 : index
    %26 = vector.load %arg13[%25, %c1_14, %c0_15] : memref<18x18x64xbf16, #tpu.memory_space<vmem>>, vector<16x16x64xbf16>
    %c2_i32_16 = arith.constant 2 : i32
    %27 = arith.addi %4, %c2_i32_16 : i32
    %28 = arith.index_cast %27 : i32 to index
    %c1_17 = arith.constant 1 : index
    %c0_18 = arith.constant 0 : index
    %29 = vector.load %arg13[%28, %c1_17, %c0_18] : memref<18x18x64xbf16, #tpu.memory_space<vmem>>, vector<16x16x64xbf16>
    %30 = tpu.concatenate %23, %26, %29 in 2 : vector<16x16x64xbf16>, vector<16x16x64xbf16>, vector<16x16x64xbf16> -> vector<16x16x192xbf16>
    %31 = vector.shape_cast %30 : vector<16x16x192xbf16> to vector<256x192xbf16>
    %c1_19 = arith.constant 1 : index
    %c0_20 = arith.constant 0 : index
    %c0_21 = arith.constant 0 : index
    %32 = vector.load %arg6[%c1_19, %c0_20, %c0_21] : memref<3x192x64xbf16, #tpu.memory_space<vmem>>, vector<1x192x64xbf16>
    %33 = vector.shape_cast %32 : vector<1x192x64xbf16> to vector<192x64xbf16>
    %cst_22 = arith.constant dense<0.000000e+00> : vector<256x64xf32>
    %34 = tpu.matmul %31, %33, %cst_22 {dimension_numbers = #tpu.dot_dimension_numbers<[1], [0], [0], [1], [0, 0, 1, 1], [], []>} : vector<256x192xbf16>, vector<192x64xbf16>, vector<256x64xf32> -> vector<256x64xf32>
    %35 = arith.addf %20, %34 : vector<256x64xf32>
    %c0_i32_23 = arith.constant 0 : i32
    %36 = arith.addi %4, %c0_i32_23 : i32
    %37 = arith.index_cast %36 : i32 to index
    %c2 = arith.constant 2 : index
    %c0_24 = arith.constant 0 : index
    %38 = vector.load %arg13[%37, %c2, %c0_24] : memref<18x18x64xbf16, #tpu.memory_space<vmem>>, vector<16x16x64xbf16>
    %c1_i32_25 = arith.constant 1 : i32
    %39 = arith.addi %4, %c1_i32_25 : i32
    %40 = arith.index_cast %39 : i32 to index
    %c2_26 = arith.constant 2 : index
    %c0_27 = arith.constant 0 : index
    %41 = vector.load %arg13[%40, %c2_26, %c0_27] : memref<18x18x64xbf16, #tpu.memory_space<vmem>>, vector<16x16x64xbf16>
    %c2_i32_28 = arith.constant 2 : i32
    %42 = arith.addi %4, %c2_i32_28 : i32
    %43 = arith.index_cast %42 : i32 to index
    %c2_29 = arith.constant 2 : index
    %c0_30 = arith.constant 0 : index
    %44 = vector.load %arg13[%43, %c2_29, %c0_30] : memref<18x18x64xbf16, #tpu.memory_space<vmem>>, vector<16x16x64xbf16>
    %45 = tpu.concatenate %38, %41, %44 in 2 : vector<16x16x64xbf16>, vector<16x16x64xbf16>, vector<16x16x64xbf16> -> vector<16x16x192xbf16>
    %46 = vector.shape_cast %45 : vector<16x16x192xbf16> to vector<256x192xbf16>
    %c2_31 = arith.constant 2 : index
    %c0_32 = arith.constant 0 : index
    %c0_33 = arith.constant 0 : index
    %47 = vector.load %arg6[%c2_31, %c0_32, %c0_33] : memref<3x192x64xbf16, #tpu.memory_space<vmem>>, vector<1x192x64xbf16>
    %48 = vector.shape_cast %47 : vector<1x192x64xbf16> to vector<192x64xbf16>
    %cst_34 = arith.constant dense<0.000000e+00> : vector<256x64xf32>
    %49 = tpu.matmul %46, %48, %cst_34 {dimension_numbers = #tpu.dot_dimension_numbers<[1], [0], [0], [1], [0, 0, 1, 1], [], []>} : vector<256x192xbf16>, vector<192x64xbf16>, vector<256x64xf32> -> vector<256x64xf32>
    %50 = arith.addf %35, %49 : vector<256x64xf32>
    %c0_35 = arith.constant 0 : index
    %c0_36 = arith.constant 0 : index
    %51 = vector.load %arg7[%c0_35, %c0_36] : memref<1x64xf32, #tpu.memory_space<vmem>>, vector<1x64xf32>
    %52 = vector.broadcast %51 : vector<1x64xf32> to vector<256x64xf32>
    %53 = arith.mulf %50, %52 : vector<256x64xf32>
    %c0_37 = arith.constant 0 : index
    %c0_38 = arith.constant 0 : index
    %54 = vector.load %arg8[%c0_37, %c0_38] : memref<1x64xf32, #tpu.memory_space<vmem>>, vector<1x64xf32>
    %55 = vector.broadcast %54 : vector<1x64xf32> to vector<256x64xf32>
    %56 = arith.addf %53, %55 : vector<256x64xf32>
    %cst_39 = arith.constant 0.000000e+00 : f32
    %57 = vector.broadcast %cst_39 : f32 to vector<256x64xf32>
    %58 = arith.maximumf %56, %57 : vector<256x64xf32>
    %59 = arith.truncf %58 : vector<256x64xf32> to vector<256x64xbf16>
    %c0_40 = arith.constant 0 : index
    %c0_41 = arith.constant 0 : index
    %60 = vector.load %arg9[%c0_40, %c0_41] : memref<64x256xbf16, #tpu.memory_space<vmem>>, vector<64x256xbf16>
    %cst_42 = arith.constant dense<0.000000e+00> : vector<256x256xf32>
    %61 = tpu.matmul %59, %60, %cst_42 {dimension_numbers = #tpu.dot_dimension_numbers<[1], [0], [0], [1], [0, 0, 1, 1], [], []>} : vector<256x64xbf16>, vector<64x256xbf16>, vector<256x256xf32> -> vector<256x256xf32>
    %c0_43 = arith.constant 0 : index
    %62 = arith.index_cast %4 : i32 to index
    %c0_44 = arith.constant 0 : index
    %c0_45 = arith.constant 0 : index
    %63 = vector.load %arg2[%c0_43, %62, %c0_44, %c0_45] : memref<1x16x16x256xbf16, #tpu.memory_space<vmem>>, vector<1x16x16x256xbf16>
    %64 = arith.extf %63 : vector<1x16x16x256xbf16> to vector<1x16x16x256xf32>
    %65 = vector.shape_cast %64 : vector<1x16x16x256xf32> to vector<256x256xf32>
    %c0_46 = arith.constant 0 : index
    %c0_47 = arith.constant 0 : index
    %66 = vector.load %arg10[%c0_46, %c0_47] : memref<1x256xf32, #tpu.memory_space<vmem>>, vector<1x256xf32>
    %67 = vector.broadcast %66 : vector<1x256xf32> to vector<256x256xf32>
    %68 = arith.mulf %61, %67 : vector<256x256xf32>
    %c0_48 = arith.constant 0 : index
    %c0_49 = arith.constant 0 : index
    %69 = vector.load %arg11[%c0_48, %c0_49] : memref<1x256xf32, #tpu.memory_space<vmem>>, vector<1x256xf32>
    %70 = vector.broadcast %69 : vector<1x256xf32> to vector<256x256xf32>
    %71 = arith.addf %68, %70 : vector<256x256xf32>
    %72 = arith.addf %71, %65 : vector<256x256xf32>
    %cst_50 = arith.constant 0.000000e+00 : f32
    %73 = vector.broadcast %cst_50 : f32 to vector<256x256xf32>
    %74 = arith.maximumf %72, %73 : vector<256x256xf32>
    %75 = arith.truncf %74 : vector<256x256xf32> to vector<256x256xbf16>
    %76 = vector.shape_cast %75 : vector<256x256xbf16> to vector<1x16x16x256xbf16>
    %c0_51 = arith.constant 0 : index
    %c0_52 = arith.constant 0 : index
    %c0_53 = arith.constant 0 : index
    %c0_54 = arith.constant 0 : index
    %77 = vector.load %arg12[%c0_51, %c0_52, %c0_53, %c0_54] : memref<1x16x16x256xbf16, #tpu.memory_space<vmem>>, vector<1x16x16x256xbf16>
    tpu.vector_store %arg12[%c0_51, %c0_52, %c0_53, %c0_54], %76 {strides = array<i32>} : memref<1x16x16x256xbf16, #tpu.memory_space<vmem>>, vector<1x16x16x256xbf16>,
    return
  }
  func.func @transform_0(%arg0: i32, %arg1: i32) -> (i32, i32, i32, i32) {
    %c0_i32 = arith.constant 0 : i32
    %c0_i32_0 = arith.constant 0 : i32
    %c0_i32_1 = arith.constant 0 : i32
    %c0_i32_2 = arith.constant 0 : i32
    return %arg0, %c0_i32, %c0_i32_0, %c0_i32_1 : i32, i32, i32, i32
  }
  func.func @transform_1(%arg0: i32, %arg1: i32) -> (i32, i32) {
    %c0_i32 = arith.constant 0 : i32
    %c0_i32_0 = arith.constant 0 : i32
    %c0_i32_1 = arith.constant 0 : i32
    return %c0_i32, %c0_i32_0 : i32, i32
  }
  func.func @transform_2(%arg0: i32, %arg1: i32) -> (i32, i32) {
    %c0_i32 = arith.constant 0 : i32
    %c0_i32_0 = arith.constant 0 : i32
    %c0_i32_1 = arith.constant 0 : i32
    return %c0_i32, %c0_i32_0 : i32, i32
  }
  func.func @transform_3(%arg0: i32, %arg1: i32) -> (i32, i32) {
    %c0_i32 = arith.constant 0 : i32
    %c0_i32_0 = arith.constant 0 : i32
    %c0_i32_1 = arith.constant 0 : i32
    return %c0_i32, %c0_i32_0 : i32, i32
  }
  func.func @transform_4(%arg0: i32, %arg1: i32) -> (i32, i32, i32) {
    %c0_i32 = arith.constant 0 : i32
    %c0_i32_0 = arith.constant 0 : i32
    %c0_i32_1 = arith.constant 0 : i32
    %c0_i32_2 = arith.constant 0 : i32
    return %c0_i32, %c0_i32_0, %c0_i32_1 : i32, i32, i32
  }
  func.func @transform_5(%arg0: i32, %arg1: i32) -> (i32, i32) {
    %c0_i32 = arith.constant 0 : i32
    %c0_i32_0 = arith.constant 0 : i32
    %c0_i32_1 = arith.constant 0 : i32
    return %c0_i32, %c0_i32_0 : i32, i32
  }
  func.func @transform_6(%arg0: i32, %arg1: i32) -> (i32, i32) {
    %c0_i32 = arith.constant 0 : i32
    %c0_i32_0 = arith.constant 0 : i32
    %c0_i32_1 = arith.constant 0 : i32
    return %c0_i32, %c0_i32_0 : i32, i32
  }
  func.func @transform_7(%arg0: i32, %arg1: i32) -> (i32, i32) {
    %c0_i32 = arith.constant 0 : i32
    %c0_i32_0 = arith.constant 0 : i32
    %c0_i32_1 = arith.constant 0 : i32
    return %c0_i32, %c0_i32_0 : i32, i32
  }
  func.func @transform_8(%arg0: i32, %arg1: i32) -> (i32, i32) {
    %c0_i32 = arith.constant 0 : i32
    %c0_i32_0 = arith.constant 0 : i32
    %c0_i32_1 = arith.constant 0 : i32
    return %c0_i32, %c0_i32_0 : i32, i32
  }
  func.func @transform_9(%arg0: i32, %arg1: i32) -> (i32, i32) {
    %c0_i32 = arith.constant 0 : i32
    %c0_i32_0 = arith.constant 0 : i32
    %c0_i32_1 = arith.constant 0 : i32
    return %c0_i32, %c0_i32_0 : i32, i32
  }
  func.func @transform_10(%arg0: i32, %arg1: i32) -> (i32, i32, i32, i32) {
    %c0_i32 = arith.constant 0 : i32
    %c0_i32_0 = arith.constant 0 : i32
    %c0_i32_1 = arith.constant 0 : i32
    return %arg0, %arg1, %c0_i32, %c0_i32_0 : i32, i32, i32, i32
  }
}

</mosaic_0001>

<bundles_post_ra>
// kernel: bottleneck_forward.1
= control target key start
LH: loop header
LB: loop body
LE: loop exit
PB: predicated region body
PF: predicated region fallthrough
CT: control target
= control target key end

     0   :  { %s6404_s13 = smov 0   ;;  %s6406_s14 = smov 0   ;;  %s8087_s0 = inlined_call_operand.vmem [shape: bf16[2,16,16,256], index: 0, kind: input, shape index: {}]   ;;  %s8088_s1 = inlined_call_operand.vmem [shape: bf16[256,64], index: 1, kind: input, shape index: {}]   ;;  %s8089_s2 = inlined_call_operand.vmem [shape: f32[1,64], index: 2, kind: input, shape index: {}]   ;;  %s8090_s3 = inlined_call_operand.vmem [shape: f32[1,64], index: 3, kind: input, shape index: {}]   ;;  %s8091_s4 = inlined_call_operand.vmem [shape: bf16[3,192,64], index: 4, kind: input, shape index: {}]   ;;  %s8092_s5 = inlined_call_operand.vmem [shape: f32[1,64], index: 5, kind: input, shape index: {}]   ;;  %s8093_s6 = inlined_call_operand.vmem [shape: f32[1,64], index: 6, kind: input, shape index: {}]   ;;  %s8094_s7 = inlined_call_operand.vmem [shape: bf16[64,256], index: 7, kind: input, shape index: {}]   ;;  %s8095_s8 = inlined_call_operand.vmem [shape: f32[1,256], index: 8, kind: input, shape index: {}]   ;;  %s8096_s9 = inlined_call_operand.vmem [shape: f32[1,256], index: 9, kind: input, shape index: {}]   ;;  %s8097_s10 = inlined_call_operand.vmem [shape: bf16[2,16,16,256], index: 10, kind: output, shape index: {}]  }
   0x1   :  { %s6408_s15 = smov 0  }
   0x2 LB: > { %s32_s16 = sadd.s32 1, %s6341_s14  ;;  %p5181_p0 = scmp.ge.s32.totalorder %s6345_s15, 1  ;;  %s6345_s15 = sphi %s6408_s15, %s20_s15   ;;  %s6341_s14 = sphi %s6406_s14, %s8194_s14   ;;  %s6337_s13 = sphi %s6404_s13, %s8193_s13  }
   0x3   : > { %p34_p1 = scmp.ge.s32.totalorder %s32_s16, 2  ;;  %p326_p2 = scmp.lt.s32.totalorder %s6345_s15, 3 }
   0x5   : > { %s8196_s16 = smov (%p34_p1, %s32_s16), 0  ;;  %p327_p3 = pnand %p5181_p0, %p326_p2 }
   0x7   : > { %330 = sbr.rel (%p327_p3) target bundleno = 1242 (0x4da), region = 60 }
   0xe   : > { %v6070_v0 = vld [vmem:[%s8088_s1 + $0x40] sm:$0xff]   ;;  %v6072_v2 = vld [vmem:[%s8088_s1 + $0x48] sm:$0xff]   ;;  %p369_p4 = scmp.lt.s32.totalorder %s6337_s13, 1  ;;  %v6074_v4 = vld [vmem:[%s8088_s1 + $0x50] sm:$0xff]   ;;  %vm393_vm0 = vcmask 516096   ;;  %vm390_vm5 = vcmask 519168  }
   0xf   : > { %v6071_v1 = vld [vmem:[%s8088_s1] sm:$0xff]   ;;  %5798 = vmatprep.subr.bf16.mxu0 %v6070_v0  ;;  %v6073_v3 = vld [vmem:[%s8088_s1 + $0x8] sm:$0xff]   ;;  %v6075_v5 = vld [vmem:[%s8088_s1 + $0x10] sm:$0xff]   ;;  %vm401_vm1 = vsmask.f32 256  ;;  %vm2004_vm10 = vcmask 523264  }
  0x10   : > { %5799 = vmatpush3.bf16.msra.mxu0 %v6071_v1  ;;  %s8198_s13 = smov (!%p369_p4, %s6337_s13), 1  ;;  %v6076_v6 = vld [vmem:[%s8088_s1 + $0x58] sm:$0xff]   ;;  %v6078_v8 = vld [vmem:[%s8088_s1 + $0x60] sm:$0xff]   ;;  %v6080_v10 = vld [vmem:[%s8088_s1 + $0x68] sm:$0xff]   ;;  %vm451_vm3 = vsmask.f32 7938 }
  0x11   : > { %5800 = vmatprep.subr.bf16.mxu0 %v6072_v2  ;;  %v6077_v7 = vld [vmem:[%s8088_s1 + $0x18] sm:$0xff]   ;;  %s5732_s17 = sshll.u32 %s8198_s13, 8  ;;  %v6079_v9 = vld [vmem:[%s8088_s1 + $0x20] sm:$0xff]   ;;  %v6081_v12 = vld [vmem:[%s8088_s1 + $0x28] sm:$0xff]   ;;  %vm1188_vm6 = vsmask.f32 4368 }
  0x12   : > { %s6457_s22 = scalar_lea.vmem %s8087_s0, %s5732_s17  ;;  %v6082_v13 = vld [vmem:[%s8088_s1 + $0x70] sm:$0xff]   ;;  %v6084_v15 = vld [vmem:[%s8088_s1 + $0x78] sm:$0xff]   ;;  %v403_v39 = vld [vmem:[#allocation2 + $0xc] sm:$0x1]  ;;  %vm2365_vm9 = vsmask.f32 7424  ;;  %s7896_s12 = scalar_lea.vmem %s8097_s10, %s5732_s17 }
  0x13   : > { %v6088_v11 = vld [vmem:[%s6457_s22 + $0x4] ss:$8 sps:$4 sm:$0xff]   ;;  %v6083_v14 = vld [vmem:[%s8088_s1 + $0x30] sm:$0xff]   ;;  %v6085_v16 = vld [vmem:[%s8088_s1 + $0x38] sm:$0xff]   ;;  %s6348_s23 = smov 64   ;;  %vm3609_vm11 = vcmask 1046528  }
  0x14   : > { %5801 = vmatpush3.bf16.msra.mxu0 %v6073_v3  ;;  %853 = vmatprep.mubr.bf16.mxu0 %v6088_v11  ;;  %v6086_v17 = vld [vmem:[%s6457_s22] ss:$8 sps:$4 sm:$0xff]   ;;  %v6089_v18 = vld [vmem:[%s6457_s22 + $0x14] ss:$8 sps:$4 sm:$0xff]   ;;  %v6091_v19 = vld [vmem:[%s6457_s22 + $0x10] ss:$8 sps:$4 sm:$0xff]  }
  0x15   : > { %5802 = vmatprep.subr.bf16.mxu0 %v6074_v4  ;;  %v6092_v20 = vld [vmem:[%s6457_s22 + $0x24] ss:$8 sps:$4 sm:$0xff]   ;;  %v6094_v21 = vld [vmem:[%s6457_s22 + $0x20] ss:$8 sps:$4 sm:$0xff]   ;;  %v6095_v22 = vld [vmem:[%s6457_s22 + $0x34] ss:$8 sps:$4 sm:$0xff]  }
  0x16   : > { %v6097_v23 = vld [vmem:[%s6457_s22 + $0x30] ss:$8 sps:$4 sm:$0xff]   ;;  %v6098_v24 = vld [vmem:[%s6457_s22 + $0x44] ss:$8 sps:$4 sm:$0xff]   ;;  %v6100_v25 = vld [vmem:[%s6457_s22 + $0x40] ss:$8 sps:$4 sm:$0xff]  }
  0x17   : > { %v6101_v26 = vld [vmem:[%s6457_s22 + $0x54] ss:$8 sps:$4 sm:$0xff]   ;;  %v6103_v27 = vld [vmem:[%s6457_s22 + $0x50] ss:$8 sps:$4 sm:$0xff]   ;;  %v6104_v28 = vld [vmem:[%s6457_s22 + $0x64] ss:$8 sps:$4 sm:$0xff]  }
  0x18   : > { %5803 = vmatpush3.bf16.msra.mxu0 %v6075_v5  ;;  %v6106_v29 = vld [vmem:[%s6457_s22 + $0x60] ss:$8 sps:$4 sm:$0xff]   ;;  %v6107_v30 = vld [vmem:[%s6457_s22 + $0x74] ss:$8 sps:$4 sm:$0xff]   ;;  %v6109_v31 = vld [vmem:[%s6457_s22 + $0x70] ss:$8 sps:$4 sm:$0xff]  }
  0x19   : > { %5804 = vmatprep.subr.bf16.mxu0 %v6076_v6  ;;  %v6110_v32 = vld [vmem:[%s6457_s22 + $0x84] ss:$8 sps:$4 sm:$0xff]   ;;  %v6112_v33 = vld [vmem:[%s6457_s22 + $0x80] ss:$8 sps:$4 sm:$0xff]   ;;  %v6113_v34 = vld [vmem:[%s6457_s22 + $0x94] ss:$8 sps:$4 sm:$0xff]  }
  0x1a   : > { %v6115_v35 = vld [vmem:[%s6457_s22 + $0x90] ss:$8 sps:$4 sm:$0xff]   ;;  %v6116_v36 = vld [vmem:[%s6457_s22 + $0xa4] ss:$8 sps:$4 sm:$0xff]   ;;  %v6118_v37 = vld [vmem:[%s6457_s22 + $0xa0] ss:$8 sps:$4 sm:$0xff]  }
  0x1b   : > { %v6119_v38 = vld [vmem:[%s6457_s22 + $0xb4] ss:$8 sps:$4 sm:$0xff]   ;;  %v6121_v40 = vld [vmem:[%s6457_s22 + $0xb0] ss:$8 sps:$4 sm:$0xff]   ;;  %vm6506_vm2 = vmand %vm393_vm0, %vm401_vm1 }
  0x1c   : > { %5805 = vmatpush3.bf16.msra.mxu0 %v6077_v7  ;;  %v6122_v42 = vld [vmem:[%s6457_s22 + $0xc4] ss:$8 sps:$4 sm:$0xff]   ;;  %v404_v43 = vsel %vm6506_vm2, 0, %v403_v39  ;;  %vm6515_vm4 = vmand %vm393_vm0, %vm451_vm3  ;;  %v6124_v45 = vld [vmem:[%s6457_s22 + $0xc0] ss:$8 sps:$4 sm:$0xff]  }
  0x1d   : > { %5806 = vmatprep.subr.bf16.mxu0 %v6078_v8  ;;  %405 = vst [vmem:[#allocation2 + $0xc] sm:$0x1] %v404_v43  ;;  %v6125_v46 = vld [vmem:[%s6457_s22 + $0xd4] ss:$8 sps:$4 sm:$0xff]   ;;  %v406_v49 = vld [vmem:[#allocation2 + $0x18] sm:$0x1]  ;;  %vm6606_vm7 = vmand %vm390_vm5, %vm451_vm3 }
  0x1e   : > { %v453_v47 = vld [vmem:[#allocation2 + $0x14] sm:$0x1]  ;;  %v6127_v50 = vld [vmem:[%s6457_s22 + $0xd0] ss:$8 sps:$4 sm:$0xff]   ;;  %v407_v51 = vsel %vm6506_vm2, 0, %v406_v49  ;;  %vm6613_vm8 = vmor %vm401_vm1, %vm1188_vm6 }
  0x1f   : > { %v454_v48 = vsel %vm6515_vm4, 0, %v453_v47  ;;  %v6128_v52 = vld [vmem:[%s6457_s22 + $0xe4] ss:$8 sps:$4 sm:$0xff]   ;;  %408 = vst [vmem:[#allocation2 + $0x18] sm:$0x1] %v407_v51 }
  0x20   : > { %5807 = vmatpush3.bf16.msra.mxu0 %v6079_v9  ;;  %455 = vst [vmem:[#allocation2 + $0x14] sm:$0x1] %v454_v48  ;;  %v456_v53 = vld [vmem:[#allocation2 + $0x20] sm:$0x1]  ;;  %v409_v56 = vld [vmem:[#allocation2 + $0x24] sm:$0x1] }
  0x21   : > { %5808 = vmatprep.subr.bf16.mxu0 %v6080_v10  ;;  %v457_v54 = vsel %vm6515_vm4, 0, %v456_v53  ;;  %v6130_v55 = vld [vmem:[%s6457_s22 + $0xe0] ss:$8 sps:$4 sm:$0xff]   ;;  %v6131_v57 = vld [vmem:[%s6457_s22 + $0xf4] ss:$8 sps:$4 sm:$0xff]   ;;  %v410_v58 = vsel %vm6506_vm2, 0, %v409_v56 }
  0x22   : > { %458 = vst [vmem:[#allocation2 + $0x20] sm:$0x1] %v457_v54  ;;  %411 = vst [vmem:[#allocation2 + $0x24] sm:$0x1] %v410_v58  ;;  %v459_v59 = vld [vmem:[#allocation2 + $0x2c] sm:$0x1] }
  0x23   : > { %v460_v60 = vsel %vm6515_vm4, 0, %v459_v59  ;;  %v6133_v61 = vld [vmem:[%s6457_s22 + $0xf0] ss:$8 sps:$4 sm:$0xff]   ;;  %v415_v2 = vld [vmem:[#allocation2 + $0x3c] sm:$0x1] }
  0x24   : > { %5809 = vmatpush3.bf16.msra.mxu0 %v6081_v12  ;;  %461 = vst [vmem:[#allocation2 + $0x2c] sm:$0x1] %v460_v60  ;;  %v412_v62 = vld [vmem:[#allocation2 + $0x30] sm:$0x1]  ;;  %v462_v0 = vld [vmem:[#allocation2 + $0x38] sm:$0x1] }
  0x25   : > { %5810 = vmatprep.subr.bf16.mxu0 %v6082_v13  ;;  %v413_v63 = vsel %vm6506_vm2, 0, %v412_v62  ;;  %v463_v1 = vsel %vm6515_vm4, 0, %v462_v0  ;;  %v416_v3 = vsel %vm6506_vm2, 0, %v415_v2  ;;  %v465_v4 = vld [vmem:[#allocation2 + $0x44] sm:$0x1] }
  0x26   : > { %414 = vst [vmem:[#allocation2 + $0x30] sm:$0x1] %v413_v63  ;;  %464 = vst [vmem:[#allocation2 + $0x38] sm:$0x1] %v463_v1  ;;  %v466_v5 = vsel %vm6515_vm4, 0, %v465_v4 }
  0x27   : > { %417 = vst [vmem:[#allocation2 + $0x3c] sm:$0x1] %v416_v3  ;;  %467 = vst [vmem:[#allocation2 + $0x44] sm:$0x1] %v466_v5  ;;  %v418_v6 = vld [vmem:[#allocation2 + $0x48] sm:$0x1] }
  0x28   : > { %5811 = vmatpush3.bf16.msra.mxu0 %v6083_v14  ;;  %v419_v7 = vsel %vm6506_vm2, 0, %v418_v6  ;;  %v468_v8 = vld [vmem:[#allocation2 + $0x50] sm:$0x1]  ;;  %v421_v10 = vld [vmem:[#allocation2 + $0x54] sm:$0x1] }
  0x29   : > { %5812 = vmatprep.subr.bf16.mxu0 %v6084_v15  ;;  %420 = vst [vmem:[#allocation2 + $0x48] sm:$0x1] %v419_v7  ;;  %v469_v9 = vsel %vm6515_vm4, 0, %v468_v8  ;;  %v422_v11 = vsel %vm6506_vm2, 0, %v421_v10  ;;  %v471_v12 = vld [vmem:[#allocation2 + $0x5c] sm:$0x1] }
  0x2a   : > { %470 = vst [vmem:[#allocation2 + $0x50] sm:$0x1] %v469_v9  ;;  %423 = vst [vmem:[#allocation2 + $0x54] sm:$0x1] %v422_v11  ;;  %v472_v13 = vsel %vm6515_vm4, 0, %v471_v12 }
  0x2b   : > { %473 = vst [vmem:[#allocation2 + $0x5c] sm:$0x1] %v472_v13  ;;  %v424_v14 = vld [vmem:[#allocation2 + $0x60] sm:$0x1]  ;;  %v445_v43 = vld [vmem:[#allocation2 + $0xb4] sm:$0x1] }
  0x2c   : > { %5813 = vmatpush3.bf16.msra.mxu0 %v6085_v16  ;;  %v425_v15 = vsel %vm6506_vm2, 0, %v424_v14  ;;  %v474_v16 = vld [vmem:[#allocation2 + $0x68] sm:$0x1]  ;;  %v6592_v53 = vld [vmem:[%s8090_s3] ss:$0 sm:$0xff] }
  0x2d   : > { %426 = vst [vmem:[#allocation2 + $0x60] sm:$0x1] %v425_v15  ;;  %v448_v59 = vld [vmem:[#allocation2 + $0xc0] sm:$0x1]  ;;  %v498_v0 = vld [vmem:[#allocation2 + $0xc8] sm:$0x1] }
  0x2e   : > { %v449_v60 = vsel %vm6506_vm2, 0, %v448_v59  ;;  %v499_v2 = vsel %vm6515_vm4, 0, %v498_v0 }
  0x2f   : > { %854 = vmatmul.mubr.bf16.vlgmr.msra.gmra.mrb[0].mxu0 %v6086_v17  ;;  %v475_v17 = vsel %vm6515_vm4, 0, %v474_v16  ;;  %450 = vst [vmem:[#allocation2 + $0xc0] sm:$0x1] %v449_v60  ;;  %500 = vst [vmem:[#allocation2 + $0xc8] sm:$0x1] %v499_v2 }
  0x30   : > { %861 = vmatprep.mubr.bf16.mxu0 %v6089_v18  ;;  %476 = vst [vmem:[#allocation2 + $0x68] sm:$0x1] %v475_v17  ;;  %v427_v18 = vld [vmem:[#allocation2 + $0x6c] sm:$0x1] }
  0x31   : > { %v1512_v16 = vld [vmem:[#allocation2 + $0xc] sm:$0xf] }
  0x37   : > { %862 = vmatmul.mubr.bf16.gmra.mrb[4].mxu0 %v6091_v19  ;;  %v428_v19 = vsel %vm6506_vm2, 0, %v427_v18 }
  0x38   : > { %869 = vmatprep.mubr.bf16.mxu0 %v6092_v20  ;;  %429 = vst [vmem:[#allocation2 + $0x6c] sm:$0x1] %v428_v19  ;;  %v477_v20 = vld [vmem:[#allocation2 + $0x74] sm:$0x1] }
  0x3f   : > { %870 = vmatmul.mubr.bf16.gmra.mrb[8].mxu0 %v6094_v21  ;;  %v478_v21 = vsel %vm6515_vm4, 0, %v477_v20 }
  0x40   : > { %877 = vmatprep.mubr.bf16.mxu0 %v6095_v22  ;;  %479 = vst [vmem:[#allocation2 + $0x74] sm:$0x1] %v478_v21  ;;  %v430_v22 = vld [vmem:[#allocation2 + $0x78] sm:$0x1] }
  0x47   : > { %878 = vmatmul.mubr.bf16.gmra.mrb[12].mxu0 %v6097_v23  ;;  %v431_v23 = vsel %vm6506_vm2, 0, %v430_v22 }
  0x48   : > { %885 = vmatprep.mubr.bf16.mxu0 %v6098_v24  ;;  %432 = vst [vmem:[#allocation2 + $0x78] sm:$0x1] %v431_v23  ;;  %v480_v24 = vld [vmem:[#allocation2 + $0x80] sm:$0x1] }
  0x4f   : > { %886 = vmatmul.mubr.bf16.gmra.mrb[16].mxu0 %v6100_v25  ;;  %v481_v25 = vsel %vm6515_vm4, 0, %v480_v24 }
  0x50   : > { %893 = vmatprep.mubr.bf16.mxu0 %v6101_v26  ;;  %482 = vst [vmem:[#allocation2 + $0x80] sm:$0x1] %v481_v25  ;;  %v433_v26 = vld [vmem:[#allocation2 + $0x84] sm:$0x1]  ;;  %v1516_v25 = vld [vmem:[#allocation2 + $0x14] sm:$0x1] }
  0x57   : > { %894 = vmatmul.mubr.bf16.gmra.mrb[20].mxu0 %v6103_v27  ;;  %v434_v27 = vsel %vm6506_vm2, 0, %v433_v26 }
  0x58   : > { %901 = vmatprep.mubr.bf16.mxu0 %v6104_v28  ;;  %435 = vst [vmem:[#allocation2 + $0x84] sm:$0x1] %v434_v27  ;;  %v483_v28 = vld [vmem:[#allocation2 + $0x8c] sm:$0x1] }
  0x5f   : > { %902 = vmatmul.mubr.bf16.gmra.mrb[24].mxu0 %v6106_v29  ;;  %v484_v29 = vsel %vm6515_vm4, 0, %v483_v28 }
  0x60   : > { %909 = vmatprep.mubr.bf16.mxu0 %v6107_v30  ;;  %485 = vst [vmem:[#allocation2 + $0x8c] sm:$0x1] %v484_v29  ;;  %v436_v30 = vld [vmem:[#allocation2 + $0x90] sm:$0x1] }
  0x67   : > { %910 = vmatmul.mubr.bf16.gmra.mrb[28].mxu0 %v6109_v31  ;;  %v437_v31 = vsel %vm6506_vm2, 0, %v436_v30 }
  0x68   : > { %917 = vmatprep.mubr.bf16.mxu0 %v6110_v32  ;;  %438 = vst [vmem:[#allocation2 + $0x90] sm:$0x1] %v437_v31  ;;  %v486_v32 = vld [vmem:[#allocation2 + $0x98] sm:$0x1] }
  0x6f   : > { %918 = vmatmul.mubr.bf16.gmra.mrb[32].mxu0 %v6112_v33  ;;  %v487_v33 = vsel %vm6515_vm4, 0, %v486_v32 }
  0x70   : > { %925 = vmatprep.mubr.bf16.mxu0 %v6113_v34  ;;  %488 = vst [vmem:[#allocation2 + $0x98] sm:$0x1] %v487_v33  ;;  %v439_v34 = vld [vmem:[#allocation2 + $0x9c] sm:$0x1] }
  0x77   : > { %926 = vmatmul.mubr.bf16.gmra.mrb[36].mxu0 %v6115_v35  ;;  %v440_v35 = vsel %vm6506_vm2, 0, %v439_v34 }
  0x78   : > { %933 = vmatprep.mubr.bf16.mxu0 %v6116_v36  ;;  %441 = vst [vmem:[#allocation2 + $0x9c] sm:$0x1] %v440_v35  ;;  %v489_v36 = vld [vmem:[#allocation2 + $0xa4] sm:$0x1] }
  0x7f   : > { %934 = vmatmul.mubr.bf16.gmra.mrb[40].mxu0 %v6118_v37  ;;  %v490_v37 = vsel %vm6515_vm4, 0, %v489_v36 }
  0x80   : > { %941 = vmatprep.mubr.bf16.mxu0 %v6119_v38  ;;  %491 = vst [vmem:[#allocation2 + $0xa4] sm:$0x1] %v490_v37  ;;  %v442_v38 = vld [vmem:[#allocation2 + $0xa8] sm:$0x1] }
  0x81   : > { %v443_v39 = vsel %vm6506_vm2, 0, %v442_v38 }
  0x82   : > { %444 = vst [vmem:[#allocation2 + $0xa8] sm:$0x1] %v443_v39 }
  0x87   : > { %942 = vmatmul.mubr.bf16.gmra.mrb[44].mxu0 %v6121_v40  ;;  %v492_v40 = vld [vmem:[#allocation2 + $0xb0] sm:$0x1] }
  0x88   : > { %949 = vmatprep.mubr.bf16.mxu0 %v6122_v42  ;;  %v493_v42 = vsel %vm6515_vm4, 0, %v492_v40 }
  0x89   : > { %494 = vst [vmem:[#allocation2 + $0xb0] sm:$0x1] %v493_v42 }
  0x8f   : > { %950 = vmatmul.mubr.bf16.gmra.mrb[48].mxu0 %v6124_v45  ;;  %v446_v45 = vsel %vm6506_vm2, 0, %v445_v43 }
  0x90   : > { %957 = vmatprep.mubr.bf16.mxu0 %v6125_v46  ;;  %447 = vst [vmem:[#allocation2 + $0xb4] sm:$0x1] %v446_v45  ;;  %v495_v46 = vld [vmem:[#allocation2 + $0xbc] sm:$0x1] }
  0x91   : > { %v496_v47 = vsel %vm6515_vm4, 0, %v495_v46  ;;  %v1519_v46 = vld [vmem:[#allocation2 + $0x18] sm:$0xf] }
  0x92   : > { %497 = vst [vmem:[#allocation2 + $0xbc] sm:$0x1] %v496_v47 }
  0x97   : > { %958 = vmatmul.mubr.bf16.gmra.mrb[52].mxu0 %v6127_v50  ;;  %v6587_v50 = vld [vmem:[%s8089_s2] ss:$0 sm:$0xff] }
  0x98   : > { %965 = vmatprep.mubr.bf16.mxu0 %v6128_v52 }
  0x9f   : > { %966 = vmatmul.mubr.bf16.gmra.mrb[56].mxu0 %v6130_v55 }
  0xa0   : > { %973 = vmatprep.mubr.bf16.mxu0 %v6131_v57 }
  0xa7   : > { %974 = vmatmul.mubr.bf16.gmra.mrb[60].mxu0 %v6133_v61 }
 0x102   : > { %v5814_v48 = vpop.f32.mrb[0].mxu0 }
 0x103   : > { %v5815_v49 = vpop.f32.mrb[1].mxu0 }
 0x104   : > { %v5816_v51 = vadd.f32 %v5815_v49, %v5814_v48  ;;  %v5817_v52 = vpop.f32.mrb[2].mxu0 }
 0x105   : > { %v5818_v54 = vpop.f32.mrb[3].mxu0 }
 0x106   : > { %v989_v55 = vmul.f32 %v5816_v51, %v6587_v50  ;;  %v5819_v56 = vadd.f32 %v5818_v54, %v5817_v52 }
 0x108   : > { %v1028_v57 = vadd.f32 %v6592_v53, %v989_v55  ;;  %v990_v58 = vmul.f32 %v5819_v56, %v6587_v50 }
 0x10a   : > { %v1060_v61 = vmax.f32 %v1028_v57, 0.0  ;;  %v1029_v62 = vadd.f32 %v6592_v53, %v990_v58  ;;  %v5820_v63 = vpop.f32.mrb[4].mxu0 }
 0x10b   : > { %v5821_v1 = vpop.f32.mrb[5].mxu0 }
 0x10c   : > { %v5734_v3 = vpack.c.bf16 %v1060_v61, %v1060_v61  ;;  %v1061_v4 = vmax.f32 %v1029_v62, 0.0  ;;  %v5822_v5 = vadd.f32 %v5821_v1, %v5820_v63  ;;  %v5823_v6 = vpop.f32.mrb[6].mxu0  ;;  %v1523_v61 = vld [vmem:[#allocation2 + $0x20] sm:$0x1] }
 0x10d   : > { %v5824_v7 = vpop.f32.mrb[7].mxu0 }
 0x10e   : > { %v1191_v8 = vshrl.u32 %v5734_v3, 16  ;;  %v5735_v9 = vpack.c.bf16 %v1061_v4, %v1061_v4  ;;  %v991_v10 = vmul.f32 %v5822_v5, %v6587_v50  ;;  %v5825_v11 = vadd.f32 %v5824_v7, %v5823_v6 }
 0x10f   : > { %v1194_v13 = vshll.u32 %v5734_v3, 16 }
 0x110   : > { %v1193_v12 = vrot.slane %v1191_v8, 7  ;;  %v1199_v14 = vshrl.u32 %v5735_v9, 16  ;;  %v1030_v15 = vadd.f32 %v6592_v53, %v991_v10  ;;  %v992_v17 = vmul.f32 %v5825_v11, %v6587_v50 }
 0x111   : > { %v1202_v20 = vshll.u32 %v5735_v9, 16 }
 0x112   : > { %v1196_v18 = vor.u32 %v1194_v13, %v1193_v12  ;;  %v1201_v19 = vrot.slane %v1199_v14, 7  ;;  %v1062_v21 = vmax.f32 %v1030_v15, 0.0  ;;  %v5826_v22 = vpop.f32.mrb[8].mxu0  ;;  %v1197_v23 = vrot.slane %v1193_v12, 4  ;;  %v1526_v15 = vld [vmem:[#allocation2 + $0x24] sm:$0xf] }
 0x113   : > { %v1031_v26 = vadd.f32 %v6592_v53, %v992_v17  ;;  %v5827_v27 = vpop.f32.mrb[9].mxu0 }
 0x114   : > { %v1513_v28 = vsel %vm6606_vm7, %v1196_v18, %v1512_v16  ;;  %v1204_v29 = vor.u32 %v1202_v20, %v1201_v19  ;;  %v1206_v30 = vrot.slane %v1201_v19, 4  ;;  %v5736_v31 = vpack.c.bf16 %v1062_v21, %v1062_v21  ;;  %v5829_v32 = vpop.f32.mrb[10].mxu0 }
 0x115   : > { %1514 = vst [vmem:[#allocation2 + $0xc] sm:$0xf] %v1513_v28  ;;  %v1063_v33 = vmax.f32 %v1031_v26, 0.0  ;;  %v5828_v34 = vadd.f32 %v5827_v27, %v5826_v22  ;;  %v5830_v35 = vpop.f32.mrb[11].mxu0 }
 0x116   : > { %v1205_v36 = vsel %vm6613_vm8, %v1197_v23, %v1204_v29  ;;  %v1517_v37 = vsel %vm6506_vm2, %v1206_v30, %v1516_v25  ;;  %v1208_v38 = vshrl.u32 %v5736_v31, 16  ;;  %v5831_v42 = vadd.f32 %v5830_v35, %v5829_v32  ;;  %v1530_v30 = vld [vmem:[#allocation2 + $0x2c] sm:$0x1] }
 0x117   : > { %1515 = vst.msk [vmem:[#allocation2 + $0x10] sm:$0xf] %vm390_vm5, %v1205_v36  ;;  %1518 = vst [vmem:[#allocation2 + $0x14] sm:$0x1] %v1517_v37  ;;  %v5737_v39 = vpack.c.bf16 %v1063_v33, %v1063_v33  ;;  %v993_v40 = vmul.f32 %v5828_v34, %v6587_v50  ;;  %v1211_v45 = vshll.u32 %v5736_v31, 16 }
 0x118   : > { %v1210_v43 = vrot.slane %v1208_v38, 7  ;;  %v994_v49 = vmul.f32 %v5831_v42, %v6587_v50 }
 0x119   : > { %v1216_v47 = vshrl.u32 %v5737_v39, 16  ;;  %v1032_v48 = vadd.f32 %v6592_v53, %v993_v40  ;;  %v1219_v55 = vshll.u32 %v5737_v39, 16 }
 0x11a   : > { %v1213_v51 = vor.u32 %v1211_v45, %v1210_v43  ;;  %v5832_v52 = vpop.f32.mrb[12].mxu0  ;;  %v1033_v57 = vadd.f32 %v6592_v53, %v994_v49  ;;  %v1214_v59 = vrot.slane %v1210_v43, 4  ;;  %v1533_v49 = vld [vmem:[#allocation2 + $0x30] sm:$0xf] }
 0x11b   : > { %v1218_v54 = vrot.slane %v1216_v47, 7  ;;  %v1064_v56 = vmax.f32 %v1032_v48, 0.0  ;;  %v5833_v58 = vpop.f32.mrb[13].mxu0 }
 0x11c   : > { %v1520_v60 = vsel %vm6606_vm7, %v1213_v51, %v1519_v46  ;;  %v5834_v62 = vadd.f32 %v5833_v58, %v5832_v52  ;;  %v5835_v63 = vpop.f32.mrb[14].mxu0  ;;  %v1065_v3 = vmax.f32 %v1033_v57, 0.0 }
 0x11d   : > { %1521 = vst [vmem:[#allocation2 + $0x18] sm:$0xf] %v1520_v60  ;;  %v1221_v0 = vor.u32 %v1219_v55, %v1218_v54  ;;  %v1223_v1 = vrot.slane %v1218_v54, 4  ;;  %v5738_v2 = vpack.c.bf16 %v1064_v56, %v1064_v56  ;;  %v5836_v4 = vpop.f32.mrb[15].mxu0 }
 0x11e   : > { %v995_v5 = vmul.f32 %v5834_v62, %v6587_v50  ;;  %v5837_v6 = vadd.f32 %v5836_v4, %v5835_v63  ;;  %v5739_v10 = vpack.c.bf16 %v1065_v3, %v1065_v3 }
 0x11f   : > { %v1222_v7 = vsel %vm6613_vm8, %v1214_v59, %v1221_v0  ;;  %v1524_v8 = vsel %vm6506_vm2, %v1223_v1, %v1523_v61  ;;  %v1225_v9 = vshrl.u32 %v5738_v2, 16  ;;  %v1228_v14 = vshll.u32 %v5738_v2, 16  ;;  %v1537_v2 = vld [vmem:[#allocation2 + $0x38] sm:$0x1] }
 0x120   : > { %1522 = vst.msk [vmem:[#allocation2 + $0x1c] sm:$0xf] %vm390_vm5, %v1222_v7  ;;  %1525 = vst [vmem:[#allocation2 + $0x20] sm:$0x1] %v1524_v8  ;;  %v1034_v11 = vadd.f32 %v6592_v53, %v995_v5  ;;  %v996_v12 = vmul.f32 %v5837_v6, %v6587_v50  ;;  %v1233_v16 = vshrl.u32 %v5739_v10, 16  ;;  %v1236_v21 = vshll.u32 %v5739_v10, 16 }
 0x121   : > { %v1227_v13 = vrot.slane %v1225_v9, 7 }
 0x122   : > { %v1066_v17 = vmax.f32 %v1034_v11, 0.0  ;;  %v1035_v18 = vadd.f32 %v6592_v53, %v996_v12  ;;  %v5838_v19 = vpop.f32.mrb[16].mxu0  ;;  %v1235_v23 = vrot.slane %v1233_v16, 7 }
 0x123   : > { %v1230_v20 = vor.u32 %v1228_v14, %v1227_v13  ;;  %v5839_v22 = vpop.f32.mrb[17].mxu0  ;;  %v1231_v32 = vrot.slane %v1227_v13, 4 }
 0x124   : > { %v5740_v25 = vpack.c.bf16 %v1066_v17, %v1066_v17  ;;  %v1067_v26 = vmax.f32 %v1035_v18, 0.0  ;;  %v5840_v27 = vadd.f32 %v5839_v22, %v5838_v19  ;;  %v5841_v28 = vpop.f32.mrb[18].mxu0  ;;  %v1238_v33 = vor.u32 %v1236_v21, %v1235_v23  ;;  %v5300_v36 = vld [vmem:[#allocation2 + $0x18] sm:$0xf] }
 0x125   : > { %v1527_v29 = vsel %vm6606_vm7, %v1230_v20, %v1526_v15  ;;  %v5842_v31 = vpop.f32.mrb[19].mxu0  ;;  %v1240_v34 = vrot.slane %v1235_v23, 4 }
 0x126   : > { %1528 = vst [vmem:[#allocation2 + $0x24] sm:$0xf] %v1527_v29  ;;  %v1242_v35 = vshrl.u32 %v5740_v25, 16  ;;  %v1245_v37 = vshll.u32 %v5740_v25, 16  ;;  %v5741_v38 = vpack.c.bf16 %v1067_v26, %v1067_v26  ;;  %v997_v39 = vmul.f32 %v5840_v27, %v6587_v50  ;;  %v1540_v26 = vld [vmem:[#allocation2 + $0x3c] sm:$0xf] }
 0x127   : > { %v5843_v40 = vadd.f32 %v5842_v31, %v5841_v28  ;;  %v5301_v42 = vld [vmem:[#allocation2 + $0x1c] sm:$0xf]  ;;  %v1239_v43 = vsel %vm6613_vm8, %v1231_v32, %v1238_v33  ;;  %v1531_v45 = vsel %vm6506_vm2, %v1240_v34, %v1530_v30  ;;  %v6135_v48 = vld [vmem:[#allocation2 + $0x20] ss:$0 sps:$4 sm:$0x11]  }
 0x128   : > { %v1244_v46 = vrot.slane %v1242_v35, 7  ;;  %v6647_v47 = vcombine.low %v5300_v36, %v5301_v42  ;;  %1529 = vst.msk [vmem:[#allocation2 + $0x28] sm:$0xf] %vm390_vm5, %v1239_v43  ;;  %1532 = vst [vmem:[#allocation2 + $0x2c] sm:$0x1] %v1531_v45  ;;  %v1250_v51 = vshrl.u32 %v5741_v38, 16  ;;  %v1036_v52 = vadd.f32 %v6592_v53, %v997_v39 }
 0x129   : > { %v998_v54 = vmul.f32 %v5843_v40, %v6587_v50  ;;  %v1253_v57 = vshll.u32 %v5741_v38, 16  ;;  %v2384_v0 = vshll.u32 %v6135_v48, 16  ;;  %v8098_v39 = vmov 0   ;;  %v1544_v42 = vld [vmem:[#allocation2 + $0x44] sm:$0x1] }
 0x12a   : > { %v1247_v55 = vor.u32 %v1245_v37, %v1244_v46  ;;  %v1248_v56 = vrot.slane %v1244_v46, 4  ;;  %v5844_v58 = vpop.f32.mrb[20].mxu0  ;;  %v2379_v59 = vshll.u32 %v6647_v47, 16  ;;  %v1252_v60 = vrot.slane %v1250_v51, 7  ;;  %5910 = vmatprep.subr.bf16.mxu1 %v8098_v39  ;;  %391 = vst.msk [vmem:[#allocation2] sm:$0xf] %vm390_vm5, %v8098_v39  ;;  %2879 = vmatprep.subr.bf16.mxu0 %v8098_v39 }
 0x12b   : > { %v1068_v61 = vmax.f32 %v1036_v52, 0.0  ;;  %v1037_v62 = vadd.f32 %v6592_v53, %v998_v54  ;;  %v5845_v63 = vpop.f32.mrb[21].mxu0  ;;  %v2377_v5 = vshrl.u32 %v6647_v47, 16  ;;  %v2386_v15 = vrot.slane %v2384_v0, 1  ;;  %392 = vst.msk [vmem:[#allocation2 + $0x4] sm:$0xf] %vm390_vm5, %v8098_v39 }
 0x12c   : > { %v1534_v1 = vsel %vm6606_vm7, %v1247_v55, %v1533_v49  ;;  %v5846_v3 = vadd.f32 %v5845_v63, %v5844_v58  ;;  %v5847_v4 = vpop.f32.mrb[22].mxu0  ;;  %v2381_v6 = vrot.slane %v2379_v59, 1  ;;  %v1255_v7 = vor.u32 %v1253_v57, %v1252_v60  ;;  %394 = vst.msk [vmem:[#allocation2 + $0x8] sm:$0x1] %vm393_vm0, %v8098_v39  ;;  %398 = vst.msk [vmem:[#allocation2 + $0xd4] sm:$0x1] %vm393_vm0, %v8098_v39 }
 0x12d   : > { %1535 = vst [vmem:[#allocation2 + $0x30] sm:$0xf] %v1534_v1  ;;  %v1257_v8 = vrot.slane %v1252_v60, 4  ;;  %v5742_v9 = vpack.c.bf16 %v1068_v61, %v1068_v61  ;;  %v1069_v10 = vmax.f32 %v1037_v62, 0.0  ;;  %v5848_v11 = vpop.f32.mrb[23].mxu0  ;;  %v6167_v55 = vld [vmem:[%s8091_s4 + $0x60] sm:$0xff]  }
 0x12e   : > { %v999_v12 = vmul.f32 %v5846_v3, %v6587_v50  ;;  %v5849_v13 = vadd.f32 %v5848_v11, %v5847_v4  ;;  %v2382_v14 = vor.u32 %v2381_v6, %v2377_v5  ;;  %v1256_v16 = vsel %vm6613_vm8, %v1248_v56, %v1255_v7  ;;  %396 = vst.msk [vmem:[#allocation2 + $0xcc] sm:$0xf] %vm390_vm5, %v8098_v39  ;;  %v1547_v60 = vld [vmem:[#allocation2 + $0x48] sm:$0xf] }
 0x12f   : > { %v1538_v17 = vsel %vm6506_vm2, %v1257_v8, %v1537_v2  ;;  %v1259_v18 = vshrl.u32 %v5742_v9, 16  ;;  %1536 = vst.msk [vmem:[#allocation2 + $0x34] sm:$0xf] %vm390_vm5, %v1256_v16  ;;  %v5743_v19 = vpack.c.bf16 %v1069_v10, %v1069_v10  ;;  %v1262_v25 = vshll.u32 %v5742_v9, 16  ;;  %397 = vst.msk [vmem:[#allocation2 + $0xd0] sm:$0xf] %vm390_vm5, %v8098_v39  ;;  %5922 = vmatpush1.bf16.msra.mxu1 %v6167_v55 }
 0x130   : > { %1539 = vst [vmem:[#allocation2 + $0x38] sm:$0x1] %v1538_v17  ;;  %v1038_v20 = vadd.f32 %v6592_v53, %v999_v12  ;;  %v1000_v21 = vmul.f32 %v5849_v13, %v6587_v50  ;;  %v2387_v22 = vsel %vm2365_vm9, %v2382_v14, %v2386_v15  ;;  %2880 = vmatpush1.bf16.msra.mxu0 %v6167_v55  ;;  %v1551_v2 = vld [vmem:[#allocation2 + $0x50] sm:$0x1]  ;;  %v6169_v8 = vld [vmem:[%s8091_s4 + $0x68] sm:$0xff]  }
 0x131   : > { %v1261_v23 = vrot.slane %v1259_v18, 7  ;;  %5496 = vmatprep.mubr.msk.bf16.mxu0 %vm2004_vm10, %v2387_v22  ;;  %v1267_v27 = vshrl.u32 %v5743_v19, 16  ;;  %v1270_v32 = vshll.u32 %v5743_v19, 16  ;;  %5911 = vmatprep.subr.bf16.mxu1 %v8098_v39 }
 0x132   : > { %v1070_v28 = vmax.f32 %v1038_v20, 0.0  ;;  %v1039_v29 = vadd.f32 %v6592_v53, %v1000_v21  ;;  %v5850_v30 = vpop.f32.mrb[24].mxu0  ;;  %2881 = vmatprep.subr.bf16.mxu0 %v8098_v39 }
 0x133   : > { %v1264_v31 = vor.u32 %v1262_v25, %v1261_v23  ;;  %v5851_v33 = vpop.f32.mrb[25].mxu0  ;;  %v1269_v34 = vrot.slane %v1267_v27, 7  ;;  %v1265_v45 = vrot.slane %v1261_v23, 4  ;;  %5923 = vmatpush1.bf16.msra.mxu1 %v6169_v8  ;;  %v6171_v23 = vld [vmem:[%s8091_s4 + $0x70] sm:$0xff]  }
 0x134   : > { %v5744_v35 = vpack.c.bf16 %v1070_v28, %v1070_v28  ;;  %v1071_v36 = vmax.f32 %v1039_v29, 0.0  ;;  %v5852_v37 = vadd.f32 %v5851_v33, %v5850_v30  ;;  %v5853_v38 = vpop.f32.mrb[26].mxu0  ;;  %2882 = vmatpush1.bf16.msra.mxu0 %v6169_v8  ;;  %5912 = vmatprep.subr.bf16.mxu1 %v8098_v39  ;;  %v1554_v30 = vld [vmem:[#allocation2 + $0x54] sm:$0xf] }
 0x135   : > { %v1541_v40 = vsel %vm6606_vm7, %v1264_v31, %v1540_v26  ;;  %v5854_v43 = vpop.f32.mrb[27].mxu0  ;;  %v1272_v46 = vor.u32 %v1270_v32, %v1269_v34  ;;  %v1274_v48 = vrot.slane %v1269_v34, 4  ;;  %2883 = vmatprep.subr.bf16.mxu0 %v8098_v39 }
 0x136   : > { %1542 = vst [vmem:[#allocation2 + $0x3c] sm:$0xf] %v1541_v40  ;;  %v1276_v49 = vshrl.u32 %v5744_v35, 16  ;;  %v5745_v51 = vpack.c.bf16 %v1071_v36, %v1071_v36  ;;  %v1001_v52 = vmul.f32 %v5852_v37, %v6587_v50  ;;  %v5855_v54 = vadd.f32 %v5854_v43, %v5853_v38  ;;  %v6173_v38 = vld [vmem:[%s8091_s4 + $0x78] sm:$0xff]  }
 0x137   : > { %v1273_v56 = vsel %vm6613_vm8, %v1265_v45, %v1272_v46  ;;  %v1545_v57 = vsel %vm6506_vm2, %v1274_v48, %v1544_v42  ;;  %v1279_v59 = vshll.u32 %v5744_v35, 16  ;;  %5924 = vmatpush1.bf16.msra.mxu1 %v6171_v23 }
 0x138   : > { %v1278_v58 = vrot.slane %v1276_v49, 7  ;;  %1543 = vst.msk [vmem:[#allocation2 + $0x40] sm:$0xf] %vm390_vm5, %v1273_v56  ;;  %1546 = vst [vmem:[#allocation2 + $0x44] sm:$0x1] %v1545_v57  ;;  %v1284_v61 = vshrl.u32 %v5745_v51, 16  ;;  %v1040_v62 = vadd.f32 %v6592_v53, %v1001_v52  ;;  %v1002_v63 = vmul.f32 %v5855_v54, %v6587_v50  ;;  %2884 = vmatpush1.bf16.msra.mxu0 %v6171_v23 }
 0x139   : > { %v1287_v1 = vshll.u32 %v5745_v51, 16  ;;  %5913 = vmatprep.subr.bf16.mxu1 %v8098_v39  ;;  %2885 = vmatprep.subr.bf16.mxu0 %v8098_v39  ;;  %v1558_v49 = vld [vmem:[#allocation2 + $0x5c] sm:$0x1] }
 0x13a   : > { %v1281_v0 = vor.u32 %v1279_v59, %v1278_v58  ;;  %v5856_v3 = vpop.f32.mrb[28].mxu0  ;;  %v1286_v4 = vrot.slane %v1284_v61, 7  ;;  %v1072_v5 = vmax.f32 %v1040_v62, 0.0  ;;  %v1041_v6 = vadd.f32 %v6592_v53, %v1002_v63 }
 0x13b   : > { %v5857_v7 = vpop.f32.mrb[29].mxu0  ;;  %v1282_v9 = vrot.slane %v1278_v58, 4  ;;  %5925 = vmatpush1.bf16.msra.mxu1 %v6173_v38 }
 0x13c   : > { %v1548_v10 = vsel %vm6606_vm7, %v1281_v0, %v1547_v60  ;;  %v5858_v11 = vadd.f32 %v5857_v7, %v5856_v3  ;;  %v5859_v12 = vpop.f32.mrb[30].mxu0  ;;  %v1289_v13 = vor.u32 %v1287_v1, %v1286_v4  ;;  %v1291_v14 = vrot.slane %v1286_v4, 4  ;;  %2886 = vmatpush1.bf16.msra.mxu0 %v6173_v38  ;;  %5914 = vmatprep.subr.bf16.mxu1 %v8098_v39  ;;  %v6175_v60 = vld [vmem:[%s8091_s4 + $0x80] sm:$0xff]  }
 0x13d   : > { %1549 = vst [vmem:[#allocation2 + $0x48] sm:$0xf] %v1548_v10  ;;  %v5746_v15 = vpack.c.bf16 %v1072_v5, %v1072_v5  ;;  %v1073_v16 = vmax.f32 %v1041_v6, 0.0  ;;  %v5860_v17 = vpop.f32.mrb[31].mxu0  ;;  %2887 = vmatprep.subr.bf16.mxu0 %v8098_v39  ;;  %v1561_v1 = vld [vmem:[#allocation2 + $0x60] sm:$0xf] }
 0x13e   : > { %v1003_v18 = vmul.f32 %v5858_v11, %v6587_v50  ;;  %v5861_v19 = vadd.f32 %v5860_v17, %v5859_v12  ;;  %v1290_v20 = vsel %vm6613_vm8, %v1282_v9, %v1289_v13  ;;  %v1552_v21 = vsel %vm6506_vm2, %v1291_v14, %v1551_v2  ;;  %v6177_v12 = vld [vmem:[%s8091_s4 + $0x88] sm:$0xff]  }
 0x13f   : > { %v1293_v22 = vshrl.u32 %v5746_v15, 16  ;;  %1550 = vst.msk [vmem:[#allocation2 + $0x4c] sm:$0xf] %vm390_vm5, %v1290_v20  ;;  %1553 = vst [vmem:[#allocation2 + $0x50] sm:$0x1] %v1552_v21  ;;  %v5747_v25 = vpack.c.bf16 %v1073_v16, %v1073_v16  ;;  %v1296_v29 = vshll.u32 %v5746_v15, 16  ;;  %5926 = vmatpush1.bf16.msra.mxu1 %v6175_v60 }
 0x140   : > { %v1042_v26 = vadd.f32 %v6592_v53, %v1003_v18  ;;  %v1004_v27 = vmul.f32 %v5861_v19, %v6587_v50  ;;  %2888 = vmatpush1.bf16.msra.mxu0 %v6175_v60  ;;  %5915 = vmatprep.subr.bf16.mxu1 %v8098_v39  ;;  %v1565_v15 = vld [vmem:[#allocation2 + $0x68] sm:$0x1] }
 0x141   : > { %v1295_v28 = vrot.slane %v1293_v22, 7  ;;  %v1301_v31 = vshrl.u32 %v5747_v25, 16  ;;  %v1304_v36 = vshll.u32 %v5747_v25, 16  ;;  %2889 = vmatprep.subr.bf16.mxu0 %v8098_v39 }
 0x142   : > { %v1074_v32 = vmax.f32 %v1042_v26, 0.0  ;;  %v1043_v33 = vadd.f32 %v6592_v53, %v1004_v27  ;;  %v5862_v34 = vpop.f32.mrb[32].mxu0 }
 0x143   : > { %v1298_v35 = vor.u32 %v1296_v29, %v1295_v28  ;;  %v5863_v37 = vpop.f32.mrb[33].mxu0  ;;  %v1303_v40 = vrot.slane %v1301_v31, 7  ;;  %v1299_v52 = vrot.slane %v1295_v28, 4  ;;  %5927 = vmatpush1.bf16.msra.mxu1 %v6177_v12  ;;  %v6179_v29 = vld [vmem:[%s8091_s4 + $0x90] sm:$0xff]  }
 0x144   : > { %v5748_v42 = vpack.c.bf16 %v1074_v32, %v1074_v32  ;;  %v1075_v43 = vmax.f32 %v1043_v33, 0.0  ;;  %v5864_v45 = vadd.f32 %v5863_v37, %v5862_v34  ;;  %v5865_v46 = vpop.f32.mrb[34].mxu0  ;;  %2890 = vmatpush1.bf16.msra.mxu0 %v6177_v12  ;;  %5916 = vmatprep.subr.bf16.mxu1 %v8098_v39 }
 0x145   : > { %v1555_v48 = vsel %vm6606_vm7, %v1298_v35, %v1554_v30  ;;  %v5866_v51 = vpop.f32.mrb[35].mxu0  ;;  %v1306_v54 = vor.u32 %v1304_v36, %v1303_v40  ;;  %v1308_v55 = vrot.slane %v1303_v40, 4  ;;  %2891 = vmatprep.subr.bf16.mxu0 %v8098_v39  ;;  %v1568_v35 = vld [vmem:[#allocation2 + $0x6c] sm:$0xf] }
 0x146   : > { %1556 = vst [vmem:[#allocation2 + $0x54] sm:$0xf] %v1555_v48  ;;  %v1310_v56 = vshrl.u32 %v5748_v42, 16  ;;  %v5749_v57 = vpack.c.bf16 %v1075_v43, %v1075_v43  ;;  %v1005_v58 = vmul.f32 %v5864_v45, %v6587_v50  ;;  %v5867_v59 = vadd.f32 %v5866_v51, %v5865_v46  ;;  %v6180_v46 = vld [vmem:[%s8091_s4 + $0x98] sm:$0xff]  }
 0x147   : > { %v1307_v61 = vsel %vm6613_vm8, %v1299_v52, %v1306_v54  ;;  %v1559_v62 = vsel %vm6506_vm2, %v1308_v55, %v1558_v49  ;;  %v1313_v0 = vshll.u32 %v5748_v42, 16  ;;  %5928 = vmatpush1.bf16.msra.mxu1 %v6179_v29 }
 0x148   : > { %v1312_v63 = vrot.slane %v1310_v56, 7  ;;  %1557 = vst.msk [vmem:[#allocation2 + $0x58] sm:$0xf] %vm390_vm5, %v1307_v61  ;;  %1560 = vst [vmem:[#allocation2 + $0x5c] sm:$0x1] %v1559_v62  ;;  %v1318_v2 = vshrl.u32 %v5749_v57, 16  ;;  %v1044_v3 = vadd.f32 %v6592_v53, %v1005_v58  ;;  %v1006_v4 = vmul.f32 %v5867_v59, %v6587_v50  ;;  %2892 = vmatpush1.bf16.msra.mxu0 %v6179_v29 }
 0x149   : > { %v1321_v8 = vshll.u32 %v5749_v57, 16  ;;  %5917 = vmatprep.subr.bf16.mxu1 %v8098_v39  ;;  %2893 = vmatprep.subr.bf16.mxu0 %v8098_v39  ;;  %v1572_v56 = vld [vmem:[#allocation2 + $0x74] sm:$0x1] }
 0x14a   : > { %v1315_v5 = vor.u32 %v1313_v0, %v1312_v63  ;;  %v5868_v6 = vpop.f32.mrb[36].mxu0  ;;  %v1320_v7 = vrot.slane %v1318_v2, 7  ;;  %v1076_v9 = vmax.f32 %v1044_v3, 0.0  ;;  %v1045_v10 = vadd.f32 %v6592_v53, %v1006_v4 }
 0x14b   : > { %v5869_v11 = vpop.f32.mrb[37].mxu0  ;;  %v1316_v13 = vrot.slane %v1312_v63, 4  ;;  %5929 = vmatpush1.bf16.msra.mxu1 %v6180_v46 }
 0x14c   : > { %v1562_v14 = vsel %vm6606_vm7, %v1315_v5, %v1561_v1  ;;  %v5870_v16 = vadd.f32 %v5869_v11, %v5868_v6  ;;  %v5871_v17 = vpop.f32.mrb[38].mxu0  ;;  %v1323_v18 = vor.u32 %v1321_v8, %v1320_v7  ;;  %v1325_v19 = vrot.slane %v1320_v7, 4  ;;  %2894 = vmatpush1.bf16.msra.mxu0 %v6180_v46  ;;  %5918 = vmatprep.subr.bf16.mxu1 %v8098_v39  ;;  %v6181_v1 = vld [vmem:[%s8091_s4 + $0xa0] sm:$0xff]   ;;  %v1575_v6 = vld [vmem:[#allocation2 + $0x78] sm:$0xf] }
 0x14d   : > { %1563 = vst [vmem:[#allocation2 + $0x60] sm:$0xf] %v1562_v14  ;;  %v5750_v20 = vpack.c.bf16 %v1076_v9, %v1076_v9  ;;  %v1077_v21 = vmax.f32 %v1045_v10, 0.0  ;;  %v5872_v22 = vpop.f32.mrb[39].mxu0  ;;  %2895 = vmatprep.subr.bf16.mxu0 %v8098_v39 }
 0x14e   : > { %v1007_v23 = vmul.f32 %v5870_v16, %v6587_v50  ;;  %v5873_v25 = vadd.f32 %v5872_v22, %v5871_v17  ;;  %v1324_v26 = vsel %vm6613_vm8, %v1316_v13, %v1323_v18  ;;  %v1566_v27 = vsel %vm6506_vm2, %v1325_v19, %v1565_v15  ;;  %v6182_v17 = vld [vmem:[%s8091_s4 + $0xa8] sm:$0xff]  }
 0x14f   : > { %v1327_v28 = vshrl.u32 %v5750_v20, 16  ;;  %1564 = vst.msk [vmem:[#allocation2 + $0x64] sm:$0xf] %vm390_vm5, %v1324_v26  ;;  %1567 = vst [vmem:[#allocation2 + $0x68] sm:$0x1] %v1566_v27  ;;  %v5751_v30 = vpack.c.bf16 %v1077_v21, %v1077_v21  ;;  %v1330_v34 = vshll.u32 %v5750_v20, 16  ;;  %5930 = vmatpush1.bf16.msra.mxu1 %v6181_v1 }
 0x150   : > { %v1046_v31 = vadd.f32 %v6592_v53, %v1007_v23  ;;  %v1008_v32 = vmul.f32 %v5873_v25, %v6587_v50  ;;  %2896 = vmatpush1.bf16.msra.mxu0 %v6181_v1  ;;  %5919 = vmatprep.subr.bf16.mxu1 %v8098_v39  ;;  %v1579_v20 = vld [vmem:[#allocation2 + $0x80] sm:$0x1] }
 0x151   : > { %v1329_v33 = vrot.slane %v1327_v28, 7  ;;  %v1335_v36 = vshrl.u32 %v5751_v30, 16  ;;  %v1338_v43 = vshll.u32 %v5751_v30, 16  ;;  %2897 = vmatprep.subr.bf16.mxu0 %v8098_v39 }
 0x152   : > { %v1078_v37 = vmax.f32 %v1046_v31, 0.0  ;;  %v1047_v38 = vadd.f32 %v6592_v53, %v1008_v32  ;;  %v5874_v40 = vpop.f32.mrb[40].mxu0 }
 0x153   : > { %v1332_v42 = vor.u32 %v1330_v34, %v1329_v33  ;;  %v5875_v45 = vpop.f32.mrb[41].mxu0  ;;  %v1337_v48 = vrot.slane %v1335_v36, 7  ;;  %v1333_v58 = vrot.slane %v1329_v33, 4  ;;  %5931 = vmatpush1.bf16.msra.mxu1 %v6182_v17 }
 0x154   : > { %v5752_v49 = vpack.c.bf16 %v1078_v37, %v1078_v37  ;;  %v1079_v51 = vmax.f32 %v1047_v38, 0.0  ;;  %v5876_v52 = vadd.f32 %v5875_v45, %v5874_v40  ;;  %v5877_v54 = vpop.f32.mrb[42].mxu0  ;;  %2898 = vmatpush1.bf16.msra.mxu0 %v6182_v17  ;;  %5920 = vmatprep.subr.bf16.mxu1 %v8098_v39  ;;  %v1582_v40 = vld [vmem:[#allocation2 + $0x84] sm:$0xf] }
 0x155   : > { %v1569_v55 = vsel %vm6606_vm7, %v1332_v42, %v1568_v35  ;;  %v5878_v57 = vpop.f32.mrb[43].mxu0  ;;  %v1340_v59 = vor.u32 %v1338_v43, %v1337_v48  ;;  %v1342_v60 = vrot.slane %v1337_v48, 4  ;;  %2899 = vmatprep.subr.bf16.mxu0 %v8098_v39  ;;  %v6184_v48 = vld [vmem:[%s8091_s4 + $0xb0] sm:$0xff]  }
 0x156   : > { %1570 = vst [vmem:[#allocation2 + $0x6c] sm:$0xf] %v1569_v55  ;;  %v1344_v61 = vshrl.u32 %v5752_v49, 16  ;;  %v5753_v62 = vpack.c.bf16 %v1079_v51, %v1079_v51  ;;  %v1009_v63 = vmul.f32 %v5876_v52, %v6587_v50  ;;  %v5879_v0 = vadd.f32 %v5878_v57, %v5877_v54 }
 0x157   : > { %v1341_v2 = vsel %vm6613_vm8, %v1333_v58, %v1340_v59  ;;  %v1573_v3 = vsel %vm6506_vm2, %v1342_v60, %v1572_v56  ;;  %v1347_v5 = vshll.u32 %v5752_v49, 16  ;;  %5932 = vmatpush1.bf16.msra.mxu1 %v6184_v48  ;;  %v6186_v59 = vld [vmem:[%s8091_s4 + $0xb8] sm:$0xff]  }
 0x158   : > { %v1346_v4 = vrot.slane %v1344_v61, 7  ;;  %1571 = vst.msk [vmem:[#allocation2 + $0x70] sm:$0xf] %vm390_vm5, %v1341_v2  ;;  %1574 = vst [vmem:[#allocation2 + $0x74] sm:$0x1] %v1573_v3  ;;  %v1352_v7 = vshrl.u32 %v5753_v62, 16  ;;  %v1048_v8 = vadd.f32 %v6592_v53, %v1009_v63  ;;  %v1010_v9 = vmul.f32 %v5879_v0, %v6587_v50  ;;  %2900 = vmatpush1.bf16.msra.mxu0 %v6184_v48 }
 0x159   : > { %v1355_v13 = vshll.u32 %v5753_v62, 16  ;;  %v1586_v62 = vld [vmem:[#allocation2 + $0x8c] sm:$0x1]  ;;  %5921 = vmatprep.subr.bf16.mxu1 %v8098_v39  ;;  %2901 = vmatprep.subr.bf16.mxu0 %v8098_v39  ;;  %v6839_v48 = vld [vmem:[%s8090_s3] ss:$0 sm:$0xff] }
 0x15a   : > { %v1349_v10 = vor.u32 %v1347_v5, %v1346_v4  ;;  %v5880_v11 = vpop.f32.mrb[44].mxu0  ;;  %v1354_v12 = vrot.slane %v1352_v7, 7  ;;  %v1080_v14 = vmax.f32 %v1048_v8, 0.0  ;;  %v1049_v15 = vadd.f32 %v6592_v53, %v1010_v9 }
 0x15b   : > { %v5881_v16 = vpop.f32.mrb[45].mxu0  ;;  %v1350_v18 = vrot.slane %v1346_v4, 4  ;;  %5933 = vmatpush1.bf16.msra.mxu1 %v6186_v59 }
 0x15c   : > { %v1576_v19 = vsel %vm6606_vm7, %v1349_v10, %v1575_v6  ;;  %v5882_v21 = vadd.f32 %v5881_v16, %v5880_v11  ;;  %v5883_v22 = vpop.f32.mrb[46].mxu0  ;;  %v1357_v23 = vor.u32 %v1355_v13, %v1354_v12  ;;  %v1359_v25 = vrot.slane %v1354_v12, 4  ;;  %2902 = vmatpush1.bf16.msra.mxu0 %v6186_v59  ;;  %v1589_v13 = vld [vmem:[#allocation2 + $0x90] sm:$0xf]  ;;  %3144 = vmatprep.subr.bf16.mxu1 %v8098_v39 }
 0x15d   : > { %1577 = vst [vmem:[#allocation2 + $0x78] sm:$0xf] %v1576_v19  ;;  %v5754_v26 = vpack.c.bf16 %v1080_v14, %v1080_v14  ;;  %v1081_v27 = vmax.f32 %v1049_v15, 0.0  ;;  %v5884_v28 = vpop.f32.mrb[47].mxu0 }
 0x15e   : > { %v1011_v29 = vmul.f32 %v5882_v21, %v6587_v50  ;;  %v5885_v30 = vadd.f32 %v5884_v28, %v5883_v22  ;;  %v1358_v31 = vsel %vm6613_vm8, %v1350_v18, %v1357_v23  ;;  %v1580_v32 = vsel %vm6506_vm2, %v1359_v25, %v1579_v20 }
 0x15f   : > { %v1361_v33 = vshrl.u32 %v5754_v26, 16  ;;  %1578 = vst.msk [vmem:[#allocation2 + $0x7c] sm:$0xf] %vm390_vm5, %v1358_v31  ;;  %1581 = vst [vmem:[#allocation2 + $0x80] sm:$0x1] %v1580_v32  ;;  %v5755_v34 = vpack.c.bf16 %v1081_v27, %v1081_v27  ;;  %v1364_v38 = vshll.u32 %v5754_v26, 16 }
 0x160   : > { %v1050_v35 = vadd.f32 %v6592_v53, %v1011_v29  ;;  %v1012_v36 = vmul.f32 %v5885_v30, %v6587_v50  ;;  %v1593_v27 = vld [vmem:[#allocation2 + $0x98] sm:$0x1] }
 0x161   : > { %v1363_v37 = vrot.slane %v1361_v33, 7  ;;  %v1369_v42 = vshrl.u32 %v5755_v34, 16  ;;  %v1372_v51 = vshll.u32 %v5755_v34, 16 }
 0x162   : > { %v1082_v43 = vmax.f32 %v1050_v35, 0.0  ;;  %v1051_v45 = vadd.f32 %v6592_v53, %v1012_v36  ;;  %v5886_v46 = vpop.f32.mrb[48].mxu0  ;;  %v6827_v35 = vld [vmem:[%s8089_s2] ss:$0 sm:$0xff] }
 0x163   : > { %v1366_v49 = vor.u32 %v1364_v38, %v1363_v37  ;;  %v5887_v52 = vpop.f32.mrb[49].mxu0  ;;  %v1371_v54 = vrot.slane %v1369_v42, 7  ;;  %v1367_v60 = vrot.slane %v1363_v37, 4 }
 0x164   : > { %v5756_v55 = vpack.c.bf16 %v1082_v43, %v1082_v43  ;;  %v1083_v56 = vmax.f32 %v1051_v45, 0.0  ;;  %v5888_v57 = vadd.f32 %v5887_v52, %v5886_v46  ;;  %v5889_v58 = vpop.f32.mrb[50].mxu0  ;;  %v5286_v7 = vld [vmem:[#allocation2 + $0x78] sm:$0xf] }
 0x165   : > { %v1583_v61 = vsel %vm6606_vm7, %v1366_v49, %v1582_v40  ;;  %v5890_v63 = vpop.f32.mrb[51].mxu0  ;;  %v1374_v0 = vor.u32 %v1372_v51, %v1371_v54  ;;  %v1376_v1 = vrot.slane %v1371_v54, 4 }
 0x166   : > { %1584 = vst [vmem:[#allocation2 + $0x84] sm:$0xf] %v1583_v61  ;;  %v1378_v2 = vshrl.u32 %v5756_v55, 16  ;;  %v1381_v3 = vshll.u32 %v5756_v55, 16  ;;  %v5757_v4 = vpack.c.bf16 %v1083_v56, %v1083_v56  ;;  %v1013_v5 = vmul.f32 %v5888_v57, %v6587_v50  ;;  %v6809_v8 = vld [vmem:[#allocation2 + $0x7c] sm:$0xf] }
 0x167   : > { %v5891_v6 = vadd.f32 %v5890_v63, %v5889_v58  ;;  %v1375_v9 = vsel %vm6613_vm8, %v1367_v60, %v1374_v0  ;;  %v1587_v10 = vsel %vm6506_vm2, %v1376_v1, %v1586_v62  ;;  %v5357_v12 = vcombine.low %v5286_v7, %v6809_v8  ;;  %v6138_v29 = vld [vmem:[#allocation2 + $0x80] ss:$0 sps:$4 sm:$0x11]   ;;  %v1596_v56 = vld [vmem:[#allocation2 + $0x9c] sm:$0xf] }
 0x168   : > { %v1380_v11 = vrot.slane %v1378_v2, 7  ;;  %1585 = vst.msk [vmem:[#allocation2 + $0x88] sm:$0xf] %vm390_vm5, %v1375_v9  ;;  %1588 = vst [vmem:[#allocation2 + $0x8c] sm:$0x1] %v1587_v10  ;;  %v1386_v14 = vshrl.u32 %v5757_v4, 16  ;;  %v1052_v15 = vadd.f32 %v6592_v53, %v1013_v5 }
 0x169   : > { %v1014_v16 = vmul.f32 %v5891_v6, %v6587_v50  ;;  %v1389_v18 = vshll.u32 %v5757_v4, 16  ;;  %1910 = vrot.lane.b32.xlu0 %v5357_v12, %s6348_s23  ;;  %v1600_v5 = vld [vmem:[#allocation2 + $0xa4] sm:$0x1] }
 0x16a   : > { %v1383_v17 = vor.u32 %v1381_v3, %v1380_v11  ;;  %v5892_v19 = vpop.f32.mrb[52].mxu0  ;;  %v1384_v20 = vrot.slane %v1380_v11, 4  ;;  %v1388_v21 = vrot.slane %v1386_v14, 7  ;;  %v1084_v22 = vmax.f32 %v1052_v15, 0.0 }
 0x16b   : > { %v1053_v23 = vadd.f32 %v6592_v53, %v1014_v16  ;;  %v5893_v25 = vpop.f32.mrb[53].mxu0 }
 0x16c   : > { %v1590_v26 = vsel %vm6606_vm7, %v1383_v17, %v1589_v13  ;;  %v5894_v28 = vadd.f32 %v5893_v25, %v5892_v19  ;;  %v5895_v50 = vpop.f32.mrb[54].mxu0  ;;  %v1391_v30 = vor.u32 %v1389_v18, %v1388_v21  ;;  %v1393_v31 = vrot.slane %v1388_v21, 4 }
 0x16d   : > { %1591 = vst [vmem:[#allocation2 + $0x90] sm:$0xf] %v1590_v26  ;;  %v5758_v32 = vpack.c.bf16 %v1084_v22, %v1084_v22  ;;  %v1085_v33 = vmax.f32 %v1053_v23, 0.0  ;;  %v5896_v34 = vpop.f32.mrb[55].mxu0  ;;  %2255 = vrot.lane.b32.xlu0 %v6138_v29, %s6348_s23  ;;  %v5288_v43 = vld [vmem:[#allocation2 + $0x84] sm:$0xf] }
 0x16e   : > { %v1015_v53 = vmul.f32 %v6827_v35, %v5894_v28  ;;  %v5897_v36 = vadd.f32 %v5896_v34, %v5895_v50  ;;  %v1392_v37 = vsel %vm6613_vm8, %v1384_v20, %v1391_v30  ;;  %v1594_v38 = vsel %vm6506_vm2, %v1393_v31, %v1593_v27  ;;  %v5318_v45 = vld [vmem:[#allocation2 + $0x84] sm:$0xf]  ;;  %v1603_v50 = vld [vmem:[#allocation2 + $0xa8] sm:$0xf] }
 0x16f   : > { %v1395_v40 = vshrl.u32 %v5758_v32, 16  ;;  %v1398_v42 = vshll.u32 %v5758_v32, 16  ;;  %1592 = vst.msk [vmem:[#allocation2 + $0x94] sm:$0xf] %vm390_vm5, %v1392_v37  ;;  %1595 = vst [vmem:[#allocation2 + $0x98] sm:$0x1] %v1594_v38  ;;  %v5759_v46 = vpack.c.bf16 %v1085_v33, %v1085_v33 }
 0x170   : > { %v1054_v49 = vadd.f32 %v6839_v48, %v1015_v53  ;;  %v1016_v51 = vmul.f32 %v6827_v35, %v5897_v36  ;;  %v6843_v52 = vld [vmem:[#allocation2 + $0x88] sm:$0xf]  ;;  %v6853_v3 = vld [vmem:[#allocation2 + $0x8c] ss:$0 sps:$4 sm:$0x11]  }
 0x171   : > { %v6845_v54 = vld [vmem:[#allocation2 + $0x88] sm:$0xf]  ;;  %v1397_v55 = vrot.slane %v1395_v40, 7  ;;  %v5358_v57 = vcombine.low %v5288_v43, %v6843_v52  ;;  %v1403_v59 = vshrl.u32 %v5759_v46, 16  ;;  %v1406_v1 = vshll.u32 %v5759_v46, 16 }
 0x172   : > { %v6849_v58 = vcombine.low %v5318_v45, %v6845_v54  ;;  %v1086_v60 = vmax.f32 %v1054_v49, 0.0  ;;  %v1055_v61 = vadd.f32 %v6839_v48, %v1016_v51  ;;  %v5898_v62 = vpop.f32.mrb[56].mxu0  ;;  %v6141_v13 = vld [vmem:[#allocation2 + $0x8c] ss:$0 sps:$4 sm:$0x11]   ;;  %v2582_v15 = vshll.u32 %v6853_v3, 16 }
 0x173   : > { %v1400_v63 = vor.u32 %v1398_v42, %v1397_v55  ;;  %v1401_v0 = vrot.slane %v1397_v55, 4  ;;  %1912 = vrot.lane.b32.xlu1 %v5358_v57, %s6348_s23  ;;  %v5899_v2 = vpop.f32.mrb[57].mxu0  ;;  %v1405_v4 = vrot.slane %v1403_v59, 7 }
 0x174   : > { %v5760_v6 = vpack.c.bf16 %v1086_v60, %v1086_v60  ;;  %v1087_v7 = vmax.f32 %v1055_v61, 0.0  ;;  %v5900_v9 = vadd.f32 %v5899_v2, %v5898_v62  ;;  %v5901_v10 = vpop.f32.mrb[58].mxu0  ;;  %v2577_v14 = vshll.u32 %v6849_v58, 16  ;;  %v5290_v53 = vld [vmem:[#allocation2 + $0x90] sm:$0xf] }
 0x175   : > { %v1597_v11 = vsel %vm6606_vm7, %v1400_v63, %v1596_v56  ;;  %v5902_v12 = vpop.f32.mrb[59].mxu0  ;;  %v1408_v16 = vor.u32 %v1406_v1, %v1405_v4  ;;  %v1410_v17 = vrot.slane %v1405_v4, 4  ;;  %v2575_v29 = vshrl.u32 %v6849_v58, 16  ;;  %v1607_v56 = vld [vmem:[#allocation2 + $0xb0] sm:$0x1] }
 0x176   : > { %1598 = vst [vmem:[#allocation2 + $0x9c] sm:$0xf] %v1597_v11  ;;  %v1412_v18 = vshrl.u32 %v5760_v6, 16  ;;  %v1415_v19 = vshll.u32 %v5760_v6, 16  ;;  %v5761_v20 = vpack.c.bf16 %v1087_v7, %v1087_v7  ;;  %v1017_v21 = vmul.f32 %v6827_v35, %v5900_v9  ;;  %v6866_v30 = vld [vmem:[#allocation2 + $0x94] sm:$0xf] }
 0x177   : > { %v5903_v22 = vadd.f32 %v5902_v12, %v5901_v10  ;;  %2257 = vrot.lane.b32.xlu1 %v6141_v13, %s6348_s23  ;;  %v2579_v23 = vrot.slane %v2577_v14, 1  ;;  %v6144_v25 = vld [vmem:[#allocation2 + $0x98] ss:$0 sps:$4 sm:$0x11]   ;;  %v1409_v26 = vsel %vm6613_vm8, %v1401_v0, %v1408_v16  ;;  %v1601_v27 = vsel %vm6506_vm2, %v1410_v17, %v1600_v5 }
 0x178   : > { %v1414_v28 = vrot.slane %v1412_v18, 7  ;;  %1599 = vst.msk [vmem:[#allocation2 + $0xa0] sm:$0xf] %vm390_vm5, %v1409_v26  ;;  %1602 = vst [vmem:[#allocation2 + $0xa4] sm:$0x1] %v1601_v27  ;;  %v1420_v31 = vshrl.u32 %v5761_v20, 16  ;;  %v1056_v32 = vadd.f32 %v6839_v48, %v1017_v21  ;;  %v5359_v40 = vcombine.low %v5290_v53, %v6866_v30 }
 0x179   : > { %v1018_v33 = vmul.f32 %v6827_v35, %v5903_v22  ;;  %v2584_v34 = vrot.slane %v2582_v15, 1  ;;  %v1423_v37 = vshll.u32 %v5761_v20, 16  ;;  %v2580_v38 = vor.u32 %v2579_v23, %v2575_v29  ;;  %v1610_v15 = vld [vmem:[#allocation2 + $0xb4] sm:$0xf] }
 0x17a   : > { %v1417_v36 = vor.u32 %v1415_v19, %v1414_v28  ;;  %v5904_v42 = vpop.f32.mrb[60].mxu0  ;;  %v1418_v43 = vrot.slane %v1414_v28, 4  ;;  %v1422_v45 = vrot.slane %v1420_v31, 7  ;;  %v1088_v46 = vmax.f32 %v1056_v32, 0.0  ;;  %1914 = vrot.lane.b32.xlu0 %v5359_v40, %s6348_s23 }
 0x17b   : > { %v1057_v49 = vadd.f32 %v6839_v48, %v1018_v33  ;;  %2259 = vrot.lane.b32.xlu1 %v6144_v25, %s6348_s23  ;;  %v5905_v51 = vpop.f32.mrb[61].mxu0  ;;  %v2585_v57 = vsel %vm2365_vm9, %v2580_v38, %v2584_v34 }
 0x17c   : > { %v1604_v55 = vsel %vm6606_vm7, %v1417_v36, %v1603_v50  ;;  %v5906_v59 = vadd.f32 %v5905_v51, %v5904_v42  ;;  %v5907_v60 = vpop.f32.mrb[62].mxu0  ;;  %v1425_v61 = vor.u32 %v1423_v37, %v1422_v45  ;;  %v1427_v62 = vrot.slane %v1422_v45, 4  ;;  %5505 = vmatprep.mubr.msk.bf16.mxu1 %vm2004_vm10, %v2585_v57  ;;  %v1614_v50 = vld [vmem:[#allocation2 + $0xbc] sm:$0x1]  ;;  %v1617_v42 = vld [vmem:[#allocation2 + $0xc0] sm:$0xf] }
 0x17d   : > { %1605 = vst [vmem:[#allocation2 + $0xa8] sm:$0xf] %v1604_v55  ;;  %v5762_v63 = vpack.c.bf16 %v1088_v46, %v1088_v46  ;;  %v1089_v0 = vmax.f32 %v1057_v49, 0.0  ;;  %v5908_v1 = vpop.f32.mrb[63].mxu0  ;;  %v5292_v20 = vld [vmem:[#allocation2 + $0x9c] sm:$0xf] }
 0x17e   : > { %v1019_v2 = vmul.f32 %v6827_v35, %v5906_v59  ;;  %v5909_v4 = vadd.f32 %v5908_v1, %v5907_v60  ;;  %v1426_v5 = vsel %vm6613_vm8, %v1418_v43, %v1425_v61  ;;  %v1608_v6 = vsel %vm6506_vm2, %v1427_v62, %v1607_v56  ;;  %v1621_v57 = vld [vmem:[#allocation2 + $0xc8] sm:$0x1] }
 0x17f   : > { %v1429_v7 = vshrl.u32 %v5762_v63, 16  ;;  %v1432_v9 = vshll.u32 %v5762_v63, 16  ;;  %1606 = vst.msk [vmem:[#allocation2 + $0xac] sm:$0xf] %vm390_vm5, %v1426_v5  ;;  %1609 = vst [vmem:[#allocation2 + $0xb0] sm:$0x1] %v1608_v6  ;;  %v5763_v10 = vpack.c.bf16 %v1089_v0, %v1089_v0 }
 0x180   : > { %v1058_v11 = vadd.f32 %v6839_v48, %v1019_v2  ;;  %v1020_v12 = vmul.f32 %v6827_v35, %v5909_v4  ;;  %v6146_v13 = vld [vmem:[#allocation2 + $0xa4] ss:$0 sps:$4 sm:$0x11]   ;;  %v6887_v16 = vld [vmem:[#allocation2 + $0xa0] sm:$0xf] }
 0x181   : > { %v1431_v14 = vrot.slane %v1429_v7, 7  ;;  %v1437_v17 = vshrl.u32 %v5763_v10, 16  ;;  %2261 = vrot.lane.b32.xlu1 %v6146_v13, %s6348_s23  ;;  %v1440_v22 = vshll.u32 %v5763_v10, 16  ;;  %v5360_v23 = vcombine.low %v5292_v20, %v6887_v16  ;;  %v6917_v2 = vld [vmem:[#allocation2 + $0x1c] sm:$0xf] }
 0x182   : > { %v1090_v18 = vmax.f32 %v1058_v11, 0.0  ;;  %v1059_v19 = vadd.f32 %v6839_v48, %v1020_v12  ;;  %v5270_v6 = vld [vmem:[#allocation2 + $0x18] sm:$0xf]  ;;  %v6923_v7 = vld [vmem:[#allocation2 + $0x10] sm:$0xf] }
 0x183   : > { %v1434_v21 = vor.u32 %v1432_v9, %v1431_v14  ;;  %v1435_v25 = vrot.slane %v1431_v14, 4  ;;  %v1439_v26 = vrot.slane %v1437_v17, 7  ;;  %1916 = vrot.lane.b32.xlu0 %v5360_v23, %s6348_s23  ;;  %v5349_v9 = vcombine.low %v5270_v6, %v6917_v2  ;;  %v5268_v10 = vld [vmem:[#allocation2 + $0xc] sm:$0xf]  ;;  %v6927_v11 = vld [vmem:[#allocation2 + $0x34] sm:$0xf] }
 0x184   : > { %v5764_v27 = vpack.c.bf16 %v1090_v18, %v1090_v18  ;;  %v1091_v35 = vmax.f32 %v1059_v19, 0.0  ;;  %v5294_v38 = vld [vmem:[#allocation2 + $0xa8] sm:$0xf]  ;;  %v5348_v12 = vcombine.low %v5268_v10, %v6923_v7  ;;  %v5274_v13 = vld [vmem:[#allocation2 + $0x30] sm:$0xf] }
 0x185   : > { %v1611_v28 = vsel %vm6606_vm7, %v1434_v21, %v1610_v15  ;;  %v1442_v29 = vor.u32 %v1440_v22, %v1439_v26  ;;  %v1444_v48 = vrot.slane %v1439_v26, 4  ;;  %v6931_v14 = vld [vmem:[#allocation2 + $0x28] sm:$0xf]  ;;  %v5351_v15 = vcombine.low %v5274_v13, %v6927_v11  ;;  %v5272_v17 = vld [vmem:[#allocation2 + $0x24] sm:$0xf] }
 0x186   : > { %1612 = vst [vmem:[#allocation2 + $0xb4] sm:$0xf] %v1611_v28  ;;  %v1446_v31 = vshrl.u32 %v5764_v27, 16  ;;  %v1449_v32 = vshll.u32 %v5764_v27, 16  ;;  %v5765_v33 = vpack.c.bf16 %v1091_v35, %v1091_v35  ;;  %v6899_v40 = vld [vmem:[#allocation2 + $0xac] sm:$0xf]  ;;  %v5350_v19 = vcombine.low %v5272_v17, %v6931_v14 }
 0x187   : > { %v6148_v34 = vld [vmem:[#allocation2 + $0xb0] ss:$0 sps:$4 sm:$0x11]   ;;  %v1443_v53 = vsel %vm6613_vm8, %v1435_v25, %v1442_v29  ;;  %v1615_v36 = vsel %vm6506_vm2, %v1444_v48, %v1614_v50  ;;  %v5361_v45 = vcombine.low %v5294_v38, %v6899_v40  ;;  %v6935_v18 = vld [vmem:[#allocation2 + $0x4c] sm:$0xf] }
 0x188   : > { %v1448_v37 = vrot.slane %v1446_v31, 7  ;;  %1613 = vst.msk [vmem:[#allocation2 + $0xb8] sm:$0xf] %vm390_vm5, %v1443_v53  ;;  %1616 = vst [vmem:[#allocation2 + $0xbc] sm:$0x1] %v1615_v36  ;;  %v1454_v43 = vshrl.u32 %v5765_v33, 16  ;;  %2263 = vrot.lane.b32.xlu1 %v6148_v34, %s6348_s23 }
 0x189   : > { %v1457_v55 = vshll.u32 %v5765_v33, 16  ;;  %1918 = vrot.lane.b32.xlu0 %v5361_v45, %s6348_s23  ;;  %v5278_v20 = vld [vmem:[#allocation2 + $0x48] sm:$0xf]  ;;  %v6939_v21 = vld [vmem:[#allocation2 + $0x40] sm:$0xf] }
 0x18a   : > { %v1451_v46 = vor.u32 %v1449_v32, %v1448_v37  ;;  %v1452_v49 = vrot.slane %v1448_v37, 4  ;;  %v1456_v51 = vrot.slane %v1454_v43, 7  ;;  %v5353_v22 = vcombine.low %v5278_v20, %v6935_v18  ;;  %v5276_v23 = vld [vmem:[#allocation2 + $0x3c] sm:$0xf]  ;;  %v6943_v25 = vld [vmem:[#allocation2 + $0x64] sm:$0xf] }
 0x18b   : > { %v5352_v26 = vcombine.low %v5276_v23, %v6939_v21  ;;  %v5282_v27 = vld [vmem:[#allocation2 + $0x60] sm:$0xf]  ;;  %v6947_v35 = vld [vmem:[#allocation2 + $0x58] sm:$0xf]  ;;  %v5280_v50 = vld [vmem:[#allocation2 + $0x54] sm:$0xf] }
 0x18c   : > { %v1618_v56 = vsel %vm6606_vm7, %v1451_v46, %v1617_v42  ;;  %v1459_v59 = vor.u32 %v1457_v55, %v1456_v51  ;;  %v1461_v60 = vrot.slane %v1456_v51, 4  ;;  %v5355_v28 = vcombine.low %v5282_v27, %v6943_v25  ;;  %v6162_v48 = vld [vmem:[#allocation2 + $0x14] ss:$0 sps:$4 sm:$0x11]   ;;  %v5284_v31 = vld [vmem:[#allocation2 + $0x6c] sm:$0xf] }
 0x18d   : > { %1619 = vst [vmem:[#allocation2 + $0xc0] sm:$0xf] %v1618_v56  ;;  %v5296_v0 = vld [vmem:[#allocation2 + $0xb4] sm:$0xf]  ;;  %v5354_v29 = vcombine.low %v5280_v50, %v6947_v35  ;;  %v6953_v32 = vld [vmem:[#allocation2 + $0x70] sm:$0xf] }
 0x18e   : > { %v1460_v61 = vsel %vm6613_vm8, %v1452_v49, %v1459_v59  ;;  %v1622_v62 = vsel %vm6506_vm2, %v1461_v60, %v1621_v57  ;;  %v5313_v33 = vld [vmem:[#allocation2 + $0x64] sm:$0xf]  ;;  %v6271_v34 = vld [vmem:[#allocation2 + $0x68] ss:$0 sps:$4 sm:$0x11]   ;;  %v5356_v38 = vcombine.low %v5284_v31, %v6953_v32 }
 0x18f   : > { %1620 = vst.msk [vmem:[#allocation2 + $0xc4] sm:$0xf] %vm390_vm5, %v1460_v61  ;;  %1623 = vst [vmem:[#allocation2 + $0xc8] sm:$0x1] %v1622_v62  ;;  %v6912_v1 = vld [vmem:[#allocation2 + $0xb8] sm:$0xf] }
 0x190   : > { %v6150_v63 = vld [vmem:[#allocation2 + $0xbc] ss:$0 sps:$4 sm:$0x11]   ;;  %v5362_v44 = vcombine.low %v5296_v0, %v6912_v1  ;;  %v5315_v53 = vld [vmem:[#allocation2 + $0x70] sm:$0xf] }
 0x191   : > { %2265 = vrot.lane.b32.xlu1 %v6150_v63, %s6348_s23  ;;  %v6275_v36 = vld [vmem:[#allocation2 + $0x74] ss:$0 sps:$4 sm:$0x11]   ;;  %v5562_v37 = vld [vmem:[#allocation2 + $0x60] sm:$0xe]  ;;  %v3650_v63 = vrot.slane %v6271_v34, 1 }
 0x192   : > { %1920 = vrot.lane.b32.xlu0 %v5362_v44, %s6348_s23  ;;  %v6164_v42 = vld [vmem:[#allocation2 + $0x20] ss:$0 sps:$4 sm:$0x11]   ;;  %v5540_v43 = vld [vmem:[#allocation2 + $0xc] sm:$0xe]  ;;  %v5610_v55 = vcombine.low %v5562_v37, %v5313_v33 }
 0x193   : > { %v6958_v45 = vld [vmem:[#allocation2 + $0x94] sm:$0xf]  ;;  %v6960_v46 = vld [vmem:[#allocation2 + $0x98] ss:$0 sps:$4 sm:$0x11]  }
 0x194   : > { %v5298_v4 = vld [vmem:[#allocation2 + $0xc0] sm:$0xf]  ;;  %v5317_v49 = vld [vmem:[#allocation2 + $0x7c] sm:$0xf]  ;;  %v5541_v56 = vld [vmem:[#allocation2 + $0x18] sm:$0xe] }
 0x195   : > { %v6279_v51 = vld [vmem:[#allocation2 + $0x80] ss:$0 sps:$4 sm:$0x11]   ;;  %v6964_v59 = vld [vmem:[#allocation2 + $0xa4] ss:$0 sps:$4 sm:$0x11]  }
 0x196   : > { %v6152_v24 = vld [vmem:[#allocation2 + $0xc8] ss:$0 sps:$4 sm:$0x11]   ;;  %v6919_v5 = vld [vmem:[#allocation2 + $0xc4] sm:$0xf]  ;;  %v3649_v62 = vrot.slane %v5610_v55, 1 }
 0x197   : > { %2267 = vrot.lane.b32.xlu1 %v6152_v24, %s6348_s23  ;;  %v5363_v41 = vcombine.low %v5298_v4, %v6919_v5  ;;  %v6962_v57 = vld [vmem:[#allocation2 + $0xa0] sm:$0xf]  ;;  %v6967_v60 = vld [vmem:[#allocation2 + $0xac] sm:$0xf]  ;;  %v5564_v44 = vld [vmem:[#allocation2 + $0x78] sm:$0xe]  ;;  %v5588_v24 = vcombine.low %v5540_v43, %v6923_v7 }
 0x198   : > { %v6969_v61 = vld [vmem:[#allocation2 + $0xb0] ss:$0 sps:$4 sm:$0x11]   ;;  %v5563_v0 = vld [vmem:[#allocation2 + $0x6c] sm:$0xe]  ;;  %v5612_v10 = vcombine.low %v5564_v44, %v5317_v49  ;;  %v6983_v20 = vsel %vm3609_vm11, %v3649_v62, %v3650_v63  ;;  %v3662_v7 = vrot.slane %v6279_v51, 1 }
 0x199   : > { %1922 = vrot.lane.b32.xlu0 %v5363_v41, %s6348_s23  ;;  %v6972_v4 = vld [vmem:[#allocation2 + $0xb8] sm:$0xf]  ;;  %v6974_v41 = vld [vmem:[#allocation2 + $0xbc] ss:$0 sps:$4 sm:$0x11]   ;;  %v5611_v6 = vcombine.low %v5563_v0, %v5315_v53  ;;  %8123 = vst [vmem:[#allocation3_spill] sm:$0xff] %v6983_v20 }
 0x19a   : > { %v6166_v13 = vld [vmem:[#allocation2 + $0x2c] ss:$0 sps:$4 sm:$0x11]   ;;  %v6978_v17 = vld [vmem:[#allocation2 + $0xc4] sm:$0xf]  ;;  %v3661_v27 = vrot.slane %v5612_v10, 1 }
 0x19b   : > { %1894 = vrot.lane.b32.xlu1 %v5349_v9, %s6348_s23  ;;  %v3656_v9 = vrot.slane %v6275_v36, 1  ;;  %v5566_v23 = vld [vmem:[#allocation2 + $0x90] sm:$0xe]  ;;  %v3680_v33 = vrot.slane %v6964_v59, 1  ;;  %v5568_v34 = vld [vmem:[#allocation2 + $0xa8] sm:$0xe] }
 0x19c   : > { %v5614_v50 = vcombine.low %v5566_v23, %v6958_v45  ;;  %v6996_v53 = vsel %vm3609_vm11, %v3661_v27, %v3662_v7  ;;  %v5616_v36 = vcombine.low %v5568_v34, %v6967_v60  ;;  %v5569_v37 = vld [vmem:[#allocation2 + $0xb4] sm:$0xe]  ;;  %v3686_v43 = vrot.slane %v6969_v61, 1  ;;  %v5570_v51 = vld [vmem:[#allocation2 + $0xc0] sm:$0xe] }
 0x19d   : > { %1892 = vrot.lane.b32.xlu0 %v5348_v12, %s6348_s23  ;;  %v5565_v12 = vld [vmem:[#allocation2 + $0x84] sm:$0xe]  ;;  %8125 = vst [vmem:[#allocation5_spill] sm:$0xff] %v6996_v53  ;;  %v5617_v49 = vcombine.low %v5569_v37, %v6972_v4  ;;  %v3692_v62 = vrot.slane %v6974_v41, 1  ;;  %v5618_v63 = vcombine.low %v5570_v51, %v6978_v17  ;;  %v5543_v23 = vld [vmem:[#allocation2 + $0x30] sm:$0xe] }
 0x19e   : > { %v6168_v0 = vld [vmem:[#allocation2 + $0x38] ss:$0 sps:$4 sm:$0x11]   ;;  %v6172_v27 = vld [vmem:[#allocation2 + $0x50] ss:$0 sps:$4 sm:$0x11]  }
 0x19f   : > { %1898 = vrot.lane.b32.xlu1 %v5351_v15, %s6348_s23  ;;  %v5589_v15 = vcombine.low %v5541_v56, %v6917_v2  ;;  %v3685_v56 = vrot.slane %v5616_v36, 1  ;;  %v5320_v51 = vld [vmem:[#allocation2 + $0x90] sm:$0xf]  ;;  %v7296_v20 = vld [vmem:[#allocation2 + $0x1c] sm:$0xf] }
 0x1a1   : > { %1896 = vrot.lane.b32.xlu0 %v5350_v19, %s6348_s23  ;;  %v6980_v19 = vld [vmem:[#allocation2 + $0xc8] ss:$0 sps:$4 sm:$0x11]   ;;  %v7016_v10 = vsel %vm3609_vm11, %v3685_v56, %v3686_v43  ;;  %v5550_v43 = vld [vmem:[#allocation2 + $0x84] sm:$0xe]  ;;  %v7052_v56 = vcombine.low %v5320_v51, %v6958_v45 }
 0x1a2   : > { %8129 = vst [vmem:[#allocation9_spill] sm:$0xff] %v7016_v10  ;;  %v5554_v45 = vld [vmem:[#allocation2 + $0xb4] sm:$0xe] }
 0x1a3   : > { %1902 = vrot.lane.b32.xlu1 %v5353_v22, %s6348_s23  ;;  %v5613_v22 = vcombine.low %v5565_v12, %v6845_v54  ;;  %v3697_v12 = vrot.slane %v5618_v63, 1  ;;  %v1646_v63 = vld [vmem:[#allocation2 + $0x6c] sm:$0xf] }
 0x1a5   : > { %1900 = vrot.lane.b32.xlu0 %v5352_v26, %s6348_s23  ;;  %v3655_v26 = vrot.slane %v5611_v6, 1  ;;  %v3667_v2 = vrot.slane %v5613_v22, 1  ;;  %v3698_v6 = vrot.slane %v6980_v19, 1  ;;  %v6170_v22 = vld [vmem:[#allocation2 + $0x44] ss:$0 sps:$4 sm:$0x11]  }
 0x1a7   : > { %1906 = vrot.lane.b32.xlu1 %v5355_v28, %s6348_s23  ;;  %v3668_v28 = vrot.slane %v6853_v3, 1  ;;  %v6993_v54 = vsel %vm3609_vm11, %v3655_v26, %v3656_v9  ;;  %v3673_v3 = vrot.slane %v5614_v50, 1  ;;  %v5542_v9 = vld [vmem:[#allocation2 + $0x24] sm:$0xe]  ;;  %v5591_v26 = vcombine.low %v5543_v23, %v6927_v11  ;;  %v5546_v11 = vld [vmem:[#allocation2 + $0x54] sm:$0xe] }
 0x1a8   : > { %8124 = vst [vmem:[#allocation4_spill] sm:$0xff] %v6993_v54  ;;  %v6174_v50 = vld [vmem:[#allocation2 + $0x5c] ss:$0 sps:$4 sm:$0x11]  }
 0x1a9   : > { %1904 = vrot.lane.b32.xlu0 %v5354_v29, %s6348_s23  ;;  %v5567_v29 = vld [vmem:[#allocation2 + $0x9c] sm:$0xe] }
 0x1aa   : > { %v5615_v31 = vcombine.low %v5567_v29, %v6962_v57  ;;  %v5545_v29 = vld [vmem:[#allocation2 + $0x48] sm:$0xe]  ;;  %v5322_v23 = vld [vmem:[#allocation2 + $0x9c] sm:$0xf] }
 0x1ab   : > { %2237 = vrot.lane.b32.xlu1 %v6162_v48, %s6348_s23  ;;  %v3674_v48 = vrot.slane %v6960_v46, 1 }
 0x1ad   : > { %1908 = vrot.lane.b32.xlu0 %v5356_v38, %s6348_s23  ;;  %v7001_v38 = vsel %vm3609_vm11, %v3667_v2, %v3668_v28  ;;  %v7006_v55 = vsel %vm3609_vm11, %v3673_v3, %v3674_v48  ;;  %v5544_v28 = vld [vmem:[#allocation2 + $0x3c] sm:$0xe]  ;;  %v5593_v2 = vcombine.low %v5545_v29, %v6935_v18  ;;  %v6176_v48 = vld [vmem:[#allocation2 + $0x68] ss:$0 sps:$4 sm:$0x11]  }
 0x1ae   : > { %8126 = vst [vmem:[#allocation6_spill] sm:$0xff] %v7001_v38  ;;  %8127 = vst [vmem:[#allocation7_spill] sm:$0xff] %v7006_v55  ;;  %v5549_v3 = vld [vmem:[#allocation2 + $0x78] sm:$0xe]  ;;  %v5548_v18 = vld [vmem:[#allocation2 + $0x6c] sm:$0xe] }
 0x1af   : > { %2239 = vrot.lane.b32.xlu1 %v6164_v42, %s6348_s23  ;;  %v3679_v42 = vrot.slane %v5615_v31, 1  ;;  %v5594_v31 = vcombine.low %v5546_v11, %v6947_v35  ;;  %v5597_v36 = vcombine.low %v5549_v3, %v6809_v8  ;;  %v5596_v37 = vcombine.low %v5548_v18, %v6953_v32  ;;  %v5552_v32 = vld [vmem:[#allocation2 + $0x9c] sm:$0xe]  ;;  %v6234_v38 = vld [vmem:[%s8091_s4 + $0xc8] sm:$0xff]  }
 0x1b1   : > { %3449 = vrot.lane.b32.xlu0 %v5588_v24, %s6348_s23  ;;  %v7012_v44 = vsel %vm3609_vm11, %v3679_v42, %v3680_v33  ;;  %v3691_v24 = vrot.slane %v5617_v49, 1  ;;  %v6178_v33 = vld [vmem:[#allocation2 + $0x74] ss:$0 sps:$4 sm:$0x11]   ;;  %v5551_v42 = vld [vmem:[#allocation2 + $0x90] sm:$0xe]  ;;  %v5598_v49 = vcombine.low %v5550_v43, %v6843_v52 }
 0x1b2   : > { %8128 = vst [vmem:[#allocation8_spill] sm:$0xff] %v7012_v44  ;;  %v5599_v35 = vcombine.low %v5551_v42, %v6866_v30  ;;  %v5600_v30 = vcombine.low %v5552_v32, %v6887_v16  ;;  %v5555_v52 = vld [vmem:[#allocation2 + $0xc0] sm:$0xe]  ;;  %v6189_v43 = vld [vmem:[#allocation2 + $0x80] ss:$0 sps:$4 sm:$0x11]  }
 0x1b3   : > { %2241 = vrot.lane.b32.xlu1 %v6166_v13, %s6348_s23  ;;  %v5590_v13 = vcombine.low %v5542_v9, %v6931_v14  ;;  %v7021_v7 = vsel %vm3609_vm11, %v3691_v24, %v3692_v62  ;;  %v5592_v14 = vcombine.low %v5544_v28, %v6939_v21  ;;  %v5547_v21 = vld [vmem:[#allocation2 + $0x60] sm:$0xe]  ;;  %v7054_v62 = vld [vmem:[#allocation2 + $0x70] sm:$0xf]  ;;  %v5603_v24 = vcombine.low %v5555_v52, %v6919_v5 }
 0x1b4   : > { %8130 = vst [vmem:[#allocation10_spill] sm:$0xff] %v7021_v7  ;;  %v5595_v34 = vcombine.low %v5547_v21, %v6943_v25  ;;  %v5553_v25 = vld [vmem:[#allocation2 + $0xa8] sm:$0xe]  ;;  %v6188_v21 = vld [vmem:[%s8091_s4] sm:$0xff]  }
 0x1b5   : > { %3451 = vrot.lane.b32.xlu0 %v5589_v15, %s6348_s23  ;;  %v7024_v15 = vsel %vm3609_vm11, %v3697_v12, %v3698_v6  ;;  %v5601_v8 = vcombine.low %v5553_v25, %v6899_v40  ;;  %v2599_v40 = vshll.u32 %v7052_v56, 16  ;;  %v5602_v12 = vcombine.low %v5554_v45, %v6912_v1 }
 0x1b6   : > { %8131 = vst [vmem:[#allocation11_spill] sm:$0xff] %v7024_v15  ;;  %v2604_v1 = vshll.u32 %v6960_v46, 16 }
 0x1b7   : > { %2243 = vrot.lane.b32.xlu1 %v6168_v0, %s6348_s23  ;;  %v5341_v0 = vcombine.low %v1646_v63, %v7054_v62  ;;  %v7103_v63 = vld [vmem:[#allocation2 + $0x88] sm:$0xf] }
 0x1b9   : > { %3453 = vrot.lane.b32.xlu0 %v5590_v13, %s6348_s23  ;;  %v6185_v13 = vld [vmem:[#allocation2 + $0x74] ss:$0 sps:$4 sm:$0x11]  }
 0x1bb   : > { %2245 = vrot.lane.b32.xlu1 %v6170_v22, %s6348_s23  ;;  %v2601_v22 = vrot.slane %v2599_v40, 1 }
 0x1bd   : > { %3455 = vrot.lane.b32.xlu0 %v5591_v26, %s6348_s23 }
 0x1bf   : > { %2247 = vrot.lane.b32.xlu1 %v6172_v27, %s6348_s23  ;;  %v7070_v27 = vcombine.low %v5322_v23, %v6962_v57 }
 0x1c1   : > { %3457 = vrot.lane.b32.xlu0 %v5592_v14, %s6348_s23  ;;  %v7075_v14 = vld [vmem:[#allocation2 + $0x7c] sm:$0xf]  ;;  %v2619_v52 = vshrl.u32 %v7070_v27, 16 }
 0x1c3   : > { %2249 = vrot.lane.b32.xlu1 %v6174_v50, %s6348_s23  ;;  %v2597_v50 = vshrl.u32 %v7052_v56, 16 }
 0x1c5   : > { %3459 = vrot.lane.b32.xlu0 %v5593_v2, %s6348_s23  ;;  %v2602_v11 = vor.u32 %v2601_v22, %v2597_v50 }
 0x1c7   : > { %2251 = vrot.lane.b32.xlu1 %v6176_v48, %s6348_s23  ;;  %v1648_v48 = vld [vmem:[#allocation2 + $0x78] sm:$0xf] }
 0x1c8   : > { %v5342_v57 = vcombine.low %v1648_v48, %v7075_v14 }
 0x1c9   : > { %3461 = vrot.lane.b32.xlu0 %v5594_v31, %s6348_s23 }
 0x1cb   : > { %2253 = vrot.lane.b32.xlu1 %v6178_v33, %s6348_s23 }
 0x1cd   : > { %3463 = vrot.lane.b32.xlu0 %v5595_v34, %s6348_s23  ;;  %v2621_v34 = vshll.u32 %v7070_v27, 16 }
 0x1cf   : > { %3467 = vrot.lane.b32.xlu1 %v5597_v36, %s6348_s23  ;;  %v2606_v36 = vrot.slane %v2604_v1, 1  ;;  %v2623_v25 = vrot.slane %v2621_v34, 1 }
 0x1d1   : > { %3465 = vrot.lane.b32.xlu0 %v5596_v37, %s6348_s23  ;;  %v2607_v42 = vsel %vm2365_vm9, %v2602_v11, %v2606_v36  ;;  %v2624_v45 = vor.u32 %v2623_v25, %v2619_v52 }
 0x1d3   : > { %3471 = vrot.lane.b32.xlu1 %v5599_v35, %s6348_s23  ;;  %v5324_v35 = vld [vmem:[#allocation2 + $0xa8] sm:$0xf] }
 0x1d4   : > { %v7097_v51 = vcombine.low %v5324_v35, %v6967_v60  ;;  %v1650_v60 = vld [vmem:[#allocation2 + $0x84] sm:$0xf] }
 0x1d5   : > { %3469 = vrot.lane.b32.xlu0 %v5598_v49, %s6348_s23  ;;  %v6194_v49 = vld [vmem:[%s8091_s4 + $0x8] sm:$0xff]   ;;  %v5343_v23 = vcombine.low %v1650_v60, %v7103_v63 }
 0x1d6   : > { %v2641_v36 = vshrl.u32 %v7097_v51, 16 }
 0x1d7   : > { %3475 = vrot.lane.b32.xlu1 %v5601_v8, %s6348_s23 }
 0x1d9   : > { %3473 = vrot.lane.b32.xlu0 %v5600_v30, %s6348_s23 }
 0x1db   : > { %v1911_v6 = vpop.permute.xlu0 %1910  ;;  %3479 = vrot.lane.b32.xlu1 %v5603_v24, %s6348_s23 }
 0x1dc   : > { %v7063_v9 = vsel %vm2004_vm10, %v5341_v0, %v1911_v6  ;;  %v2626_v0 = vshll.u32 %v6964_v59, 16  ;;  %v6192_v6 = vld [vmem:[#allocation2 + $0x8c] ss:$0 sps:$4 sm:$0x11]   ;;  %v6197_v59 = vld [vmem:[%s8091_s4 + $0x10] sm:$0xff]  }
 0x1dd   : > { %v2566_v16 = vshll.u32 %v7063_v9, 16  ;;  %3477 = vrot.lane.b32.xlu0 %v5602_v12, %s6348_s23  ;;  %v2564_v29 = vshrl.u32 %v7063_v9, 16  ;;  %v2643_v12 = vshll.u32 %v7097_v51, 16 }
 0x1de   : > { %v2628_v50 = vrot.slane %v2626_v0, 1 }
 0x1df   : > { %v2568_v26 = vrot.slane %v2566_v16, 1  ;;  %v2256_v5 = vpop.permute.xlu0 %2255 }
 0x1e0   : > { %v7073_v28 = vsel %vm2004_vm10, %v6185_v13, %v2256_v5  ;;  %v2629_v11 = vsel %vm2365_vm9, %v2624_v45, %v2628_v50 }
 0x1e1   : > { %v2570_v2 = vshll.u32 %v7073_v28, 16  ;;  %v2569_v31 = vor.u32 %v2568_v26, %v2564_v29 }
 0x1e3   : > { %v2572_v33 = vrot.slane %v2570_v2, 1  ;;  %v5326_v2 = vld [vmem:[#allocation2 + $0xb4] sm:$0xf] }
 0x1e5   : > { %v1913_v3 = vpop.permute.xlu1 %1912  ;;  %v2573_v18 = vsel %vm2365_vm9, %v2569_v31, %v2572_v33  ;;  %v2645_v31 = vrot.slane %v2643_v12, 1  ;;  %v7125_v33 = vcombine.low %v5326_v2, %v6972_v4  ;;  %v7136_v4 = vld [vmem:[#allocation2 + $0x94] sm:$0xf] }
 0x1e6   : > { %v7087_v46 = vsel %vm2004_vm10, %v5342_v57, %v1913_v3  ;;  %2984 = vmatmul.mubr.bf16.vlgmr.msra.gmra.mrb[0].mxu1 %v2573_v18  ;;  %v2648_v18 = vshll.u32 %v6969_v61, 16 }
 0x1e7   : > { %v2588_v37 = vshll.u32 %v7087_v46, 16  ;;  %3145 = vmatpush1.bf16.msra.mxu1 %v6188_v21  ;;  %5506 = vmatprep.mubr.msk.bf16.mxu1 %vm2004_vm10, %v2607_v42  ;;  %v2586_v24 = vshrl.u32 %v7087_v46, 16  ;;  %v6200_v21 = vld [vmem:[%s8091_s4 + $0x18] sm:$0xff]   ;;  %v2663_v50 = vshrl.u32 %v7125_v33, 16 }
 0x1e8   : > { %3146 = vmatprep.subr.bf16.mxu1 %v8098_v39  ;;  %v6198_v42 = vld [vmem:[#allocation2 + $0x98] ss:$0 sps:$4 sm:$0x11]   ;;  %v2650_v0 = vrot.slane %v2648_v18, 1 }
 0x1e9   : > { %v2590_v8 = vrot.slane %v2588_v37, 1  ;;  %v2258_v32 = vpop.permute.xlu1 %2257 }
 0x1ea   : > { %v7101_v30 = vsel %vm2004_vm10, %v6189_v43, %v2258_v32  ;;  %v2646_v43 = vor.u32 %v2645_v31, %v2641_v36  ;;  %v6203_v32 = vld [vmem:[%s8091_s4 + $0x20] sm:$0xff]   ;;  %v5331_v31 = vld [vmem:[#allocation2 + $0xd0] sm:$0xf] }
 0x1eb   : > { %v2592_v40 = vshll.u32 %v7101_v30, 16  ;;  %3147 = vmatpush1.bf16.msra.mxu1 %v6194_v49  ;;  %v2591_v16 = vor.u32 %v2590_v8, %v2586_v24  ;;  %v2665_v49 = vshll.u32 %v7125_v33, 16  ;;  %v1652_v8 = vld [vmem:[#allocation2 + $0x90] sm:$0xf] }
 0x1ec   : > { %3148 = vmatprep.subr.bf16.mxu1 %v8098_v39  ;;  %v1915_v5 = vpop.permute.xlu0 %1914  ;;  %v5344_v61 = vcombine.low %v1652_v8, %v7136_v4  ;;  %v2651_v45 = vsel %vm2365_vm9, %v2646_v43, %v2650_v0  ;;  %v6214_v0 = vld [vmem:[%s8091_s4 + $0x38] sm:$0xff]  }
 0x1ed   : > { %v2594_v13 = vrot.slane %v2592_v40, 1  ;;  %v2260_v22 = vpop.permute.xlu1 %2259  ;;  %v7119_v1 = vsel %vm2004_vm10, %v5343_v23, %v1915_v5  ;;  %v2667_v12 = vrot.slane %v2665_v49, 1  ;;  %v7158_v23 = vld [vmem:[#allocation2 + $0xa0] sm:$0xf]  ;;  %v1654_v5 = vld [vmem:[#allocation2 + $0x9c] sm:$0xf] }
 0x1ee   : > { %v7116_v26 = vsel %vm2004_vm10, %v6192_v6, %v2260_v22  ;;  %v2610_v48 = vshll.u32 %v7119_v1, 16  ;;  %v2608_v34 = vshrl.u32 %v7119_v1, 16  ;;  %v5328_v6 = vld [vmem:[#allocation2 + $0xc0] sm:$0xf] }
 0x1ef   : > { %v2595_v29 = vsel %vm2365_vm9, %v2591_v16, %v2594_v13  ;;  %v2614_v57 = vshll.u32 %v7116_v26, 16  ;;  %3149 = vmatpush1.bf16.msra.mxu1 %v6197_v59  ;;  %v7153_v16 = vcombine.low %v5328_v6, %v6978_v17  ;;  %v6206_v59 = vld [vmem:[%s8091_s4 + $0x28] sm:$0xff]   ;;  %v2670_v17 = vshll.u32 %v6974_v41, 16  ;;  %v6209_v41 = vld [vmem:[%s8091_s4 + $0x30] sm:$0xff]  }
 0x1f0   : > { %2992 = vmatmul.mubr.bf16.gmra.mrb[4].mxu1 %v2595_v29  ;;  %v2612_v3 = vrot.slane %v2610_v48, 1  ;;  %3150 = vmatprep.subr.bf16.mxu1 %v8098_v39 }
 0x1f1   : > { %5507 = vmatprep.mubr.msk.bf16.mxu1 %vm2004_vm10, %v2629_v11  ;;  %v2616_v25 = vrot.slane %v2614_v57, 1  ;;  %8132 = vst [vmem:[#allocation12_spill] sm:$0xff] %v7153_v16  ;;  %v5330_v11 = vld [vmem:[#allocation2 + $0xcc] sm:$0xf]  ;;  %v2672_v43 = vrot.slane %v2670_v17, 1 }
 0x1f2   : > { %v2613_v37 = vor.u32 %v2612_v3, %v2608_v34  ;;  %v6204_v57 = vld [vmem:[#allocation2 + $0xa4] ss:$0 sps:$4 sm:$0x11]   ;;  %v2668_v34 = vor.u32 %v2667_v12, %v2663_v50  ;;  %v2687_v3 = vshll.u32 %v7153_v16, 16  ;;  %v7179_v49 = vcombine.low %v5330_v11, %v5331_v31  ;;  %v7190_v12 = vld [vmem:[#allocation2 + $0xac] sm:$0xf] }
 0x1f3   : > { %v2262_v35 = vpop.permute.xlu1 %2261  ;;  %3151 = vmatpush1.bf16.msra.mxu1 %v6200_v21  ;;  %v5345_v21 = vcombine.low %v1654_v5, %v7158_v23  ;;  %v6210_v50 = vld [vmem:[#allocation2 + $0xb0] ss:$0 sps:$4 sm:$0x11]   ;;  %v6217_v31 = vld [vmem:[%s8091_s4 + $0x40] sm:$0xff]  }
 0x1f4   : > { %v7143_v52 = vsel %vm2004_vm10, %v6198_v42, %v2262_v35  ;;  %3152 = vmatprep.subr.bf16.mxu1 %v8098_v39  ;;  %v2617_v40 = vsel %vm2365_vm9, %v2613_v37, %v2616_v25  ;;  %8133 = vst [vmem:[#allocation13_spill] sm:$0xff] %v7179_v49 }
 0x1f5   : > { %v1917_v24 = vpop.permute.xlu0 %1916  ;;  %v2636_v13 = vshll.u32 %v7143_v52, 16 }
 0x1f6   : > { %v7149_v60 = vsel %vm2004_vm10, %v5344_v61, %v1917_v24  ;;  %v2689_v61 = vrot.slane %v2687_v3, 1  ;;  %v2707_v3 = vshrl.u32 %v7179_v49, 16 }
 0x1f7   : > { %v2632_v22 = vshll.u32 %v7149_v60, 16  ;;  %3153 = vmatpush1.bf16.msra.mxu1 %v6203_v32  ;;  %v2630_v29 = vshrl.u32 %v7149_v60, 16  ;;  %v2638_v36 = vrot.slane %v2636_v13, 1  ;;  %v2673_v32 = vsel %vm2365_vm9, %v2668_v34, %v2672_v43 }
 0x1f8   : > { %3000 = vmatmul.mubr.bf16.gmra.mrb[8].mxu1 %v2617_v40  ;;  %3154 = vmatprep.subr.bf16.mxu1 %v8098_v39  ;;  %v2685_v13 = vshrl.u32 %v7153_v16, 16 }
 0x1f9   : > { %5508 = vmatprep.mubr.msk.bf16.mxu1 %vm2004_vm10, %v2651_v45  ;;  %v2634_v2 = vrot.slane %v2632_v22, 1  ;;  %v6221_v45 = vld [vmem:[#allocation2 + $0xd4] ss:$0 sps:$4 sm:$0x11]   ;;  %v2692_v22 = vshll.u32 %v6980_v19, 16 }
 0x1fa   : > { %v2264_v48 = vpop.permute.xlu1 %2263 }
 0x1fb   : > { %v2635_v18 = vor.u32 %v2634_v2, %v2630_v29  ;;  %v1919_v37 = vpop.permute.xlu0 %1918  ;;  %3155 = vmatpush1.bf16.msra.mxu1 %v6206_v59  ;;  %v7173_v42 = vsel %vm2004_vm10, %v6204_v57, %v2264_v48  ;;  %v2709_v59 = vshll.u32 %v7179_v49, 16  ;;  %v1656_v29 = vld [vmem:[#allocation2 + $0xa8] sm:$0xf]  ;;  %v2690_v2 = vor.u32 %v2689_v61, %v2685_v13  ;;  %v6315_v49 = vld [vmem:[#allocation2 + $0x70] sm:$0xf] }
 0x1fc   : > { %v7176_v35 = vsel %vm2004_vm10, %v5345_v21, %v1919_v37  ;;  %3156 = vmatprep.subr.bf16.mxu1 %v8098_v39  ;;  %v2658_v24 = vshll.u32 %v7173_v42, 16  ;;  %v5346_v11 = vcombine.low %v1656_v29, %v7190_v12  ;;  %v2714_v57 = vshll.u32 %v6221_v45, 16  ;;  %v1658_v45 = vld [vmem:[#allocation2 + $0xb4] sm:$0xf] }
 0x1fd   : > { %v2654_v25 = vshll.u32 %v7176_v35, 16  ;;  %v2639_v8 = vsel %vm2365_vm9, %v2635_v18, %v2638_v36  ;;  %v2652_v40 = vshrl.u32 %v7176_v35, 16  ;;  %v2694_v34 = vrot.slane %v2692_v22, 1  ;;  %v6215_v22 = vld [vmem:[#allocation2 + $0xbc] ss:$0 sps:$4 sm:$0x11]  }
 0x1fe   : > { %v2660_v48 = vrot.slane %v2658_v24, 1  ;;  %v2711_v36 = vrot.slane %v2709_v59, 1 }
 0x1ff   : > { %v2656_v6 = vrot.slane %v2654_v25, 1  ;;  %3157 = vmatpush1.bf16.msra.mxu1 %v6209_v41  ;;  %v2695_v43 = vsel %vm2365_vm9, %v2690_v2, %v2694_v34 }
 0x200   : > { %3008 = vmatmul.mubr.bf16.gmra.mrb[12].mxu1 %v2639_v8  ;;  %3158 = vmatprep.subr.bf16.mxu1 %v8098_v39  ;;  %v7213_v8 = vld [vmem:[#allocation2 + $0xb8] sm:$0xf]  ;;  %v2712_v24 = vor.u32 %v2711_v36, %v2707_v3 }
 0x201   : > { %5509 = vmatprep.mubr.msk.bf16.mxu1 %vm2004_vm10, %v2673_v32  ;;  %v2657_v5 = vor.u32 %v2656_v6, %v2652_v40  ;;  %v6219_v32 = vld [vmem:[%s8091_s4 + $0x48] sm:$0xff]   ;;  %v2716_v40 = vrot.slane %v2714_v57, 1  ;;  %v5347_v59 = vcombine.low %v1658_v45, %v7213_v8 }
 0x203   : > { %v2266_v17 = vpop.permute.xlu1 %2265  ;;  %3159 = vmatpush1.bf16.msra.mxu1 %v6214_v0  ;;  %v2661_v37 = vsel %vm2365_vm9, %v2657_v5, %v2660_v48  ;;  %v2717_v48 = vsel %vm2365_vm9, %v2712_v24, %v2716_v40  ;;  %v5302_v24 = vld [vmem:[#allocation2 + $0x24] sm:$0xf] }
 0x204   : > { %v7201_v21 = vsel %vm2004_vm10, %v6210_v50, %v2266_v17  ;;  %v1921_v19 = vpop.permute.xlu0 %1920  ;;  %3160 = vmatprep.subr.bf16.mxu1 %v8098_v39  ;;  %v6222_v17 = vld [vmem:[%s8091_s4 + $0x50] sm:$0xff]  }
 0x205   : > { %v7206_v18 = vsel %vm2004_vm10, %v5346_v11, %v1921_v19  ;;  %v2680_v25 = vshll.u32 %v7201_v21, 16  ;;  %v1628_v19 = vld [vmem:[#allocation2] sm:$0xf] }
 0x206   : > { %8134 = vst [vmem:[#allocation14_spill] sm:$0xff] %v7206_v18  ;;  %v2676_v41 = vshll.u32 %v7206_v18, 16  ;;  %v2674_v61 = vshrl.u32 %v7206_v18, 16 }
 0x207   : > { %3161 = vmatpush1.bf16.msra.mxu1 %v6217_v31  ;;  %v2682_v5 = vrot.slane %v2680_v25, 1  ;;  %v7243_v25 = vld [vmem:[#allocation2 + $0x28] sm:$0xf] }
 0x208   : > { %3016 = vmatmul.mubr.bf16.gmra.mrb[16].mxu1 %v2661_v37  ;;  %v2678_v0 = vrot.slane %v2676_v41, 1  ;;  %3162 = vmatprep.subr.bf16.mxu1 %v8098_v39  ;;  %v7236_v37 = vld [vmem:[#allocation2 + $0x4] sm:$0xf]  ;;  %8136 = vst [vmem:[#allocation16_spill] sm:$0xff] %v7243_v25  ;;  %v5365_v45 = vcombine.low %v5302_v24, %v7243_v25 }
 0x209   : > { %5510 = vmatprep.mubr.msk.bf16.mxu1 %vm2004_vm10, %v2695_v43  ;;  %v2268_v6 = vpop.permute.xlu1 %2267  ;;  %v6223_v43 = vld [vmem:[%s8091_s4 + $0x58] sm:$0xff]  }
 0x20a   : > { %v2679_v13 = vor.u32 %v2678_v0, %v2674_v61  ;;  %v7225_v29 = vsel %vm2004_vm10, %v6215_v22, %v2268_v6  ;;  %v5332_v0 = vcombine.low %v1628_v19, %v7236_v37  ;;  %v7266_v19 = vld [vmem:[#allocation2 + $0x2c] ss:$0 sps:$4 sm:$0x11]  }
 0x20b   : > { %v1923_v50 = vpop.permute.xlu0 %1922  ;;  %3163 = vmatpush1.bf16.msra.mxu1 %v6219_v32  ;;  %v2702_v34 = vshll.u32 %v7225_v29, 16  ;;  %8138 = vst [vmem:[#allocation18_spill] sm:$0xff] %v7266_v19  ;;  %v2406_v15 = vshll.u32 %v7266_v19, 16 }
 0x20c   : > { %v7228_v2 = vsel %vm2004_vm10, %v5347_v59, %v1923_v50  ;;  %3164 = vmatprep.subr.bf16.mxu1 %v8098_v39  ;;  %v2683_v31 = vsel %vm2365_vm9, %v2679_v13, %v2682_v5  ;;  %v2401_v50 = vshll.u32 %v5365_v45, 16 }
 0x20d   : > { %8135 = vst [vmem:[#allocation15_spill] sm:$0xff] %v7228_v2  ;;  %v2698_v11 = vshll.u32 %v7228_v2, 16  ;;  %v1895_v57 = vpop.permute.xlu1 %1894  ;;  %v2696_v3 = vshrl.u32 %v7228_v2, 16  ;;  %v2704_v40 = vrot.slane %v2702_v34, 1  ;;  %v5304_v34 = vld [vmem:[#allocation2 + $0x30] sm:$0xf] }
 0x20e   : > { %v2408_v54 = vrot.slane %v2406_v15, 1  ;;  %v1632_v2 = vld [vmem:[#allocation2 + $0x18] sm:$0xf] }
 0x20f   : > { %v2700_v36 = vrot.slane %v2698_v11, 1  ;;  %v1893_v41 = vpop.permute.xlu0 %1892  ;;  %3165 = vmatpush1.bf16.msra.mxu1 %v6222_v17  ;;  %v7260_v17 = vld [vmem:[#allocation2 + $0x34] sm:$0xf] }
 0x210   : > { %3024 = vmatmul.mubr.bf16.gmra.mrb[20].mxu1 %v2683_v31  ;;  %3166 = vmatprep.subr.bf16.mxu1 %v8098_v39  ;;  %v2007_v59 = vsel %vm2004_vm10, %v5332_v0, %v1893_v41  ;;  %8137 = vst [vmem:[#allocation17_spill] sm:$0xff] %v7260_v17 }
 0x211   : > { %5511 = vmatprep.mubr.msk.bf16.mxu1 %vm2004_vm10, %v2717_v48  ;;  %v2701_v32 = vor.u32 %v2700_v36, %v2696_v3  ;;  %v7245_v61 = vpop.permute.xlu1 %1898  ;;  %v7262_v48 = vld [vmem:[#allocation2 + $0x10] sm:$0xf]  ;;  %v2368_v11 = vshll.u32 %v2007_v59, 16  ;;  %v6225_v3 = vld [vmem:[#allocation2 + $0x8] ss:$0 sps:$4 sm:$0x11]   ;;  %v7269_v36 = vcombine.low %v5304_v34, %v7260_v17 }
 0x212   : > { %v2366_v44 = vshrl.u32 %v2007_v59, 16  ;;  %v5306_v17 = vld [vmem:[#allocation2 + $0x3c] sm:$0xf] }
 0x213   : > { %v7248_v6 = vpop.permute.xlu0 %1896  ;;  %3167 = vmatpush1.bf16.msra.mxu1 %v6223_v43  ;;  %v2705_v13 = vsel %vm2365_vm9, %v2701_v32, %v2704_v40  ;;  %v1630_v43 = vld [vmem:[#allocation2 + $0xc] sm:$0xf]  ;;  %v2403_v32 = vrot.slane %v2401_v50, 1  ;;  %v2370_v24 = vrot.slane %v2368_v11, 1  ;;  %v2423_v10 = vshll.u32 %v7269_v36, 16 }
 0x214   : > { %3867 = vmatprep.subr.bf16.mxu1 %v8098_v39  ;;  %v5333_v0 = vcombine.low %v1630_v43, %v7262_v48  ;;  %v2399_v39 = vshrl.u32 %v5365_v45, 16  ;;  %v6227_v11 = vld [vmem:[#allocation2 + $0x14] ss:$0 sps:$4 sm:$0x11]  }
 0x215   : > { %v7253_v22 = vpop.permute.xlu1 %1902 }
 0x216   : > { %v7280_v7 = vsel %vm2004_vm10, %v5333_v0, %v1895_v57  ;;  %v2404_v43 = vor.u32 %v2403_v32, %v2399_v39  ;;  %v7291_v57 = vld [vmem:[#allocation2 + $0x38] ss:$0 sps:$4 sm:$0x11]   ;;  %v7293_v0 = vld [vmem:[#allocation2 + $0x40] sm:$0xf]  ;;  %v2425_v32 = vrot.slane %v2423_v10, 1 }
 0x217   : > { %v7258_v5 = vpop.permute.xlu0 %1900  ;;  %8140 = vst [vmem:[#allocation19_spill] sm:$0xff] %v7291_v57  ;;  %8141 = vst [vmem:[#allocation20_spill] sm:$0xff] %v7293_v0  ;;  %v2421_v10 = vshrl.u32 %v7269_v36, 16 }
 0x218   : > { %3032 = vmatmul.mubr.bf16.gmra.mrb[24].mxu1 %v2705_v13  ;;  %v3305_v13 = vld [vmem:[#allocation2] sm:$0xe]  ;;  %v2409_v25 = vsel %vm2365_vm9, %v2404_v43, %v2408_v54  ;;  %v3306_v43 = vld [vmem:[#allocation2 + $0xc] sm:$0xe] }
 0x219   : > { %5524 = vmatprep.mubr.msk.bf16.mxu1 %vm2004_vm10, %v6647_v47  ;;  %v7264_v31 = vpop.permute.xlu1 %1906  ;;  %v6224_v47 = vld [vmem:[%s8091_s4 + $0xc0] sm:$0xff]  }
 0x21b   : > { %v7271_v41 = vpop.permute.xlu0 %1904 }
 0x21d   : > { %v2238_v40 = vpop.permute.xlu1 %2237 }
 0x21e   : > { %v2319_v34 = vsel %vm2004_vm10, %v6225_v3, %v2238_v40  ;;  %v5572_v3 = vcombine.low %v3305_v13, %v7236_v37  ;;  %v8139_v40 = vmov 0  }
 0x21f   : > { %v2372_v55 = vshll.u32 %v2319_v34, 16  ;;  %v7284_v50 = vpop.permute.xlu0 %1908  ;;  %v3611_v54 = vrot.slane %v2319_v34, 1 }
 0x220   : > { %3177 = vmatmul.mubr.bf16.vlgmr.msra.gmra.mrb[28].mxu1 %v2007_v59  ;;  %v2371_v59 = vor.u32 %v2370_v24, %v2366_v44  ;;  %v6244_v44 = vld [vmem:[%s8091_s4 + $0xd0] sm:$0xff]   ;;  %v2428_v24 = vshll.u32 %v7291_v57, 16  ;;  %v7335_v57 = vld [vmem:[#allocation2 + $0x4c] sm:$0xf] }
 0x221   : > { %3868 = vmatpush1.bf16.msra.mxu1 %v6224_v47  ;;  %5525 = vmatprep.mubr.msk.bf16.mxu1 %vm2004_vm10, %v5365_v45  ;;  %v2374_v47 = vrot.slane %v2372_v55, 1  ;;  %v2240_v53 = vpop.permute.xlu1 %2239  ;;  %v2390_v45 = vshll.u32 %v7280_v7, 16  ;;  %v7302_v55 = vcombine.low %v5306_v17, %v7293_v0  ;;  %8144 = vst [vmem:[#allocation23_spill] sm:$0xff] %v7335_v57 }
 0x222   : > { %3869 = vmatprep.subr.bf16.mxu1 %v8139_v40  ;;  %v2322_v39 = vsel %vm2004_vm10, %v6227_v11, %v2240_v53  ;;  %v5334_v53 = vcombine.low %v1632_v2, %v7296_v20 }
 0x223   : > { %v2394_v19 = vshll.u32 %v2322_v39, 16  ;;  %v3450_v37 = vpop.permute.xlu0 %3449  ;;  %v2375_v13 = vsel %vm2365_vm9, %v2371_v59, %v2374_v47  ;;  %v2392_v11 = vrot.slane %v2390_v45, 1  ;;  %v6230_v59 = vld [vmem:[#allocation2 + $0x20] ss:$0 sps:$4 sm:$0x11]   ;;  %v2426_v47 = vor.u32 %v2425_v32, %v2421_v10 }
 0x224   : > { %v3531_v15 = vsel %vm2004_vm10, %v5572_v3, %v3450_v37  ;;  %2912 = vmatmul.mubr.bf16.vlgmr.msra.gmra.mrb[64].mxu0 %v2375_v13  ;;  %v5573_v3 = vcombine.low %v3306_v43, %v7262_v48  ;;  %v7317_v2 = vsel %vm2004_vm10, %v5334_v53, %v7248_v6  ;;  %v2388_v13 = vshrl.u32 %v7280_v7, 16  ;;  %v3307_v45 = vld [vmem:[#allocation2 + $0x18] sm:$0xe]  ;;  %v7331_v53 = vld [vmem:[#allocation2 + $0x44] ss:$0 sps:$4 sm:$0x11]  }
 0x225   : > { %3870 = vmatpush1.bf16.msra.mxu1 %v6234_v38  ;;  %v3610_v38 = vrot.slane %v3531_v15, 1  ;;  %v2242_v17 = vpop.permute.xlu1 %2241  ;;  %5497 = vmatprep.mubr.msk.bf16.mxu0 %vm2004_vm10, %v2409_v25  ;;  %v2396_v37 = vrot.slane %v2394_v19, 1  ;;  %v2445_v25 = vshll.u32 %v7302_v55, 16  ;;  %v6253_v48 = vld [vmem:[%s8091_s4 + $0xd8] sm:$0xff]   ;;  %v2430_v32 = vrot.slane %v2428_v24, 1  ;;  %8143 = vst [vmem:[#allocation22_spill] sm:$0xff] %v7331_v53 }
 0x226   : > { %3871 = vmatprep.subr.bf16.mxu1 %v8139_v40  ;;  %v2325_v6 = vsel %vm2004_vm10, %v6230_v59, %v2242_v17  ;;  %v2412_v0 = vshll.u32 %v7317_v2, 16  ;;  %v1634_v17 = vld [vmem:[#allocation2 + $0x24] sm:$0xf] }
 0x227   : > { %v3452_v34 = vpop.permute.xlu0 %3451  ;;  %v7327_v15 = vsel %vm3609_vm11, %v3610_v38, %v3611_v54  ;;  %v5574_v54 = vcombine.low %v3307_v45, %v7296_v20  ;;  %v2431_v38 = vsel %vm2365_vm9, %v2426_v47, %v2430_v32  ;;  %v2416_v59 = vshll.u32 %v2325_v6, 16 }
 0x228   : > { %3185 = vmatmul.mubr.bf16.gmra.mrb[32].mxu1 %v7280_v7  ;;  %8142 = vst [vmem:[#allocation21_spill] sm:$0xff] %v7327_v15  ;;  %v3534_v19 = vsel %vm2004_vm10, %v5573_v3, %v3452_v34  ;;  %v1635_v7 = vld [vmem:[#allocation2 + $0x28] sm:$0xf]  ;;  %v2447_v34 = vrot.slane %v2445_v25, 1  ;;  %v2450_v45 = vshll.u32 %v7331_v53, 16 }
 0x229   : > { %5526 = vmatprep.mubr.msk.bf16.mxu1 %vm2004_vm10, %v7269_v36  ;;  %3872 = vmatpush1.bf16.msra.mxu1 %v6244_v44  ;;  %v3617_v36 = vrot.slane %v2322_v39, 1  ;;  %v2393_v44 = vor.u32 %v2392_v11, %v2388_v13  ;;  %v3616_v10 = vrot.slane %v3534_v19, 1  ;;  %v2244_v43 = vpop.permute.xlu1 %2243  ;;  %v5308_v15 = vld [vmem:[#allocation2 + $0x48] sm:$0xf]  ;;  %v6265_v39 = vld [vmem:[%s8091_s4 + $0xe0] sm:$0xff]   ;;  %v5335_v47 = vcombine.low %v1634_v17, %v1635_v7 }
 0x22a   : > { %3873 = vmatprep.subr.bf16.mxu1 %v8139_v40  ;;  %v6235_v13 = vld [vmem:[#allocation2 + $0x2c] ss:$0 sps:$4 sm:$0x11]   ;;  %v7349_v19 = vcombine.low %v5308_v15, %v7335_v57 }
 0x22b   : > { %v3454_v3 = vpop.permute.xlu0 %3453  ;;  %v2397_v24 = vsel %vm2365_vm9, %v2393_v44, %v2396_v37  ;;  %v7344_v11 = vsel %vm3609_vm11, %v3616_v10, %v3617_v36  ;;  %v3623_v37 = vrot.slane %v2325_v6, 1  ;;  %v3308_v44 = vld [vmem:[#allocation2 + $0x24] sm:$0xe]  ;;  %v2443_v36 = vshrl.u32 %v7302_v55, 16 }
 0x22c   : > { %8145 = vst [vmem:[#allocation24_spill] sm:$0xff] %v7344_v11  ;;  %v3537_v20 = vsel %vm2004_vm10, %v5574_v54, %v3454_v3  ;;  %2920 = vmatmul.mubr.bf16.gmra.mrb[68].mxu0 %v2397_v24  ;;  %v2328_v10 = vsel %vm2004_vm10, %v6235_v13, %v2244_v43  ;;  %v6238_v54 = vld [vmem:[#allocation2 + $0x38] ss:$0 sps:$4 sm:$0x11]   ;;  %v5575_v17 = vcombine.low %v3308_v44, %v1635_v7  ;;  %v2418_v3 = vrot.slane %v2416_v59, 1  ;;  %v6273_v43 = vld [vmem:[%s8091_s4 + $0xe8] sm:$0xff]  }
 0x22d   : > { %3874 = vmatpush1.bf16.msra.mxu1 %v6253_v48  ;;  %v3622_v25 = vrot.slane %v3537_v20, 1  ;;  %v2414_v48 = vrot.slane %v2412_v0, 1  ;;  %v2246_v32 = vpop.permute.xlu1 %2245  ;;  %5498 = vmatprep.mubr.msk.bf16.mxu0 %vm2004_vm10, %v2431_v38  ;;  %v7358_v15 = vsel %vm2004_vm10, %v5335_v47, %v7245_v61  ;;  %v2410_v6 = vshrl.u32 %v7317_v2, 16  ;;  %v1637_v38 = vld [vmem:[#allocation2 + $0x34] sm:$0xf] }
 0x22e   : > { %3875 = vmatprep.subr.bf16.mxu1 %v8139_v40  ;;  %v2448_v24 = vor.u32 %v2447_v34, %v2443_v36  ;;  %v3309_v13 = vld [vmem:[#allocation2 + $0x30] sm:$0xe]  ;;  %v2452_v59 = vrot.slane %v2450_v45, 1  ;;  %v3629_v20 = vrot.slane %v2328_v10, 1  ;;  %v7373_v44 = vld [vmem:[#allocation2 + $0x58] sm:$0xf]  ;;  %v7376_v36 = vsel %vm2004_vm10, %v6238_v54, %v2246_v32 }
 0x22f   : > { %v3456_v0 = vpop.permute.xlu0 %3455  ;;  %v7367_v7 = vsel %vm3609_vm11, %v3622_v25, %v3623_v37  ;;  %8147 = vst [vmem:[#allocation26_spill] sm:$0xff] %v7373_v44  ;;  %v5576_v37 = vcombine.low %v3309_v13, %v1637_v38  ;;  %v7378_v25 = vld [vmem:[#allocation2 + $0x40] sm:$0xf]  ;;  %v2438_v45 = vshll.u32 %v2328_v10, 16  ;;  %v7489_v11 = vld [vmem:[#allocation2 + $0x58] sm:$0xf] }
 0x230   : > { %3193 = vmatmul.mubr.bf16.gmra.mrb[36].mxu1 %v7317_v2  ;;  %8146 = vst [vmem:[#allocation25_spill] sm:$0xff] %v7367_v7  ;;  %v3540_v61 = vsel %vm2004_vm10, %v5575_v17, %v3456_v0  ;;  %v2467_v2 = vshll.u32 %v7349_v19, 16  ;;  %v7380_v17 = vld [vmem:[#allocation2 + $0x50] ss:$0 sps:$4 sm:$0x11]  }
 0x231   : > { %5527 = vmatprep.mubr.msk.bf16.mxu1 %vm2004_vm10, %v7302_v55  ;;  %3876 = vmatpush1.bf16.msra.mxu1 %v6265_v39  ;;  %v2415_v55 = vor.u32 %v2414_v48, %v2410_v6  ;;  %v3628_v47 = vrot.slane %v3540_v61, 1  ;;  %v2248_v34 = vpop.permute.xlu1 %2247  ;;  %v2434_v39 = vshll.u32 %v7358_v15, 16  ;;  %8148 = vst [vmem:[#allocation27_spill] sm:$0xff] %v7380_v17  ;;  %v2453_v48 = vsel %vm2365_vm9, %v2448_v24, %v2452_v59  ;;  %v1636_v6 = vld [vmem:[#allocation2 + $0x30] sm:$0xf] }
 0x232   : > { %3877 = vmatprep.subr.bf16.mxu1 %v8139_v40  ;;  %v5310_v61 = vld [vmem:[#allocation2 + $0x54] sm:$0xf]  ;;  %v5336_v13 = vcombine.low %v1636_v6, %v1637_v38  ;;  %v2469_v10 = vrot.slane %v2467_v2, 1  ;;  %v2465_v2 = vshrl.u32 %v7349_v19, 16 }
 0x233   : > { %v3458_v0 = vpop.permute.xlu0 %3457  ;;  %v2419_v57 = vsel %vm2365_vm9, %v2415_v55, %v2418_v3  ;;  %v6278_v7 = vld [vmem:[%s8091_s4 + $0xf0] sm:$0xff]   ;;  %v7388_v32 = vsel %vm3609_vm11, %v3628_v47, %v3629_v20  ;;  %v7392_v53 = vcombine.low %v5310_v61, %v7373_v44  ;;  %v3635_v3 = vrot.slane %v7376_v36, 1  ;;  %v3310_v55 = vld [vmem:[#allocation2 + $0x3c] sm:$0xe]  ;;  %v3313_v44 = vld [vmem:[#allocation2 + $0x60] sm:$0xe] }
 0x234   : > { %8149 = vst [vmem:[#allocation28_spill] sm:$0xff] %v7388_v32  ;;  %v3543_v54 = vsel %vm2004_vm10, %v5576_v37, %v3458_v0  ;;  %2928 = vmatmul.mubr.bf16.gmra.mrb[72].mxu0 %v2419_v57  ;;  %v6242_v20 = vld [vmem:[#allocation2 + $0x44] ss:$0 sps:$4 sm:$0x11]   ;;  %v5577_v57 = vcombine.low %v3310_v55, %v7378_v25  ;;  %v7403_v38 = vsel %vm2004_vm10, %v5336_v13, %v7258_v5  ;;  %v2472_v47 = vshll.u32 %v7380_v17, 16 }
 0x235   : > { %3878 = vmatpush1.bf16.msra.mxu1 %v6273_v43  ;;  %v3634_v24 = vrot.slane %v3543_v54, 1  ;;  %v2436_v43 = vrot.slane %v2434_v39, 1  ;;  %v7396_v59 = vpop.permute.xlu1 %2249  ;;  %5499 = vmatprep.mubr.msk.bf16.mxu0 %vm2004_vm10, %v2453_v48  ;;  %v2440_v37 = vrot.slane %v2438_v45, 1  ;;  %v2432_v39 = vshrl.u32 %v7358_v15, 16  ;;  %v6280_v48 = vld [vmem:[%s8091_s4 + $0xf8] sm:$0xff]  }
 0x236   : > { %3879 = vmatprep.subr.bf16.mxu1 %v8139_v40  ;;  %v7417_v5 = vsel %vm2004_vm10, %v6242_v20, %v2248_v34  ;;  %v2470_v45 = vor.u32 %v2469_v10, %v2465_v2  ;;  %v2456_v13 = vshll.u32 %v7403_v38, 16  ;;  %v7425_v55 = vld [vmem:[#allocation2 + $0x5c] ss:$0 sps:$4 sm:$0x11]   ;;  %v5312_v34 = vld [vmem:[#allocation2 + $0x60] sm:$0xf] }
 0x237   : > { %v3460_v0 = vpop.permute.xlu0 %3459  ;;  %v7414_v6 = vsel %vm3609_vm11, %v3634_v24, %v3635_v3  ;;  %v2437_v54 = vor.u32 %v2436_v43, %v2432_v39  ;;  %8151 = vst [vmem:[#allocation30_spill] sm:$0xff] %v7425_v55  ;;  %v2474_v3 = vrot.slane %v2472_v47, 1  ;;  %v7427_v24 = vld [vmem:[#allocation2 + $0x64] sm:$0xf]  ;;  %v2460_v20 = vshll.u32 %v7376_v36, 16 }
 0x238   : > { %3201 = vmatmul.mubr.bf16.gmra.mrb[40].mxu1 %v7358_v15  ;;  %8150 = vst [vmem:[#allocation29_spill] sm:$0xff] %v7414_v6  ;;  %v3546_v61 = vsel %vm2004_vm10, %v5577_v57, %v3460_v0  ;;  %v2489_v15 = vshll.u32 %v7392_v53, 16  ;;  %v3641_v10 = vrot.slane %v7417_v5, 1  ;;  %v7431_v57 = vld [vmem:[#allocation2 + $0x4c] sm:$0xf]  ;;  %v6281_v47 = vld [vmem:[%s8091_s4 + $0x100] sm:$0xff]  }
 0x239   : > { %5528 = vmatprep.mubr.msk.bf16.mxu1 %vm2004_vm10, %v7349_v19  ;;  %3880 = vmatpush1.bf16.msra.mxu1 %v6278_v7  ;;  %v3640_v19 = vrot.slane %v3546_v61, 1  ;;  %v7422_v7 = vpop.permute.xlu1 %2251  ;;  %8152 = vst [vmem:[#allocation31_spill] sm:$0xff] %v7431_v57  ;;  %v2441_v43 = vsel %vm2365_vm9, %v2437_v54, %v2440_v37  ;;  %v1638_v39 = vld [vmem:[#allocation2 + $0x3c] sm:$0xf]  ;;  %v6313_v0 = vld [vmem:[#allocation2 + $0x64] sm:$0xf]  ;;  %v2475_v36 = vsel %vm2365_vm9, %v2470_v45, %v2474_v3 }
 0x23a   : > { %3881 = vmatprep.subr.bf16.mxu1 %v8139_v40  ;;  %v7436_v61 = vcombine.low %v5312_v34, %v6313_v0  ;;  %v3314_v6 = vld [vmem:[#allocation2 + $0x6c] sm:$0xe]  ;;  %v5337_v32 = vcombine.low %v1638_v39, %v7378_v25  ;;  %v2491_v17 = vrot.slane %v2489_v15, 1  ;;  %v2458_v37 = vrot.slane %v2456_v13, 1  ;;  %v7445_v34 = vld [vmem:[#allocation2 + $0x84] sm:$0xe] }
 0x23b   : > { %v7433_v2 = vpop.permute.xlu0 %3461  ;;  %v2494_v0 = vshll.u32 %v7425_v55, 16  ;;  %v5581_v25 = vcombine.low %v3314_v6, %v7054_v62  ;;  %v5580_v45 = vcombine.low %v3313_v44, %v7427_v24  ;;  %v5583_v13 = vcombine.low %v7445_v34, %v7103_v63  ;;  %v7461_v3 = vld [vmem:[#allocation2 + $0x78] sm:$0xe]  ;;  %v7463_v39 = vld [vmem:[#allocation2 + $0x9c] sm:$0xe]  ;;  %v6282_v44 = vld [vmem:[%s8091_s4 + $0x108] sm:$0xff]  }
 0x23c   : > { %8153 = vst [vmem:[#allocation32_spill] sm:$0xff] %v7433_v2  ;;  %2936 = vmatmul.mubr.bf16.gmra.mrb[76].mxu0 %v2441_v43  ;;  %v7450_v43 = vsel %vm3609_vm11, %v3640_v19, %v3641_v10  ;;  %v7457_v15 = vsel %vm2004_vm10, %v5337_v32, %v7253_v22  ;;  %v2462_v19 = vrot.slane %v2460_v20, 1  ;;  %v2454_v10 = vshrl.u32 %v7403_v38, 16  ;;  %v1640_v22 = vld [vmem:[#allocation2 + $0x48] sm:$0xf] }
 0x23d   : > { %3882 = vmatpush1.bf16.msra.mxu1 %v6280_v48  ;;  %v2254_v54 = vpop.permute.xlu1 %2253  ;;  %5500 = vmatprep.mubr.msk.bf16.mxu0 %vm2004_vm10, %v2475_v36  ;;  %v2487_v48 = vshrl.u32 %v7392_v53, 16  ;;  %8154 = vst [vmem:[#allocation33_spill] sm:$0xff] %v7450_v43  ;;  %v7465_v36 = vld [vmem:[#allocation2 + $0x90] sm:$0xe]  ;;  %v2511_v63 = vshll.u32 %v7436_v61, 16  ;;  %v2496_v2 = vrot.slane %v2494_v0, 1 }
 0x23e   : > { %3883 = vmatprep.subr.bf16.mxu1 %v8139_v40  ;;  %v7483_v20 = vld [vmem:[#allocation2 + $0xb4] sm:$0xe]  ;;  %v7485_v34 = vld [vmem:[#allocation2 + $0xa8] sm:$0xe]  ;;  %v5314_v55 = vld [vmem:[#allocation2 + $0x6c] sm:$0xf] }
 0x23f   : > { %v7468_v43 = vpop.permute.xlu0 %3463  ;;  %v2492_v32 = vor.u32 %v2491_v17, %v2487_v48  ;;  %v6314_v17 = vld [vmem:[#allocation2 + $0x68] ss:$0 sps:$4 sm:$0x11]   ;;  %v2509_v18 = vshrl.u32 %v7436_v61, 16  ;;  %v2513_v16 = vrot.slane %v2511_v63, 1 }
 0x240   : > { %3209 = vmatmul.mubr.bf16.gmra.mrb[44].mxu1 %v7403_v38  ;;  %8155 = vst [vmem:[#allocation34_spill] sm:$0xff] %v7468_v43  ;;  %v2478_v43 = vshll.u32 %v7457_v15, 16  ;;  %v2516_v48 = vshll.u32 %v6314_v17, 16  ;;  %v6254_v38 = vld [vmem:[#allocation2 + $0x68] ss:$0 sps:$4 sm:$0x11]  }
 0x241   : > { %5529 = vmatprep.mubr.msk.bf16.mxu1 %vm2004_vm10, %v7392_v53  ;;  %3884 = vmatpush1.bf16.msra.mxu1 %v6281_v47  ;;  %v5338_v53 = vcombine.low %v1640_v22, %v7431_v57  ;;  %v2459_v47 = vor.u32 %v2458_v37, %v2454_v10  ;;  %v3468_v62 = vpop.permute.xlu1 %3467  ;;  %v7496_v37 = vcombine.low %v5314_v55, %v6315_v49  ;;  %v2482_v10 = vshll.u32 %v7417_v5, 16  ;;  %v1642_v55 = vld [vmem:[#allocation2 + $0x54] sm:$0xf] }
 0x242   : > { %3885 = vmatprep.subr.bf16.mxu1 %v8139_v40  ;;  %v3558_v6 = vsel %vm2004_vm10, %v5581_v25, %v3468_v62  ;;  %v6283_v25 = vld [vmem:[%s8091_s4 + $0x110] sm:$0xff]   ;;  %v7505_v62 = vsel %vm2004_vm10, %v6254_v38, %v2254_v54  ;;  %v2497_v5 = vsel %vm2365_vm9, %v2492_v32, %v2496_v2  ;;  %v5339_v22 = vcombine.low %v1642_v55, %v7489_v11 }
 0x243   : > { %v3466_v0 = vpop.permute.xlu0 %3465  ;;  %v2463_v17 = vsel %vm2365_vm9, %v2459_v47, %v2462_v19  ;;  %v3664_v57 = vrot.slane %v3558_v6, 1  ;;  %v2480_v47 = vrot.slane %v2478_v43, 1  ;;  %v3665_v54 = vrot.slane %v7073_v28, 1  ;;  %v6246_v38 = vld [vmem:[#allocation2 + $0x50] ss:$0 sps:$4 sm:$0x11]  }
 0x244   : > { %v3555_v49 = vsel %vm2004_vm10, %v5580_v45, %v3466_v0  ;;  %2944 = vmatmul.mubr.bf16.gmra.mrb[80].mxu0 %v2463_v17  ;;  %v2031_v2 = vsel %vm2004_vm10, %v5338_v53, %v7271_v41  ;;  %v2533_v32 = vshll.u32 %v7496_v37, 16  ;;  %v2484_v6 = vrot.slane %v2482_v10, 1 }
 0x245   : > { %3886 = vmatpush1.bf16.msra.mxu1 %v6282_v44  ;;  %v3658_v19 = vrot.slane %v3555_v49, 1  ;;  %v3472_v63 = vpop.permute.xlu1 %3471  ;;  %5501 = vmatprep.mubr.msk.bf16.mxu0 %vm2004_vm10, %v2497_v5  ;;  %v2518_v44 = vrot.slane %v2516_v48, 1  ;;  %v3659_v43 = vrot.slane %v7505_v62, 1  ;;  %v2476_v0 = vshrl.u32 %v7457_v15, 16 }
 0x246   : > { %3887 = vmatprep.subr.bf16.mxu1 %v8139_v40  ;;  %v3564_v45 = vsel %vm2004_vm10, %v5583_v13, %v3472_v63  ;;  %v2514_v28 = vor.u32 %v2513_v16, %v2509_v18  ;;  %v6284_v13 = vld [vmem:[%s8091_s4 + $0x118] sm:$0xff]   ;;  %v7527_v41 = vsel %vm2004_vm10, %v6246_v38, %v7396_v59  ;;  %v8156_v10 = vcombine.low %v7461_v3, %v7075_v14 }
 0x247   : > { %v3470_v48 = vpop.permute.xlu0 %3469  ;;  %v3676_v53 = vrot.slane %v3564_v45, 1  ;;  %v2481_v16 = vor.u32 %v2480_v47, %v2476_v0  ;;  %v7538_v49 = vsel %vm3609_vm11, %v3658_v19, %v3659_v43  ;;  %v3677_v59 = vrot.slane %v7116_v26, 1  ;;  %v5316_v63 = vld [vmem:[#allocation2 + $0x78] sm:$0xf]  ;;  %v6316_v19 = vld [vmem:[#allocation2 + $0x7c] sm:$0xf] }
 0x248   : > { %3217 = vmatmul.mubr.bf16.gmra.mrb[48].mxu1 %v7457_v15  ;;  %v3561_v15 = vsel %vm2004_vm10, %v8156_v10, %v3470_v48  ;;  %v8157_v5 = vcombine.low %v7463_v39, %v7158_v23  ;;  %v2531_v3 = vshrl.u32 %v7496_v37, 16  ;;  %v2535_v55 = vrot.slane %v2533_v32, 1 }
 0x249   : > { %5530 = vmatprep.mubr.msk.bf16.mxu1 %vm2004_vm10, %v7436_v61  ;;  %3888 = vmatpush1.bf16.msra.mxu1 %v6283_v25  ;;  %v7535_v61 = vsel %vm3609_vm11, %v3664_v57, %v3665_v54  ;;  %v3670_v18 = vrot.slane %v3561_v15, 1  ;;  %v3476_v17 = vpop.permute.xlu1 %3475  ;;  %v2500_v25 = vshll.u32 %v2031_v2, 16  ;;  %v3671_v57 = vrot.slane %v7101_v30, 1 }
 0x24a   : > { %3889 = vmatprep.subr.bf16.mxu1 %v8139_v40  ;;  %v3570_v14 = vsel %vm2004_vm10, %v8157_v5, %v3476_v17  ;;  %v2504_v47 = vshll.u32 %v7527_v41, 16  ;;  %v2485_v38 = vsel %vm2365_vm9, %v2481_v16, %v2484_v6  ;;  %v5372_v45 = vcombine.low %v5316_v63, %v6316_v19  ;;  %v6317_v6 = vld [vmem:[#allocation2 + $0x74] ss:$0 sps:$4 sm:$0x11]  }
 0x24b   : > { %v3474_v54 = vpop.permute.xlu0 %3473  ;;  %v3688_v26 = vrot.slane %v3570_v14, 1  ;;  %v8158_v23 = vcombine.low %v7465_v36, %v7136_v4  ;;  %v2519_v32 = vsel %vm2365_vm9, %v2514_v28, %v2518_v44  ;;  %v7555_v43 = vsel %vm3609_vm11, %v3676_v53, %v3677_v59  ;;  %v6250_v36 = vld [vmem:[#allocation2 + $0x5c] ss:$0 sps:$4 sm:$0x11]  }
 0x24c   : > { %2952 = vmatmul.mubr.bf16.gmra.mrb[84].mxu0 %v2485_v38  ;;  %v2502_v0 = vrot.slane %v2500_v25, 1  ;;  %v2538_v10 = vshll.u32 %v6317_v6, 16  ;;  %v3689_v4 = vrot.slane %v7173_v42, 1  ;;  %v8159_v44 = vcombine.low %v7483_v20, %v7213_v8 }
 0x24d   : > { %3890 = vmatpush1.bf16.msra.mxu1 %v6284_v13  ;;  %v3567_v39 = vsel %vm2004_vm10, %v8158_v23, %v3474_v54  ;;  %v3480_v48 = vpop.permute.xlu1 %3479  ;;  %5502 = vmatprep.mubr.msk.bf16.mxu0 %vm2004_vm10, %v2519_v32  ;;  %v7559_v13 = vsel %vm3609_vm11, %v3670_v18, %v3671_v57  ;;  %v2035_v53 = vsel %vm2004_vm10, %v5339_v22, %v7264_v31  ;;  %v3683_v16 = vrot.slane %v7143_v52, 1 }
 0x24e   : > { %v3682_v30 = vrot.slane %v3567_v39, 1  ;;  %v3576_v28 = vsel %vm2004_vm10, %v8159_v44, %v3480_v48  ;;  %v2536_v15 = vor.u32 %v2535_v55, %v2531_v3  ;;  %v2506_v17 = vrot.slane %v2504_v47, 1 }
 0x24f   : > { %v2498_v25 = vshrl.u32 %v2031_v2, 16  ;;  %v3478_v59 = vpop.permute.xlu0 %3477  ;;  %v2555_v42 = vshll.u32 %v5372_v45, 16  ;;  %v7573_v18 = vsel %vm2004_vm10, %v6250_v36, %v7422_v7  ;;  %v3700_v8 = vrot.slane %v3576_v28, 1 }
 0x250   : > { %3225 = vmatmul.mubr.bf16.gmra.mrb[52].mxu1 %v2031_v2  ;;  %v8160_v20 = vcombine.low %v7485_v34, %v7190_v12  ;;  %v7580_v22 = vsel %vm3609_vm11, %v3688_v26, %v3689_v4  ;;  %v2522_v5 = vshll.u32 %v2035_v53, 16  ;;  %v7583_v14 = vsel %vm3609_vm11, %v3682_v30, %v3683_v16  ;;  %v1644_v34 = vld [vmem:[#allocation2 + $0x60] sm:$0xf] }
 0x251   : > { %5531 = vmatprep.mubr.msk.bf16.mxu1 %vm2004_vm10, %v7496_v37  ;;  %v2503_v52 = vor.u32 %v2502_v0, %v2498_v25  ;;  %v3701_v37 = vrot.slane %v7225_v29, 1  ;;  %v2540_v3 = vrot.slane %v2538_v10, 1  ;;  %v3695_v7 = vrot.slane %v7201_v21, 1  ;;  %v6318_v26 = vld [vmem:[#allocation2 + $0x80] ss:$0 sps:$4 sm:$0x11]  }
 0x252   : > { %v3573_v31 = vsel %vm2004_vm10, %v8160_v20, %v3478_v59  ;;  %v2526_v55 = vshll.u32 %v7573_v18, 16  ;;  %v5340_v57 = vcombine.low %v1644_v34, %v7427_v24  ;;  %v2557_v47 = vrot.slane %v2555_v42, 1  ;;  %v8166_v25 = vld [vmem:[#allocation18_spill] sm:$0xff] }
 0x253   : > { %v3694_v2 = vrot.slane %v3573_v31, 1  ;;  %v2507_v12 = vsel %vm2365_vm9, %v2503_v52, %v2506_v17  ;;  %v2541_v63 = vsel %vm2365_vm9, %v2536_v15, %v2540_v3  ;;  %v7592_v54 = vsel %vm3609_vm11, %v3700_v8, %v3701_v37  ;;  %v8164_v15 = vld [vmem:[#allocation15_spill] sm:$0xff]  ;;  %v5558_v42 = vld [vmem:[#allocation2 + $0x30] sm:$0xe]  ;;  %v8167_v8 = vld [vmem:[#allocation21_spill] sm:$0xff] }
 0x254   : > { %2960 = vmatmul.mubr.bf16.gmra.mrb[88].mxu0 %v2507_v12  ;;  %v2524_v38 = vrot.slane %v2522_v5, 1  ;;  %v2039_v21 = vsel %vm2004_vm10, %v5340_v57, %v7284_v50  ;;  %v2553_v19 = vshrl.u32 %v5372_v45, 16  ;;  %v2560_v23 = vshll.u32 %v6318_v26, 16  ;;  %v8168_v31 = vld [vmem:[#allocation17_spill] sm:$0xff]  ;;  %v8169_v5 = vld [vmem:[#allocation19_spill] sm:$0xff]  ;;  %v8171_v12 = vld [vmem:[#allocation20_spill] sm:$0xff] }
 0x255   : > { %5503 = vmatprep.mubr.msk.bf16.mxu0 %vm2004_vm10, %v2541_v63  ;;  %v7596_v29 = vsel %vm3609_vm11, %v3694_v2, %v3695_v7  ;;  %v2528_v39 = vrot.slane %v2526_v55, 1  ;;  %v2520_v32 = vshrl.u32 %v2035_v53, 16  ;;  %v2544_v0 = vshll.u32 %v2039_v21, 16  ;;  %v5559_v3 = vld [vmem:[#allocation2 + $0x3c] sm:$0xe]  ;;  %v8170_v7 = vld [vmem:[#allocation24_spill] sm:$0xff] }
 0x256   : > { %v2558_v24 = vor.u32 %v2557_v47, %v2553_v19  ;;  %v2562_v48 = vrot.slane %v2560_v23, 1  ;;  %v2548_v6 = vshll.u32 %v7505_v62, 16  ;;  %v2542_v44 = vshrl.u32 %v2039_v21, 16  ;;  %v8163_v62 = vld [vmem:[#allocation13_spill] sm:$0xff]  ;;  %v8172_v57 = vld [vmem:[#allocation22_spill] sm:$0xff]  ;;  %v8174_v26 = vld [vmem:[#allocation23_spill] sm:$0xff] }
 0x257   : > { %v2525_v30 = vor.u32 %v2524_v38, %v2520_v32  ;;  %v2546_v36 = vrot.slane %v2544_v0, 1  ;;  %v3620_v59 = vrot.slane %v8166_v25, 1  ;;  %v5606_v52 = vcombine.low %v5558_v42, %v8168_v31  ;;  %v5560_v38 = vld [vmem:[#allocation2 + $0x48] sm:$0xe]  ;;  %v8175_v32 = vld [vmem:[#allocation27_spill] sm:$0xff] }
 0x258   : > { %3233 = vmatmul.mubr.bf16.gmra.mrb[56].mxu1 %v2035_v53  ;;  %v2563_v4 = vsel %vm2365_vm9, %v2558_v24, %v2562_v48  ;;  %v2550_v50 = vrot.slane %v2548_v6, 1  ;;  %v3626_v37 = vrot.slane %v8169_v5, 1  ;;  %v5607_v34 = vcombine.low %v5559_v3, %v8171_v12  ;;  %v6301_v0 = vld [vmem:[%s8094_s7 + $0x4] ss:$8 sps:$4 sm:$0xff]   ;;  %v5561_v48 = vld [vmem:[#allocation2 + $0x54] sm:$0xe] }
 0x259   : > { %5532 = vmatprep.mubr.msk.bf16.mxu1 %vm2004_vm10, %v5372_v45  ;;  %v2529_v10 = vsel %vm2365_vm9, %v2525_v30, %v2528_v39  ;;  %v2547_v45 = vor.u32 %v2546_v36, %v2542_v44  ;;  %v3625_v2 = vrot.slane %v5606_v52, 1  ;;  %v3632_v47 = vrot.slane %v8172_v57, 1  ;;  %v6299_v30 = vld [vmem:[%s8094_s7] ss:$8 sps:$4 sm:$0xff]   ;;  %4282 = vmatprep.subr.bf16.mxu0 %v6301_v0  ;;  %v8178_v44 = vld [vmem:[#allocation30_spill] sm:$0xff] }
 0x25a   : > { %v3631_v63 = vrot.slane %v5607_v34, 1  ;;  %v5608_v23 = vcombine.low %v5560_v38, %v8174_v26  ;;  %v3638_v24 = vrot.slane %v8175_v32, 1  ;;  %4283 = vmatpush1.bf16.msra.mxu0 %v6299_v30  ;;  %v8176_v6 = vld [vmem:[#allocation28_spill] sm:$0xff]  ;;  %v3647_v25 = vrot.slane %v7527_v41, 1  ;;  %v8186_v3 = vld [vmem:[#allocation5_spill] sm:$0xff]  ;;  %v8188_v41 = vld [vmem:[#allocation7_spill] sm:$0xff] }
 0x25b   : > { %v2551_v28 = vsel %vm2365_vm9, %v2547_v45, %v2550_v50  ;;  %v3627_v55 = vsel %vm3609_vm11, %v3625_v2, %v3626_v37  ;;  %v3644_v45 = vrot.slane %v8178_v44, 1  ;;  %v8185_v52 = vld [vmem:[#allocation4_spill] sm:$0xff]  ;;  %v3653_v5 = vrot.slane %v7573_v18, 1  ;;  %v8190_v18 = vld [vmem:[#allocation9_spill] sm:$0xff] }
 0x25c   : > { %2968 = vmatmul.mubr.bf16.gmra.mrb[92].mxu0 %v2529_v10  ;;  %v3633_v19 = vsel %vm3609_vm11, %v3631_v63, %v3632_v47  ;;  %v3637_v39 = vrot.slane %v5608_v23, 1  ;;  %v5571_v47 = vld [vmem:[#allocation2 + $0xcc] sm:$0xe] }
 0x25d   : > { %5504 = vmatprep.mubr.msk.bf16.mxu0 %vm2004_vm10, %v2563_v4  ;;  %v8177_v4 = vld [vmem:[#allocation26_spill] sm:$0xff] }
 0x25e   : > { %v3639_v10 = vsel %vm3609_vm11, %v3637_v39, %v3638_v24  ;;  %v5609_v36 = vcombine.low %v5561_v48, %v8177_v4 }
 0x260   : > { %3241 = vmatmul.mubr.bf16.gmra.mrb[60].mxu1 %v2039_v21  ;;  %v8173_v21 = vld [vmem:[#allocation25_spill] sm:$0xff]  ;;  %v3643_v50 = vrot.slane %v5609_v36, 1 }
 0x261   : > { %5533 = vmatprep.mubr.msk.bf16.mxu1 %vm2004_vm10, %v6849_v58  ;;  %v8161_v58 = vld [vmem:[#allocation12_spill] sm:$0xff] }
 0x264   : > { %2976 = vmatmul.mubr.bf16.gmra.mrb[96].mxu0 %v2551_v28  ;;  %v6302_v28 = vld [vmem:[%s8094_s7 + $0x10] ss:$8 sps:$4 sm:$0xff]  }
 0x265   : > { %4314 = vmatprep.mubr.bf16.mxu0 %v8139_v40 }
 0x268   : > { %3249 = vmatmul.mubr.bf16.gmra.mrb[0].mxu1 %v7063_v9  ;;  %v8162_v9 = vld [vmem:[#allocation14_spill] sm:$0xff] }
 0x269   : > { %5534 = vmatprep.mubr.msk.bf16.mxu1 %vm2004_vm10, %v7052_v56  ;;  %v5556_v56 = vld [vmem:[#allocation2 + $0x18] sm:$0xe] }
 0x270   : > { %3257 = vmatmul.mubr.bf16.gmra.mrb[4].mxu1 %v7087_v46  ;;  %v6319_v46 = vld [vmem:[#allocation2 + $0x1c] sm:$0xf] }
 0x271   : > { %5535 = vmatprep.mubr.msk.bf16.mxu1 %vm2004_vm10, %v7070_v27  ;;  %v5604_v27 = vcombine.low %v5556_v56, %v6319_v46  ;;  %v6307_v56 = vld [vmem:[%s8094_s7 + $0x24] ss:$8 sps:$4 sm:$0xff]  }
 0x272   : > { %v8179_v46 = vld [vmem:[#allocation29_spill] sm:$0xff] }
 0x278   : > { %3265 = vmatmul.mubr.bf16.gmra.mrb[8].mxu1 %v7119_v1  ;;  %v3613_v1 = vrot.slane %v5604_v27, 1  ;;  %v3645_v27 = vsel %vm3609_vm11, %v3643_v50, %v3644_v45 }
 0x279   : > { %5536 = vmatprep.mubr.msk.bf16.mxu1 %vm2004_vm10, %v7097_v51  ;;  %v6320_v51 = vld [vmem:[#allocation2 + $0x20] ss:$0 sps:$4 sm:$0x11]  }
 0x27a   : > { %v3614_v53 = vrot.slane %v6320_v51, 1  ;;  %v3311_v51 = vld [vmem:[#allocation2 + $0x48] sm:$0xe] }
 0x280   : > { %3273 = vmatmul.mubr.bf16.gmra.mrb[12].mxu1 %v7149_v60  ;;  %v5557_v60 = vld [vmem:[#allocation2 + $0x24] sm:$0xe] }
 0x281   : > { %5537 = vmatprep.mubr.msk.bf16.mxu1 %vm2004_vm10, %v7125_v33  ;;  %v3615_v33 = vsel %vm3609_vm11, %v3613_v1, %v3614_v53  ;;  %v6308_v1 = vld [vmem:[%s8094_s7 + $0x30] ss:$8 sps:$4 sm:$0xff]  }
 0x282   : > { %v8180_v53 = vld [vmem:[#allocation31_spill] sm:$0xff] }
 0x288   : > { %3281 = vmatmul.mubr.bf16.gmra.mrb[16].mxu1 %v7176_v35  ;;  %v8165_v35 = vld [vmem:[#allocation16_spill] sm:$0xff] }
 0x289   : > { %5538 = vmatprep.mubr.msk.bf16.mxu1 %vm2004_vm10, %v8161_v58  ;;  %v5605_v16 = vcombine.low %v5557_v60, %v8165_v35  ;;  %v6304_v58 = vld [vmem:[%s8094_s7 + $0x14] ss:$8 sps:$4 sm:$0xff]   ;;  %v5578_v60 = vcombine.low %v3311_v51, %v8180_v53  ;;  %v8182_v35 = vld [vmem:[#allocation33_spill] sm:$0xff] }
 0x28a   : > { %4284 = vmatprep.subr.bf16.mxu0 %v6304_v58 }
 0x28b   : > { %v3619_v17 = vrot.slane %v5605_v16, 1  ;;  %4285 = vmatpush1.bf16.msra.mxu0 %v6302_v28  ;;  %v8183_v16 = vld [vmem:[#allocation3_spill] sm:$0xff] }
 0x28c   : > { %4286 = vmatprep.subr.bf16.mxu0 %v6307_v56 }
 0x28d   : > { %v3621_v20 = vsel %vm3609_vm11, %v3619_v17, %v3620_v59  ;;  %v3312_v59 = vld [vmem:[#allocation2 + $0x54] sm:$0xe] }
 0x28e   : > { %v5579_v42 = vcombine.low %v3312_v59, %v7489_v11  ;;  %v8187_v11 = vld [vmem:[#allocation6_spill] sm:$0xff]  ;;  %v7754_v59 = vld [vmem:[%s8093_s6] ss:$0 sm:$0xff] }
 0x290   : > { %3289 = vmatmul.mubr.bf16.gmra.mrb[20].mxu1 %v8162_v9  ;;  %v6305_v9 = vld [vmem:[%s8094_s7 + $0x20] ss:$8 sps:$4 sm:$0xff]  }
 0x291   : > { %5539 = vmatprep.mubr.msk.bf16.mxu1 %vm2004_vm10, %v8163_v62  ;;  %v6310_v62 = vld [vmem:[%s8094_s7 + $0x34] ss:$8 sps:$4 sm:$0xff]   ;;  %4287 = vmatpush1.bf16.msra.mxu0 %v6305_v9 }
 0x292   : > { %4288 = vmatprep.subr.bf16.mxu0 %v6310_v62 }
 0x295   : > { %4289 = vmatpush1.bf16.msra.mxu0 %v6308_v1 }
 0x298   : > { %3297 = vmatmul.mubr.bf16.gmra.mrb[24].mxu1 %v8164_v15  ;;  %v8181_v15 = vld [vmem:[#allocation32_spill] sm:$0xff] }
 0x299   : > { %5656 = vmatprep.mubr.msk.bf16.mxu1 %vm2004_vm10, %v3615_v33  ;;  %v3549_v33 = vsel %vm2004_vm10, %v5578_v60, %v8181_v15 }
 0x29a   : > { %v3646_v17 = vrot.slane %v3549_v33, 1 }
 0x2a0   : > { %3900 = vmatmul.mubr.bf16.vlgmr.msra.gmra.mrb[28].mxu1 %v8167_v8  ;;  %v3648_v8 = vsel %vm3609_vm11, %v3646_v17, %v3647_v25 }
 0x2a1   : > { %5657 = vmatprep.mubr.msk.bf16.mxu1 %vm2004_vm10, %v3621_v20  ;;  %v8184_v20 = vld [vmem:[#allocation34_spill] sm:$0xff] }
 0x2a2   : > { %v3552_v31 = vsel %vm2004_vm10, %v5579_v42, %v8184_v20 }
 0x2a3   : > { %v3652_v2 = vrot.slane %v3552_v31, 1 }
 0x2a5   : > { %v3654_v37 = vsel %vm3609_vm11, %v3652_v2, %v3653_v5 }
 0x2a8   : > { %3908 = vmatmul.mubr.bf16.gmra.mrb[32].mxu1 %v8170_v7  ;;  %v8189_v7 = vld [vmem:[#allocation8_spill] sm:$0xff] }
 0x2a9   : > { %5658 = vmatprep.mubr.msk.bf16.mxu1 %vm2004_vm10, %v3627_v55 }
 0x2b0   : > { %3916 = vmatmul.mubr.bf16.gmra.mrb[36].mxu1 %v8173_v21  ;;  %v6321_v21 = vld [vmem:[#allocation2 + $0xd0] sm:$0xf] }
 0x2b1   : > { %5659 = vmatprep.mubr.msk.bf16.mxu1 %vm2004_vm10, %v3633_v19  ;;  %v5619_v19 = vcombine.low %v5571_v47, %v6321_v21 }
 0x2b3   : > { %v3703_v39 = vrot.slane %v5619_v19, 1 }
 0x2b8   : > { %3924 = vmatmul.mubr.bf16.gmra.mrb[40].mxu1 %v8176_v6 }
 0x2b9   : > { %5660 = vmatprep.mubr.msk.bf16.mxu1 %vm2004_vm10, %v3639_v10 }
 0x2c0   : > { %3932 = vmatmul.mubr.bf16.gmra.mrb[44].mxu1 %v8179_v46 }
 0x2c1   : > { %5661 = vmatprep.mubr.msk.bf16.mxu1 %vm2004_vm10, %v3645_v27 }
 0x2c8   : > { %3940 = vmatmul.mubr.bf16.gmra.mrb[48].mxu1 %v8182_v35 }
 0x2c9   : > { %5662 = vmatprep.mubr.msk.bf16.mxu1 %vm2004_vm10, %v8183_v16  ;;  %v7749_v16 = vld [vmem:[%s8092_s5] ss:$0 sm:$0xff] }
 0x2d0   : > { %3948 = vmatmul.mubr.bf16.gmra.mrb[52].mxu1 %v3648_v8 }
 0x2d1   : > { %5663 = vmatprep.mubr.msk.bf16.mxu1 %vm2004_vm10, %v8185_v52 }
 0x2d8   : > { %3956 = vmatmul.mubr.bf16.gmra.mrb[56].mxu1 %v3654_v37 }
 0x2d9   : > { %5664 = vmatprep.mubr.msk.bf16.mxu1 %vm2004_vm10, %v8186_v3 }
 0x2e0   : > { %3964 = vmatmul.mubr.bf16.gmra.mrb[60].mxu1 %v7538_v49 }
 0x2e1   : > { %5665 = vmatprep.mubr.msk.bf16.mxu1 %vm2004_vm10, %v8187_v11 }
 0x2e8   : > { %3972 = vmatmul.mubr.bf16.gmra.mrb[0].mxu1 %v7535_v61  ;;  %v8191_v61 = vld [vmem:[#allocation10_spill] sm:$0xff] }
 0x2e9   : > { %5666 = vmatprep.mubr.msk.bf16.mxu1 %vm2004_vm10, %v8188_v41 }
 0x2f0   : > { %3980 = vmatmul.mubr.bf16.gmra.mrb[4].mxu1 %v7559_v13 }
 0x2f1   : > { %5667 = vmatprep.mubr.msk.bf16.mxu1 %vm2004_vm10, %v8189_v7 }
 0x2f7   : > { %v2913_v55 = vpop.f32.mrb[64].mxu0 }
 0x2f8   : > { %3988 = vmatmul.mubr.bf16.gmra.mrb[8].mxu1 %v7555_v43  ;;  %v2915_v49 = vpop.f32.mrb[65].mxu0  ;;  %v8192_v43 = vld [vmem:[#allocation11_spill] sm:$0xff] }
 0x2f9   : > { %5668 = vmatprep.mubr.msk.bf16.mxu1 %vm2004_vm10, %v8190_v18  ;;  %v2916_v12 = vpop.f32.mrb[66].mxu0 }
 0x2fa   : > { %v2918_v34 = vpop.f32.mrb[67].mxu0 }
 0x2ff   : > { %v2921_v63 = vpop.f32.mrb[68].mxu0 }
 0x300   : > { %3996 = vmatmul.mubr.bf16.gmra.mrb[12].mxu1 %v7583_v14  ;;  %v2923_v57 = vpop.f32.mrb[69].mxu0  ;;  %v6322_v14 = vld [vmem:[#allocation2 + $0xd4] ss:$0 sps:$4 sm:$0x11]  }
 0x301   : > { %5669 = vmatprep.mubr.msk.bf16.mxu1 %vm2004_vm10, %v8191_v61  ;;  %v2924_v13 = vpop.f32.mrb[70].mxu0  ;;  %v3704_v32 = vrot.slane %v6322_v14, 1 }
 0x302   : > { %v2926_v38 = vpop.f32.mrb[71].mxu0 }
 0x303   : > { %v3705_v0 = vsel %vm3609_vm11, %v3703_v39, %v3704_v32 }
 0x307   : > { %v7714_v26 = vpop.f32.mrb[72].mxu0 }
 0x308   : > { %4004 = vmatmul.mubr.bf16.gmra.mrb[16].mxu1 %v7580_v22  ;;  %v2931_v23 = vpop.f32.mrb[73].mxu0 }
 0x309   : > { %5670 = vmatprep.mubr.msk.bf16.mxu1 %vm2004_vm10, %v8192_v43  ;;  %v7716_v24 = vpop.f32.mrb[74].mxu0 }
 0x30a   : > { %v2934_v30 = vpop.f32.mrb[75].mxu0 }
 0x30f   : > { %v7720_v48 = vpop.f32.mrb[76].mxu0 }
 0x310   : > { %4012 = vmatmul.mubr.bf16.gmra.mrb[20].mxu1 %v7596_v29  ;;  %v2939_v22 = vpop.f32.mrb[77].mxu0 }
 0x311   : > { %5671 = vmatprep.mubr.msk.bf16.mxu1 %vm2004_vm10, %v3705_v0  ;;  %v7723_v6 = vpop.f32.mrb[78].mxu0 }
 0x312   : > { %v2942_v10 = vpop.f32.mrb[79].mxu0 }
 0x317   : > { %v7726_v4 = vpop.f32.mrb[80].mxu0 }
 0x318   : > { %4020 = vmatmul.mubr.bf16.gmra.mrb[24].mxu1 %v7592_v54  ;;  %v2947_v36 = vpop.f32.mrb[81].mxu0 }
 0x319   : > { %v7728_v50 = vpop.f32.mrb[82].mxu0 }
 0x31a   : > { %v2950_v44 = vpop.f32.mrb[83].mxu0 }
 0x31f   : > { %v7730_v45 = vpop.f32.mrb[84].mxu0 }
 0x320   : > { %v2955_v28 = vpop.f32.mrb[85].mxu0 }
 0x321   : > { %v7732_v29 = vpop.f32.mrb[86].mxu0 }
 0x322   : > { %v2958_v58 = vpop.f32.mrb[87].mxu0 }
 0x327   : > { %v7734_v56 = vpop.f32.mrb[88].mxu0 }
 0x328   : > { %v2963_v9 = vpop.f32.mrb[89].mxu0 }
 0x329   : > { %v7736_v46 = vpop.f32.mrb[90].mxu0 }
 0x32a   : > { %v2966_v27 = vpop.f32.mrb[91].mxu0 }
 0x32f   : > { %v7738_v62 = vpop.f32.mrb[92].mxu0 }
 0x330   : > { %v2971_v54 = vpop.f32.mrb[93].mxu0 }
 0x331   : > { %v7740_v1 = vpop.f32.mrb[94].mxu0 }
 0x332   : > { %v2974_v51 = vpop.f32.mrb[95].mxu0 }
 0x337   : > { %v7742_v53 = vpop.f32.mrb[96].mxu0 }
 0x338   : > { %v2979_v60 = vpop.f32.mrb[97].mxu0 }
 0x339   : > { %v7744_v15 = vpop.f32.mrb[98].mxu0 }
 0x33a   : > { %v2982_v33 = vpop.f32.mrb[99].mxu0 }
 0x373   : > { %v3901_v35 = vpop.f32.mrb[28].mxu1 }
 0x374   : > { %v5934_v17 = vadd.f32 %v3901_v35, %v2913_v55  ;;  %v3903_v25 = vpop.f32.mrb[29].mxu1 }
 0x375   : > { %v3904_v42 = vpop.f32.mrb[30].mxu1 }
 0x376   : > { %v4067_v8 = vmul.f32 %v5934_v17, %v7749_v16  ;;  %v5935_v20 = vadd.f32 %v3904_v42, %v2916_v12  ;;  %v3906_v31 = vpop.f32.mrb[31].mxu1 }
 0x378   : > { %v4106_v52 = vadd.f32 %v7754_v59, %v4067_v8  ;;  %v4068_v2 = vmul.f32 %v5935_v20, %v7749_v16 }
 0x37a   : > { %v4107_v5 = vadd.f32 %v7754_v59, %v4068_v2  ;;  %v4138_v3 = vmax.f32 %v4106_v52, 0.0 }
 0x37b   : > { %v3909_v37 = vpop.f32.mrb[32].mxu1 }
 0x37c   : > { %v4139_v11 = vmax.f32 %v4107_v5, 0.0  ;;  %v5936_v41 = vadd.f32 %v3909_v37, %v2921_v63  ;;  %v3911_v7 = vpop.f32.mrb[33].mxu1 }
 0x37d   : > { %v3912_v18 = vpop.f32.mrb[34].mxu1 }
 0x37e   : > { %v4170_v55 = vpack.c.bf16 %v4139_v11, %v4138_v3  ;;  %v4069_v49 = vmul.f32 %v5936_v41, %v7749_v16  ;;  %v5937_v34 = vadd.f32 %v3912_v18, %v2924_v13  ;;  %v3914_v61 = vpop.f32.mrb[35].mxu1 }
 0x380   : > { %v4108_v12 = vadd.f32 %v7754_v59, %v4069_v49  ;;  %v4070_v57 = vmul.f32 %v5937_v34, %v7749_v16  ;;  %5682 = vmatmul.mubr.msk.bf16.vlgmr.msra.gmra.mrb[100].mxu0 %vm2004_vm10, %v4170_v55 }
 0x381   : > { %4324 = vmatprep.mubr.bf16.mxu0 %v8139_v40 }
 0x382   : > { %v4109_v47 = vadd.f32 %v7754_v59, %v4070_v57  ;;  %v4140_v21 = vmax.f32 %v4108_v12, 0.0 }
 0x383   : > { %v3917_v38 = vpop.f32.mrb[36].mxu1 }
 0x384   : > { %v4141_v63 = vmax.f32 %v4109_v47, 0.0  ;;  %v5938_v19 = vadd.f32 %v3917_v38, %v7714_v26  ;;  %v3919_v43 = vpop.f32.mrb[37].mxu1 }
 0x385   : > { %v3920_v23 = vpop.f32.mrb[38].mxu1 }
 0x386   : > { %v4171_v39 = vpack.c.bf16 %v4141_v63, %v4140_v21  ;;  %v4071_v13 = vmul.f32 %v5938_v19, %v7749_v16  ;;  %v5939_v14 = vadd.f32 %v3920_v23, %v7716_v24  ;;  %v3922_v32 = vpop.f32.mrb[39].mxu1 }
 0x388   : > { %v4110_v30 = vadd.f32 %v7754_v59, %v4071_v13  ;;  %v4072_v0 = vmul.f32 %v5939_v14, %v7749_v16  ;;  %5683 = vmatmul.mubr.msk.bf16.gmra.mrb[104].mxu0 %vm2004_vm10, %v4171_v39 }
 0x389   : > { %4334 = vmatprep.mubr.bf16.mxu0 %v8139_v40 }
 0x38a   : > { %v4111_v22 = vadd.f32 %v7754_v59, %v4072_v0  ;;  %v4142_v26 = vmax.f32 %v4110_v30, 0.0 }
 0x38b   : > { %v3925_v10 = vpop.f32.mrb[40].mxu1 }
 0x38c   : > { %v4143_v36 = vmax.f32 %v4111_v22, 0.0  ;;  %v5940_v44 = vadd.f32 %v3925_v10, %v7720_v48  ;;  %v3927_v28 = vpop.f32.mrb[41].mxu1 }
 0x38d   : > { %v3928_v58 = vpop.f32.mrb[42].mxu1 }
 0x38e   : > { %v4172_v9 = vpack.c.bf16 %v4143_v36, %v4142_v26  ;;  %v4073_v24 = vmul.f32 %v5940_v44, %v7749_v16  ;;  %v5941_v27 = vadd.f32 %v3928_v58, %v7723_v6  ;;  %v3930_v54 = vpop.f32.mrb[43].mxu1 }
 0x390   : > { %v4112_v51 = vadd.f32 %v7754_v59, %v4073_v24  ;;  %v4074_v60 = vmul.f32 %v5941_v27, %v7749_v16  ;;  %5684 = vmatmul.mubr.msk.bf16.gmra.mrb[108].mxu0 %vm2004_vm10, %v4172_v9 }
 0x391   : > { %4344 = vmatprep.mubr.bf16.mxu0 %v8139_v40 }
 0x392   : > { %v4113_v33 = vadd.f32 %v7754_v59, %v4074_v60  ;;  %v4144_v48 = vmax.f32 %v4112_v51, 0.0 }
 0x393   : > { %v3933_v35 = vpop.f32.mrb[44].mxu1 }
 0x394   : > { %v4145_v17 = vmax.f32 %v4113_v33, 0.0  ;;  %v5942_v25 = vadd.f32 %v3933_v35, %v7726_v4  ;;  %v3935_v42 = vpop.f32.mrb[45].mxu1 }
 0x395   : > { %v3936_v8 = vpop.f32.mrb[46].mxu1 }
 0x396   : > { %v4173_v20 = vpack.c.bf16 %v4145_v17, %v4144_v48  ;;  %v4075_v6 = vmul.f32 %v5942_v25, %v7749_v16  ;;  %v5943_v31 = vadd.f32 %v3936_v8, %v7728_v50  ;;  %v3938_v52 = vpop.f32.mrb[47].mxu1 }
 0x398   : > { %v4114_v2 = vadd.f32 %v7754_v59, %v4075_v6  ;;  %v4076_v5 = vmul.f32 %v5943_v31, %v7749_v16  ;;  %5685 = vmatmul.mubr.msk.bf16.gmra.mrb[112].mxu0 %vm2004_vm10, %v4173_v20 }
 0x399   : > { %4354 = vmatprep.mubr.bf16.mxu0 %v8139_v40 }
 0x39a   : > { %v4115_v37 = vadd.f32 %v7754_v59, %v4076_v5  ;;  %v4146_v4 = vmax.f32 %v4114_v2, 0.0 }
 0x39b   : > { %v3941_v3 = vpop.f32.mrb[48].mxu1 }
 0x39c   : > { %v4147_v11 = vmax.f32 %v4115_v37, 0.0  ;;  %v5944_v41 = vadd.f32 %v3941_v3, %v7730_v45  ;;  %v3943_v7 = vpop.f32.mrb[49].mxu1 }
 0x39d   : > { %v3944_v18 = vpop.f32.mrb[50].mxu1 }
 0x39e   : > { %v4174_v55 = vpack.c.bf16 %v4147_v11, %v4146_v4  ;;  %v4077_v50 = vmul.f32 %v5944_v41, %v7749_v16  ;;  %v5945_v49 = vadd.f32 %v3944_v18, %v7732_v29  ;;  %v3946_v34 = vpop.f32.mrb[51].mxu1 }
 0x3a0   : > { %v4116_v61 = vadd.f32 %v7754_v59, %v4077_v50  ;;  %v4078_v12 = vmul.f32 %v5945_v49, %v7749_v16  ;;  %5686 = vmatmul.mubr.msk.bf16.gmra.mrb[116].mxu0 %vm2004_vm10, %v4174_v55 }
 0x3a1   : > { %4364 = vmatprep.mubr.bf16.mxu0 %v8139_v40 }
 0x3a2   : > { %v4117_v57 = vadd.f32 %v7754_v59, %v4078_v12  ;;  %v4148_v45 = vmax.f32 %v4116_v61, 0.0 }
 0x3a3   : > { %v3949_v47 = vpop.f32.mrb[52].mxu1 }
 0x3a4   : > { %v4149_v38 = vmax.f32 %v4117_v57, 0.0  ;;  %v5946_v21 = vadd.f32 %v3949_v47, %v7734_v56  ;;  %v3951_v63 = vpop.f32.mrb[53].mxu1 }
 0x3a5   : > { %v3952_v19 = vpop.f32.mrb[54].mxu1 }
 0x3a6   : > { %v4175_v43 = vpack.c.bf16 %v4149_v38, %v4148_v45  ;;  %v4079_v29 = vmul.f32 %v5946_v21, %v7749_v16  ;;  %v5947_v23 = vadd.f32 %v3952_v19, %v7736_v46  ;;  %v3954_v39 = vpop.f32.mrb[55].mxu1 }
 0x3a8   : > { %v4118_v13 = vadd.f32 %v7754_v59, %v4079_v29  ;;  %v4080_v14 = vmul.f32 %v5947_v23, %v7749_v16  ;;  %5687 = vmatmul.mubr.msk.bf16.gmra.mrb[120].mxu0 %vm2004_vm10, %v4175_v43 }
 0x3a9   : > { %4374 = vmatprep.mubr.bf16.mxu0 %v8139_v40 }
 0x3aa   : > { %v4119_v32 = vadd.f32 %v7754_v59, %v4080_v14  ;;  %v4150_v56 = vmax.f32 %v4118_v13, 0.0 }
 0x3ab   : > { %v3957_v30 = vpop.f32.mrb[56].mxu1 }
 0x3ac   : > { %v4151_v0 = vmax.f32 %v4119_v32, 0.0  ;;  %v5948_v22 = vadd.f32 %v3957_v30, %v7738_v62  ;;  %v3959_v10 = vpop.f32.mrb[57].mxu1 }
 0x3ad   : > { %v3960_v26 = vpop.f32.mrb[58].mxu1 }
 0x3ae   : > { %v4176_v36 = vpack.c.bf16 %v4151_v0, %v4150_v56  ;;  %v4081_v46 = vmul.f32 %v5948_v22, %v7749_v16  ;;  %v5949_v44 = vadd.f32 %v3960_v26, %v7740_v1  ;;  %v3962_v28 = vpop.f32.mrb[59].mxu1 }
 0x3b0   : > { %v4120_v58 = vadd.f32 %v7754_v59, %v4081_v46  ;;  %v4082_v9 = vmul.f32 %v5949_v44, %v7749_v16  ;;  %5688 = vmatmul.mubr.msk.bf16.gmra.mrb[124].mxu0 %vm2004_vm10, %v4176_v36 }
 0x3b1   : > { %4384 = vmatprep.mubr.bf16.mxu0 %v8139_v40 }
 0x3b2   : > { %v4121_v24 = vadd.f32 %v7754_v59, %v4082_v9  ;;  %v4152_v62 = vmax.f32 %v4120_v58, 0.0 }
 0x3b3   : > { %v3965_v27 = vpop.f32.mrb[60].mxu1 }
 0x3b4   : > { %v4153_v54 = vmax.f32 %v4121_v24, 0.0  ;;  %v5950_v51 = vadd.f32 %v3965_v27, %v7742_v53  ;;  %v3967_v60 = vpop.f32.mrb[61].mxu1 }
 0x3b5   : > { %v3968_v33 = vpop.f32.mrb[62].mxu1 }
 0x3b6   : > { %v4177_v35 = vpack.c.bf16 %v4153_v54, %v4152_v62  ;;  %v4083_v1 = vmul.f32 %v5950_v51, %v7749_v16  ;;  %v5951_v48 = vadd.f32 %v3968_v33, %v7744_v15  ;;  %v3970_v17 = vpop.f32.mrb[63].mxu1 }
 0x3b8   : > { %v4122_v25 = vadd.f32 %v7754_v59, %v4083_v1  ;;  %v4084_v42 = vmul.f32 %v5951_v48, %v7749_v16  ;;  %5689 = vmatmul.mubr.msk.bf16.gmra.mrb[128].mxu0 %vm2004_vm10, %v4177_v35 }
 0x3b9   : > { %4394 = vmatprep.mubr.bf16.mxu0 %v8139_v40 }
 0x3ba   : > { %v4123_v8 = vadd.f32 %v7754_v59, %v4084_v42  ;;  %v4154_v53 = vmax.f32 %v4122_v25, 0.0 }
 0x3bb   : > { %v3973_v20 = vpop.f32.mrb[0].mxu1 }
 0x3bc   : > { %v4155_v6 = vmax.f32 %v4123_v8, 0.0  ;;  %v4085_v31 = vmul.f32 %v7749_v16, %v3973_v20  ;;  %v3975_v52 = vpop.f32.mrb[1].mxu1 }
 0x3bd   : > { %v3976_v2 = vpop.f32.mrb[2].mxu1 }
 0x3be   : > { %v4178_v5 = vpack.c.bf16 %v4155_v6, %v4154_v53  ;;  %v4124_v15 = vadd.f32 %v7754_v59, %v4085_v31  ;;  %v4086_v37 = vmul.f32 %v7749_v16, %v3976_v2  ;;  %v3978_v3 = vpop.f32.mrb[3].mxu1 }
 0x3c0   : > { %v4125_v4 = vadd.f32 %v7754_v59, %v4086_v37  ;;  %5690 = vmatmul.mubr.msk.bf16.gmra.mrb[132].mxu0 %vm2004_vm10, %v4178_v5  ;;  %v4156_v11 = vmax.f32 %v4124_v15, 0.0 }
 0x3c1   : > { %4404 = vmatprep.mubr.bf16.mxu0 %v8139_v40 }
 0x3c2   : > { %v4157_v41 = vmax.f32 %v4125_v4, 0.0 }
 0x3c3   : > { %v3981_v7 = vpop.f32.mrb[4].mxu1 }
 0x3c4   : > { %v4179_v18 = vpack.c.bf16 %v4157_v41, %v4156_v11  ;;  %v4087_v55 = vmul.f32 %v7749_v16, %v3981_v7  ;;  %v3983_v50 = vpop.f32.mrb[5].mxu1 }
 0x3c5   : > { %v3984_v49 = vpop.f32.mrb[6].mxu1 }
 0x3c6   : > { %v4126_v34 = vadd.f32 %v7754_v59, %v4087_v55  ;;  %v4088_v61 = vmul.f32 %v7749_v16, %v3984_v49  ;;  %v3986_v12 = vpop.f32.mrb[7].mxu1 }
 0x3c8   : > { %v4127_v57 = vadd.f32 %v7754_v59, %v4088_v61  ;;  %5691 = vmatmul.mubr.msk.bf16.gmra.mrb[136].mxu0 %vm2004_vm10, %v4179_v18  ;;  %v4158_v47 = vmax.f32 %v4126_v34, 0.0  ;;  %v4576_v61 = vlaneseq }
 0x3c9   : > { %4414 = vmatprep.mubr.bf16.mxu0 %v8139_v40 }
 0x3ca   : > { %v4159_v45 = vmax.f32 %v4127_v57, 0.0  ;;  %v4577_v12 = vshrl.u32 %v4576_v61, 7  ;;  %v4483_v61 = vld [vmem:[%s6457_s22 + $0x28] sm:$0xff] }
 0x3cb   : > { %v3989_v38 = vpop.f32.mrb[8].mxu1 }
 0x3cc   : > { %v4180_v21 = vpack.c.bf16 %v4159_v45, %v4158_v47  ;;  %v4089_v63 = vmul.f32 %v7749_v16, %v3989_v38  ;;  %v3991_v19 = vpop.f32.mrb[9].mxu1  ;;  %v4578_v57 = vsub.s32 0, %v4577_v12  ;;  %v4582_v47 = vsub.s32 1, %v4577_v12 }
 0x3cd   : > { %v3992_v43 = vpop.f32.mrb[10].mxu1 }
 0x3ce   : > { %v4128_v29 = vadd.f32 %v7754_v59, %v4089_v63  ;;  %v4090_v23 = vmul.f32 %v7749_v16, %v3992_v43  ;;  %v3994_v39 = vpop.f32.mrb[11].mxu1  ;;  %v4479_v43 = vld [vmem:[%s6457_s22 + $0x8] sm:$0xff] }
 0x3d0   : > { %v4129_v13 = vadd.f32 %v7754_v59, %v4090_v23  ;;  %5692 = vmatmul.mubr.msk.bf16.gmra.mrb[140].mxu0 %vm2004_vm10, %v4180_v21  ;;  %v4160_v14 = vmax.f32 %v4128_v29, 0.0 }
 0x3d1   : > { %4424 = vmatprep.mubr.bf16.mxu0 %v8139_v40 }
 0x3d2   : > { %v4161_v32 = vmax.f32 %v4129_v13, 0.0 }
 0x3d3   : > { %v3997_v30 = vpop.f32.mrb[12].mxu1 }
 0x3d4   : > { %v4181_v56 = vpack.c.bf16 %v4161_v32, %v4160_v14  ;;  %v4091_v0 = vmul.f32 %v7749_v16, %v3997_v30  ;;  %v3999_v22 = vpop.f32.mrb[13].mxu1 }
 0x3d5   : > { %v4000_v10 = vpop.f32.mrb[14].mxu1 }
 0x3d6   : > { %v4130_v26 = vadd.f32 %v7754_v59, %v4091_v0  ;;  %v4092_v36 = vmul.f32 %v7749_v16, %v4000_v10  ;;  %v4002_v46 = vpop.f32.mrb[15].mxu1 }
 0x3d8   : > { %v4131_v44 = vadd.f32 %v7754_v59, %v4092_v36  ;;  %5693 = vmatmul.mubr.msk.bf16.gmra.mrb[144].mxu0 %vm2004_vm10, %v4181_v56  ;;  %v4162_v28 = vmax.f32 %v4130_v26, 0.0  ;;  %v4512_v56 = vunpack.c.l.bf16 %v4479_v43  ;;  %v4513_v26 = vunpack.c.h.bf16 %v4479_v43 }
 0x3d9   : > { %4434 = vmatprep.mubr.bf16.mxu0 %v8139_v40 }
 0x3da   : > { %v4163_v58 = vmax.f32 %v4131_v44, 0.0 }
 0x3db   : > { %v4005_v9 = vpop.f32.mrb[16].mxu1 }
 0x3dc   : > { %v4182_v24 = vpack.c.bf16 %v4163_v58, %v4162_v28  ;;  %v4093_v27 = vmul.f32 %v7749_v16, %v4005_v9  ;;  %v4007_v62 = vpop.f32.mrb[17].mxu1  ;;  %v4480_v9 = vld [vmem:[%s6457_s22 + $0x10] sm:$0xff] }
 0x3dd   : > { %v4008_v54 = vpop.f32.mrb[18].mxu1 }
 0x3de   : > { %v4132_v51 = vadd.f32 %v7754_v59, %v4093_v27  ;;  %v4094_v60 = vmul.f32 %v7749_v16, %v4008_v54  ;;  %v4010_v33 = vpop.f32.mrb[19].mxu1 }
 0x3e0   : > { %v4133_v35 = vadd.f32 %v7754_v59, %v4094_v60  ;;  %5694 = vmatmul.mubr.msk.bf16.gmra.mrb[148].mxu0 %vm2004_vm10, %v4182_v24  ;;  %v4164_v1 = vmax.f32 %v4132_v51, 0.0  ;;  %v4481_v60 = vld [vmem:[%s6457_s22 + $0x18] sm:$0xff] }
 0x3e1   : > { %4444 = vmatprep.mubr.bf16.mxu0 %v8139_v40 }
 0x3e2   : > { %v4165_v48 = vmax.f32 %v4133_v35, 0.0  ;;  %v4514_v35 = vunpack.c.l.bf16 %v4480_v9 }
 0x3e3   : > { %v4013_v17 = vpop.f32.mrb[20].mxu1 }
 0x3e4   : > { %v4183_v25 = vpack.c.bf16 %v4165_v48, %v4164_v1  ;;  %v4095_v42 = vmul.f32 %v7749_v16, %v4013_v17  ;;  %v4015_v8 = vpop.f32.mrb[21].mxu1 }
 0x3e5   : > { %v4016_v20 = vpop.f32.mrb[22].mxu1 }
 0x3e6   : > { %v4134_v53 = vadd.f32 %v7754_v59, %v4095_v42  ;;  %v4096_v6 = vmul.f32 %v7749_v16, %v4016_v20  ;;  %v4018_v31 = vpop.f32.mrb[23].mxu1  ;;  %v4515_v42 = vunpack.c.h.bf16 %v4480_v9 }
 0x3e8   : > { %v4135_v52 = vadd.f32 %v7754_v59, %v4096_v6  ;;  %5695 = vmatmul.mubr.msk.bf16.gmra.mrb[152].mxu0 %vm2004_vm10, %v4183_v25  ;;  %v4166_v2 = vmax.f32 %v4134_v53, 0.0  ;;  %v4516_v6 = vunpack.c.l.bf16 %v4481_v60 }
 0x3e9   : > { %4454 = vmatprep.mubr.bf16.mxu0 %v8139_v40 }
 0x3ea   : > { %v4167_v5 = vmax.f32 %v4135_v52, 0.0 }
 0x3eb   : > { %v4021_v15 = vpop.f32.mrb[24].mxu1 }
 0x3ec   : > { %v4184_v37 = vpack.c.bf16 %v4167_v5, %v4166_v2  ;;  %v4097_v3 = vmul.f32 %v7749_v16, %v4021_v15  ;;  %v4023_v4 = vpop.f32.mrb[25].mxu1  ;;  %v4517_v15 = vunpack.c.h.bf16 %v4481_v60 }
 0x3ed   : > { %v4024_v11 = vpop.f32.mrb[26].mxu1 }
 0x3ee   : > { %v4136_v41 = vadd.f32 %v7754_v59, %v4097_v3  ;;  %v4098_v7 = vmul.f32 %v7749_v16, %v4024_v11  ;;  %v4026_v18 = vpop.f32.mrb[27].mxu1  ;;  %v4574_v16 = vld [vmem:[%s8095_s8] sm:$0x3] }
 0x3ef   : > { %v7871_v45 = vrot.slane %v4574_v16, %v4578_v57  ;;  %v7874_v38 = vrot.slane %v4574_v16, %v4582_v47 }
 0x3f0   : > { %v4137_v55 = vadd.f32 %v7754_v59, %v4098_v7  ;;  %5696 = vmatmul.mubr.msk.bf16.gmra.mrb[156].mxu0 %vm2004_vm10, %v4184_v37  ;;  %v4168_v50 = vmax.f32 %v4136_v41, 0.0  ;;  %v4650_v59 = vld [vmem:[%s8096_s9] sm:$0x3] }
 0x3f1   : > { %4464 = vmatprep.mubr.bf16.mxu0 %v8139_v40  ;;  %v4478_v40 = vld [vmem:[%s6457_s22] sm:$0xff]  ;;  %v7876_v21 = vrot.slane %v4650_v59, %v4578_v57  ;;  %v7878_v19 = vrot.slane %v4650_v59, %v4582_v47 }
 0x3f2   : > { %v4169_v49 = vmax.f32 %v4137_v55, 0.0  ;;  %v4510_v29 = vunpack.c.l.bf16 %v4478_v40  ;;  %v4511_v13 = vunpack.c.h.bf16 %v4478_v40  ;;  %v4482_v7 = vld [vmem:[%s6457_s22 + $0x20] sm:$0xff] }
 0x3f3   : > { %v4518_v57 = vunpack.c.l.bf16 %v4482_v7 }
 0x3f4   : > { %v4185_v34 = vpack.c.bf16 %v4169_v49, %v4168_v50 }
 0x3f8   : > { %5697 = vmatmul.mubr.msk.bf16.gmra.mrb[160].mxu0 %vm2004_vm10, %v4185_v34 }
 0x453   : > { %v4316_v63 = vpop.f32.mrb[100].mxu0 }
 0x454   : > { %v4586_v23 = vmul.f32 %v7871_v45, %v4316_v63  ;;  %v4318_v39 = vpop.f32.mrb[101].mxu0  ;;  %v4519_v63 = vunpack.c.h.bf16 %v4482_v7 }
 0x455   : > { %v4587_v14 = vmul.f32 %v7874_v38, %v4318_v39  ;;  %v4320_v32 = vpop.f32.mrb[102].mxu0  ;;  %v4520_v39 = vunpack.c.l.bf16 %v4483_v61 }
 0x456   : > { %v4662_v30 = vadd.f32 %v7876_v21, %v4586_v23  ;;  %v4588_v0 = vmul.f32 %v7871_v45, %v4320_v32  ;;  %v4322_v22 = vpop.f32.mrb[103].mxu0 }
 0x457   : > { %v4663_v10 = vadd.f32 %v7878_v19, %v4587_v14  ;;  %v4589_v36 = vmul.f32 %v7874_v38, %v4322_v22 }
 0x458   : > { %v4726_v46 = vadd.f32 %v4662_v30, %v4510_v29  ;;  %v4664_v44 = vadd.f32 %v7876_v21, %v4588_v0 }
 0x459   : > { %v4727_v28 = vadd.f32 %v4663_v10, %v4511_v13  ;;  %v4665_v58 = vadd.f32 %v7878_v19, %v4589_v36 }
 0x45a   : > { %v4790_v24 = vmax.f32 %v4726_v46, 0.0  ;;  %v4728_v27 = vadd.f32 %v4664_v44, %v4512_v56  ;;  %v4521_v56 = vunpack.c.h.bf16 %v4483_v61  ;;  %v4484_v46 = vld [vmem:[%s6457_s22 + $0x30] sm:$0xff] }
 0x45b   : > { %v4791_v62 = vmax.f32 %v4727_v28, 0.0  ;;  %v4729_v54 = vadd.f32 %v4665_v58, %v4513_v26  ;;  %v4326_v51 = vpop.f32.mrb[104].mxu0 }
 0x45c   : > { %v4792_v33 = vmax.f32 %v4728_v27, 0.0  ;;  %v4590_v1 = vmul.f32 %v7871_v45, %v4326_v51  ;;  %v4328_v48 = vpop.f32.mrb[105].mxu0  ;;  %v4485_v27 = vld [vmem:[%s6457_s22 + $0x38] sm:$0xff] }
 0x45d   : > { %v5766_v17 = vpack.c.bf16 %v4791_v62, %v4790_v24  ;;  %v4793_v25 = vmax.f32 %v4729_v54, 0.0  ;;  %v4591_v8 = vmul.f32 %v7874_v38, %v4328_v48  ;;  %v4330_v20 = vpop.f32.mrb[106].mxu0  ;;  %v4522_v54 = vunpack.c.l.bf16 %v4484_v46 }
 0x45e   : > { %v4666_v53 = vadd.f32 %v7876_v21, %v4590_v1  ;;  %v4592_v31 = vmul.f32 %v7871_v45, %v4330_v20  ;;  %v4332_v52 = vpop.f32.mrb[107].mxu0  ;;  %v4523_v1 = vunpack.c.h.bf16 %v4484_v46 }
 0x45f   : > { %5046 = vst [vmem:[%s7896_s12] sm:$0xff] %v5766_v17  ;;  %v5767_v2 = vpack.c.bf16 %v4793_v25, %v4792_v33  ;;  %v4667_v5 = vadd.f32 %v7878_v19, %v4591_v8  ;;  %v4593_v37 = vmul.f32 %v7874_v38, %v4332_v52 }
 0x460   : > { %v4730_v3 = vadd.f32 %v4666_v53, %v4514_v35  ;;  %v4668_v4 = vadd.f32 %v7876_v21, %v4592_v31  ;;  %v4525_v31 = vunpack.c.h.bf16 %v4485_v27 }
 0x461   : > { %5047 = vst [vmem:[%s7896_s12 + $0x8] sm:$0xff] %v5767_v2  ;;  %v4731_v11 = vadd.f32 %v4667_v5, %v4515_v42  ;;  %v4669_v41 = vadd.f32 %v7878_v19, %v4593_v37  ;;  %v4524_v42 = vunpack.c.l.bf16 %v4485_v27 }
 0x462   : > { %v4794_v18 = vmax.f32 %v4730_v3, 0.0  ;;  %v4732_v55 = vadd.f32 %v4668_v4, %v4516_v6  ;;  %v4486_v3 = vld [vmem:[%s6457_s22 + $0x40] sm:$0xff] }
 0x463   : > { %v4795_v50 = vmax.f32 %v4731_v11, 0.0  ;;  %v4733_v49 = vadd.f32 %v4669_v41, %v4517_v15  ;;  %v4336_v34 = vpop.f32.mrb[108].mxu0 }
 0x464   : > { %v4796_v12 = vmax.f32 %v4732_v55, 0.0  ;;  %v4594_v16 = vmul.f32 %v7871_v45, %v4336_v34  ;;  %v4338_v47 = vpop.f32.mrb[109].mxu0  ;;  %v4487_v55 = vld [vmem:[%s6457_s22 + $0x48] sm:$0xff] }
 0x465   : > { %v5768_v59 = vpack.c.bf16 %v4795_v50, %v4794_v18  ;;  %v4797_v40 = vmax.f32 %v4733_v49, 0.0  ;;  %v4595_v43 = vmul.f32 %v7874_v38, %v4338_v47  ;;  %v4340_v29 = vpop.f32.mrb[110].mxu0  ;;  %v4526_v49 = vunpack.c.l.bf16 %v4486_v3 }
 0x466   : > { %v4670_v23 = vadd.f32 %v7876_v21, %v4594_v16  ;;  %v4596_v13 = vmul.f32 %v7871_v45, %v4340_v29  ;;  %v4342_v14 = vpop.f32.mrb[111].mxu0  ;;  %v4527_v16 = vunpack.c.h.bf16 %v4486_v3 }
 0x467   : > { %5048 = vst [vmem:[%s7896_s12 + $0x10] sm:$0xff] %v5768_v59  ;;  %v5769_v32 = vpack.c.bf16 %v4797_v40, %v4796_v12  ;;  %v4671_v30 = vadd.f32 %v7878_v19, %v4595_v43  ;;  %v4597_v0 = vmul.f32 %v7874_v38, %v4342_v14 }
 0x468   : > { %v4734_v22 = vadd.f32 %v4670_v23, %v4518_v57  ;;  %v4672_v10 = vadd.f32 %v7876_v21, %v4596_v13  ;;  %v4529_v13 = vunpack.c.h.bf16 %v4487_v55 }
 0x469   : > { %5049 = vst [vmem:[%s7896_s12 + $0x18] sm:$0xff] %v5769_v32  ;;  %v4735_v26 = vadd.f32 %v4671_v30, %v4519_v63  ;;  %v4673_v36 = vadd.f32 %v7878_v19, %v4597_v0  ;;  %v4528_v63 = vunpack.c.l.bf16 %v4487_v55 }
 0x46a   : > { %v4798_v44 = vmax.f32 %v4734_v22, 0.0  ;;  %v4736_v28 = vadd.f32 %v4672_v10, %v4520_v39  ;;  %v4488_v22 = vld [vmem:[%s6457_s22 + $0x50] sm:$0xff] }
 0x46b   : > { %v4799_v58 = vmax.f32 %v4735_v26, 0.0  ;;  %v4737_v9 = vadd.f32 %v4673_v36, %v4521_v56  ;;  %v4346_v24 = vpop.f32.mrb[112].mxu0 }
 0x46c   : > { %v4800_v62 = vmax.f32 %v4736_v28, 0.0  ;;  %v4598_v51 = vmul.f32 %v7871_v45, %v4346_v24  ;;  %v4348_v60 = vpop.f32.mrb[113].mxu0  ;;  %v4489_v28 = vld [vmem:[%s6457_s22 + $0x58] sm:$0xff] }
 0x46d   : > { %v5770_v33 = vpack.c.bf16 %v4799_v58, %v4798_v44  ;;  %v4801_v35 = vmax.f32 %v4737_v9, 0.0  ;;  %v4599_v48 = vmul.f32 %v7874_v38, %v4348_v60  ;;  %v4350_v17 = vpop.f32.mrb[114].mxu0  ;;  %v4530_v9 = vunpack.c.l.bf16 %v4488_v22 }
 0x46e   : > { %v4674_v25 = vadd.f32 %v7876_v21, %v4598_v51  ;;  %v4600_v8 = vmul.f32 %v7871_v45, %v4350_v17  ;;  %v4352_v20 = vpop.f32.mrb[115].mxu0  ;;  %v4531_v51 = vunpack.c.h.bf16 %v4488_v22 }
 0x46f   : > { %5050 = vst [vmem:[%s7896_s12 + $0x20] sm:$0xff] %v5770_v33  ;;  %v5771_v53 = vpack.c.bf16 %v4801_v35, %v4800_v62  ;;  %v4675_v6 = vadd.f32 %v7878_v19, %v4599_v48  ;;  %v4601_v52 = vmul.f32 %v7874_v38, %v4352_v20 }
 0x470   : > { %v4738_v2 = vadd.f32 %v4674_v25, %v4522_v54  ;;  %v4676_v5 = vadd.f32 %v7876_v21, %v4600_v8  ;;  %v4533_v8 = vunpack.c.h.bf16 %v4489_v28 }
 0x471   : > { %5051 = vst [vmem:[%s7896_s12 + $0x28] sm:$0xff] %v5771_v53  ;;  %v4739_v15 = vadd.f32 %v4675_v6, %v4523_v1  ;;  %v4677_v37 = vadd.f32 %v7878_v19, %v4601_v52  ;;  %v4532_v1 = vunpack.c.l.bf16 %v4489_v28 }
 0x472   : > { %v4802_v4 = vmax.f32 %v4738_v2, 0.0  ;;  %v4740_v11 = vadd.f32 %v4676_v5, %v4524_v42  ;;  %v4490_v2 = vld [vmem:[%s6457_s22 + $0x60] sm:$0xff] }
 0x473   : > { %v4803_v41 = vmax.f32 %v4739_v15, 0.0  ;;  %v4741_v7 = vadd.f32 %v4677_v37, %v4525_v31  ;;  %v4356_v18 = vpop.f32.mrb[116].mxu0 }
 0x474   : > { %v4804_v50 = vmax.f32 %v4740_v11, 0.0  ;;  %v4602_v34 = vmul.f32 %v7871_v45, %v4356_v18  ;;  %v4358_v61 = vpop.f32.mrb[117].mxu0  ;;  %v4491_v11 = vld [vmem:[%s6457_s22 + $0x68] sm:$0xff] }
 0x475   : > { %v5772_v12 = vpack.c.bf16 %v4803_v41, %v4802_v4  ;;  %v4805_v57 = vmax.f32 %v4741_v7, 0.0  ;;  %v4603_v47 = vmul.f32 %v7874_v38, %v4358_v61  ;;  %v4360_v59 = vpop.f32.mrb[118].mxu0  ;;  %v4534_v7 = vunpack.c.l.bf16 %v4490_v2 }
 0x476   : > { %v4678_v40 = vadd.f32 %v7876_v21, %v4602_v34  ;;  %v4604_v43 = vmul.f32 %v7871_v45, %v4360_v59  ;;  %v4362_v29 = vpop.f32.mrb[119].mxu0  ;;  %v4535_v34 = vunpack.c.h.bf16 %v4490_v2 }
 0x477   : > { %5052 = vst [vmem:[%s7896_s12 + $0x30] sm:$0xff] %v5772_v12  ;;  %v5773_v23 = vpack.c.bf16 %v4805_v57, %v4804_v50  ;;  %v4679_v39 = vadd.f32 %v7878_v19, %v4603_v47  ;;  %v4605_v14 = vmul.f32 %v7874_v38, %v4362_v29 }
 0x478   : > { %v4742_v32 = vadd.f32 %v4678_v40, %v4526_v49  ;;  %v4680_v30 = vadd.f32 %v7876_v21, %v4604_v43  ;;  %v4537_v43 = vunpack.c.h.bf16 %v4491_v11 }
 0x479   : > { %5053 = vst [vmem:[%s7896_s12 + $0x38] sm:$0xff] %v5773_v23  ;;  %v4743_v56 = vadd.f32 %v4679_v39, %v4527_v16  ;;  %v4681_v0 = vadd.f32 %v7878_v19, %v4605_v14  ;;  %v4536_v16 = vunpack.c.l.bf16 %v4491_v11 }
 0x47a   : > { %v4806_v10 = vmax.f32 %v4742_v32, 0.0  ;;  %v4744_v26 = vadd.f32 %v4680_v30, %v4528_v63  ;;  %v4492_v32 = vld [vmem:[%s6457_s22 + $0x70] sm:$0xff] }
 0x47b   : > { %v4807_v36 = vmax.f32 %v4743_v56, 0.0  ;;  %v4745_v46 = vadd.f32 %v4681_v0, %v4529_v13  ;;  %v4366_v44 = vpop.f32.mrb[120].mxu0 }
 0x47c   : > { %v4808_v58 = vmax.f32 %v4744_v26, 0.0  ;;  %v4606_v24 = vmul.f32 %v7871_v45, %v4366_v44  ;;  %v4368_v27 = vpop.f32.mrb[121].mxu0  ;;  %v4493_v26 = vld [vmem:[%s6457_s22 + $0x78] sm:$0xff] }
 0x47d   : > { %v5774_v62 = vpack.c.bf16 %v4807_v36, %v4806_v10  ;;  %v4809_v54 = vmax.f32 %v4745_v46, 0.0  ;;  %v4607_v60 = vmul.f32 %v7874_v38, %v4368_v27  ;;  %v4370_v33 = vpop.f32.mrb[122].mxu0  ;;  %v4538_v46 = vunpack.c.l.bf16 %v4492_v32 }
 0x47e   : > { %v4682_v35 = vadd.f32 %v7876_v21, %v4606_v24  ;;  %v4608_v48 = vmul.f32 %v7871_v45, %v4370_v33  ;;  %v4372_v17 = vpop.f32.mrb[123].mxu0  ;;  %v4539_v24 = vunpack.c.h.bf16 %v4492_v32 }
 0x47f   : > { %5054 = vst [vmem:[%s7896_s12 + $0x40] sm:$0xff] %v5774_v62  ;;  %v5775_v25 = vpack.c.bf16 %v4809_v54, %v4808_v58  ;;  %v4683_v42 = vadd.f32 %v7878_v19, %v4607_v60  ;;  %v4609_v20 = vmul.f32 %v7874_v38, %v4372_v17 }
 0x480   : > { %v4746_v53 = vadd.f32 %v4682_v35, %v4530_v9  ;;  %v4684_v6 = vadd.f32 %v7876_v21, %v4608_v48  ;;  %v4541_v48 = vunpack.c.h.bf16 %v4493_v26 }
 0x481   : > { %5055 = vst [vmem:[%s7896_s12 + $0x48] sm:$0xff] %v5775_v25  ;;  %v4747_v31 = vadd.f32 %v4683_v42, %v4531_v51  ;;  %v4685_v52 = vadd.f32 %v7878_v19, %v4609_v20  ;;  %v4540_v51 = vunpack.c.l.bf16 %v4493_v26 }
 0x482   : > { %v4810_v5 = vmax.f32 %v4746_v53, 0.0  ;;  %v4748_v15 = vadd.f32 %v4684_v6, %v4532_v1  ;;  %v4494_v53 = vld [vmem:[%s6457_s22 + $0x80] sm:$0xff] }
 0x483   : > { %v4811_v37 = vmax.f32 %v4747_v31, 0.0  ;;  %v4749_v3 = vadd.f32 %v4685_v52, %v4533_v8  ;;  %v4376_v4 = vpop.f32.mrb[124].mxu0 }
 0x484   : > { %v4812_v41 = vmax.f32 %v4748_v15, 0.0  ;;  %v4610_v18 = vmul.f32 %v7871_v45, %v4376_v4  ;;  %v4378_v55 = vpop.f32.mrb[125].mxu0  ;;  %v4495_v15 = vld [vmem:[%s6457_s22 + $0x88] sm:$0xff] }
 0x485   : > { %v5776_v50 = vpack.c.bf16 %v4811_v37, %v4810_v5  ;;  %v4813_v49 = vmax.f32 %v4749_v3, 0.0  ;;  %v4611_v61 = vmul.f32 %v7874_v38, %v4378_v55  ;;  %v4380_v12 = vpop.f32.mrb[126].mxu0  ;;  %v4542_v3 = vunpack.c.l.bf16 %v4494_v53 }
 0x486   : > { %v4686_v57 = vadd.f32 %v7876_v21, %v4610_v18  ;;  %v4612_v47 = vmul.f32 %v7871_v45, %v4380_v12  ;;  %v4382_v59 = vpop.f32.mrb[127].mxu0  ;;  %v4543_v18 = vunpack.c.h.bf16 %v4494_v53 }
 0x487   : > { %5056 = vst [vmem:[%s7896_s12 + $0x50] sm:$0xff] %v5776_v50  ;;  %v5777_v40 = vpack.c.bf16 %v4813_v49, %v4812_v41  ;;  %v4687_v63 = vadd.f32 %v7878_v19, %v4611_v61  ;;  %v4613_v29 = vmul.f32 %v7874_v38, %v4382_v59 }
 0x488   : > { %v4750_v23 = vadd.f32 %v4686_v57, %v4534_v7  ;;  %v4688_v39 = vadd.f32 %v7876_v21, %v4612_v47  ;;  %v4545_v47 = vunpack.c.h.bf16 %v4495_v15 }
 0x489   : > { %5057 = vst [vmem:[%s7896_s12 + $0x58] sm:$0xff] %v5777_v40  ;;  %v4751_v13 = vadd.f32 %v4687_v63, %v4535_v34  ;;  %v4689_v14 = vadd.f32 %v7878_v19, %v4613_v29  ;;  %v4544_v34 = vunpack.c.l.bf16 %v4495_v15 }
 0x48a   : > { %v4814_v30 = vmax.f32 %v4750_v23, 0.0  ;;  %v4752_v56 = vadd.f32 %v4688_v39, %v4536_v16  ;;  %v4496_v23 = vld [vmem:[%s6457_s22 + $0x90] sm:$0xff] }
 0x48b   : > { %v4815_v0 = vmax.f32 %v4751_v13, 0.0  ;;  %v4753_v22 = vadd.f32 %v4689_v14, %v4537_v43  ;;  %v4386_v10 = vpop.f32.mrb[128].mxu0 }
 0x48c   : > { %v4816_v36 = vmax.f32 %v4752_v56, 0.0  ;;  %v4614_v44 = vmul.f32 %v7871_v45, %v4386_v10  ;;  %v4388_v28 = vpop.f32.mrb[129].mxu0  ;;  %v4497_v56 = vld [vmem:[%s6457_s22 + $0x98] sm:$0xff] }
 0x48d   : > { %v5778_v58 = vpack.c.bf16 %v4815_v0, %v4814_v30  ;;  %v4817_v9 = vmax.f32 %v4753_v22, 0.0  ;;  %v4615_v27 = vmul.f32 %v7874_v38, %v4388_v28  ;;  %v4390_v62 = vpop.f32.mrb[130].mxu0  ;;  %v4546_v22 = vunpack.c.l.bf16 %v4496_v23 }
 0x48e   : > { %v4690_v54 = vadd.f32 %v7876_v21, %v4614_v44  ;;  %v4616_v60 = vmul.f32 %v7871_v45, %v4390_v62  ;;  %v4392_v33 = vpop.f32.mrb[131].mxu0  ;;  %v4547_v44 = vunpack.c.h.bf16 %v4496_v23 }
 0x48f   : > { %5058 = vst [vmem:[%s7896_s12 + $0x60] sm:$0xff] %v5778_v58  ;;  %v5779_v35 = vpack.c.bf16 %v4817_v9, %v4816_v36  ;;  %v4691_v1 = vadd.f32 %v7878_v19, %v4615_v27  ;;  %v4617_v17 = vmul.f32 %v7874_v38, %v4392_v33 }
 0x490   : > { %v4754_v25 = vadd.f32 %v4690_v54, %v4538_v46  ;;  %v4692_v42 = vadd.f32 %v7876_v21, %v4616_v60  ;;  %v4549_v60 = vunpack.c.h.bf16 %v4497_v56 }
 0x491   : > { %5059 = vst [vmem:[%s7896_s12 + $0x68] sm:$0xff] %v5779_v35  ;;  %v4755_v8 = vadd.f32 %v4691_v1, %v4539_v24  ;;  %v4693_v20 = vadd.f32 %v7878_v19, %v4617_v17  ;;  %v4548_v24 = vunpack.c.l.bf16 %v4497_v56 }
 0x492   : > { %v4818_v6 = vmax.f32 %v4754_v25, 0.0  ;;  %v4756_v31 = vadd.f32 %v4692_v42, %v4540_v51  ;;  %v4498_v25 = vld [vmem:[%s6457_s22 + $0xa0] sm:$0xff] }
 0x493   : > { %v4819_v52 = vmax.f32 %v4755_v8, 0.0  ;;  %v4757_v2 = vadd.f32 %v4693_v20, %v4541_v48  ;;  %v4396_v5 = vpop.f32.mrb[132].mxu0 }
 0x494   : > { %v4820_v37 = vmax.f32 %v4756_v31, 0.0  ;;  %v4618_v4 = vmul.f32 %v7871_v45, %v4396_v5  ;;  %v4398_v11 = vpop.f32.mrb[133].mxu0  ;;  %v4499_v31 = vld [vmem:[%s6457_s22 + $0xa8] sm:$0xff] }
 0x495   : > { %v5780_v41 = vpack.c.bf16 %v4819_v52, %v4818_v6  ;;  %v4821_v7 = vmax.f32 %v4757_v2, 0.0  ;;  %v4619_v55 = vmul.f32 %v7874_v38, %v4398_v11  ;;  %v4400_v50 = vpop.f32.mrb[134].mxu0  ;;  %v4550_v2 = vunpack.c.l.bf16 %v4498_v25 }
 0x496   : > { %v4694_v49 = vadd.f32 %v7876_v21, %v4618_v4  ;;  %v4620_v61 = vmul.f32 %v7871_v45, %v4400_v50  ;;  %v4402_v12 = vpop.f32.mrb[135].mxu0  ;;  %v4551_v4 = vunpack.c.h.bf16 %v4498_v25 }
 0x497   : > { %5060 = vst [vmem:[%s7896_s12 + $0x70] sm:$0xff] %v5780_v41  ;;  %v5781_v57 = vpack.c.bf16 %v4821_v7, %v4820_v37  ;;  %v4695_v16 = vadd.f32 %v7878_v19, %v4619_v55  ;;  %v4621_v59 = vmul.f32 %v7874_v38, %v4402_v12 }
 0x498   : > { %v4758_v40 = vadd.f32 %v4694_v49, %v4542_v3  ;;  %v4696_v63 = vadd.f32 %v7876_v21, %v4620_v61  ;;  %v4553_v61 = vunpack.c.h.bf16 %v4499_v31 }
 0x499   : > { %5061 = vst [vmem:[%s7896_s12 + $0x78] sm:$0xff] %v5781_v57  ;;  %v4759_v43 = vadd.f32 %v4695_v16, %v4543_v18  ;;  %v4697_v29 = vadd.f32 %v7878_v19, %v4621_v59  ;;  %v4552_v18 = vunpack.c.l.bf16 %v4499_v31 }
 0x49a   : > { %v4822_v39 = vmax.f32 %v4758_v40, 0.0  ;;  %v4760_v13 = vadd.f32 %v4696_v63, %v4544_v34  ;;  %v4500_v40 = vld [vmem:[%s6457_s22 + $0xb0] sm:$0xff] }
 0x49b   : > { %v4823_v14 = vmax.f32 %v4759_v43, 0.0  ;;  %v4761_v32 = vadd.f32 %v4697_v29, %v4545_v47  ;;  %v4406_v30 = vpop.f32.mrb[136].mxu0 }
 0x49c   : > { %v4824_v0 = vmax.f32 %v4760_v13, 0.0  ;;  %v4622_v10 = vmul.f32 %v7871_v45, %v4406_v30  ;;  %v4408_v26 = vpop.f32.mrb[137].mxu0  ;;  %v4501_v13 = vld [vmem:[%s6457_s22 + $0xb8] sm:$0xff] }
 0x49d   : > { %v5782_v36 = vpack.c.bf16 %v4823_v14, %v4822_v39  ;;  %v4825_v46 = vmax.f32 %v4761_v32, 0.0  ;;  %v4623_v28 = vmul.f32 %v7874_v38, %v4408_v26  ;;  %v4410_v58 = vpop.f32.mrb[138].mxu0  ;;  %v4554_v32 = vunpack.c.l.bf16 %v4500_v40 }
 0x49e   : > { %v4698_v9 = vadd.f32 %v7876_v21, %v4622_v10  ;;  %v4624_v27 = vmul.f32 %v7871_v45, %v4410_v58  ;;  %v4412_v62 = vpop.f32.mrb[139].mxu0  ;;  %v4555_v10 = vunpack.c.h.bf16 %v4500_v40 }
 0x49f   : > { %5062 = vst [vmem:[%s7896_s12 + $0x80] sm:$0xff] %v5782_v36  ;;  %v5783_v54 = vpack.c.bf16 %v4825_v46, %v4824_v0  ;;  %v4699_v51 = vadd.f32 %v7878_v19, %v4623_v28  ;;  %v4625_v33 = vmul.f32 %v7874_v38, %v4412_v62 }
 0x4a0   : > { %v4762_v35 = vadd.f32 %v4698_v9, %v4546_v22  ;;  %v4700_v1 = vadd.f32 %v7876_v21, %v4624_v27  ;;  %v4557_v27 = vunpack.c.h.bf16 %v4501_v13 }
 0x4a1   : > { %5063 = vst [vmem:[%s7896_s12 + $0x88] sm:$0xff] %v5783_v54  ;;  %v4763_v48 = vadd.f32 %v4699_v51, %v4547_v44  ;;  %v4701_v17 = vadd.f32 %v7878_v19, %v4625_v33  ;;  %v4556_v44 = vunpack.c.l.bf16 %v4501_v13 }
 0x4a2   : > { %v4826_v42 = vmax.f32 %v4762_v35, 0.0  ;;  %v4764_v8 = vadd.f32 %v4700_v1, %v4548_v24  ;;  %v4502_v35 = vld [vmem:[%s6457_s22 + $0xc0] sm:$0xff] }
 0x4a3   : > { %v4827_v20 = vmax.f32 %v4763_v48, 0.0  ;;  %v4765_v53 = vadd.f32 %v4701_v17, %v4549_v60  ;;  %v4416_v6 = vpop.f32.mrb[140].mxu0 }
 0x4a4   : > { %v4828_v52 = vmax.f32 %v4764_v8, 0.0  ;;  %v4626_v5 = vmul.f32 %v7871_v45, %v4416_v6  ;;  %v4418_v15 = vpop.f32.mrb[141].mxu0  ;;  %v4503_v8 = vld [vmem:[%s6457_s22 + $0xc8] sm:$0xff] }
 0x4a5   : > { %v5784_v37 = vpack.c.bf16 %v4827_v20, %v4826_v42  ;;  %v4829_v3 = vmax.f32 %v4765_v53, 0.0  ;;  %v4627_v11 = vmul.f32 %v7874_v38, %v4418_v15  ;;  %v4420_v41 = vpop.f32.mrb[142].mxu0  ;;  %v4558_v53 = vunpack.c.l.bf16 %v4502_v35 }
 0x4a6   : > { %v4702_v7 = vadd.f32 %v7876_v21, %v4626_v5  ;;  %v4628_v55 = vmul.f32 %v7871_v45, %v4420_v41  ;;  %v4422_v50 = vpop.f32.mrb[143].mxu0  ;;  %v4559_v5 = vunpack.c.h.bf16 %v4502_v35 }
 0x4a7   : > { %5064 = vst [vmem:[%s7896_s12 + $0x90] sm:$0xff] %v5784_v37  ;;  %v5785_v49 = vpack.c.bf16 %v4829_v3, %v4828_v52  ;;  %v4703_v34 = vadd.f32 %v7878_v19, %v4627_v11  ;;  %v4629_v12 = vmul.f32 %v7874_v38, %v4422_v50 }
 0x4a8   : > { %v4766_v57 = vadd.f32 %v4702_v7, %v4550_v2  ;;  %v4704_v16 = vadd.f32 %v7876_v21, %v4628_v55  ;;  %v4561_v55 = vunpack.c.h.bf16 %v4503_v8 }
 0x4a9   : > { %5065 = vst [vmem:[%s7896_s12 + $0x98] sm:$0xff] %v5785_v49  ;;  %v4767_v47 = vadd.f32 %v4703_v34, %v4551_v4  ;;  %v4705_v59 = vadd.f32 %v7878_v19, %v4629_v12  ;;  %v4560_v4 = vunpack.c.l.bf16 %v4503_v8 }
 0x4aa   : > { %v4830_v63 = vmax.f32 %v4766_v57, 0.0  ;;  %v4768_v43 = vadd.f32 %v4704_v16, %v4552_v18  ;;  %v4504_v57 = vld [vmem:[%s6457_s22 + $0xd0] sm:$0xff] }
 0x4ab   : > { %v4831_v29 = vmax.f32 %v4767_v47, 0.0  ;;  %v4769_v23 = vadd.f32 %v4705_v59, %v4553_v61  ;;  %v4426_v39 = vpop.f32.mrb[144].mxu0 }
 0x4ac   : > { %v4832_v14 = vmax.f32 %v4768_v43, 0.0  ;;  %v4630_v30 = vmul.f32 %v7871_v45, %v4426_v39  ;;  %v4428_v56 = vpop.f32.mrb[145].mxu0  ;;  %v4505_v43 = vld [vmem:[%s6457_s22 + $0xd8] sm:$0xff] }
 0x4ad   : > { %v5786_v0 = vpack.c.bf16 %v4831_v29, %v4830_v63  ;;  %v4833_v22 = vmax.f32 %v4769_v23, 0.0  ;;  %v4631_v26 = vmul.f32 %v7874_v38, %v4428_v56  ;;  %v4430_v36 = vpop.f32.mrb[146].mxu0  ;;  %v4562_v23 = vunpack.c.l.bf16 %v4504_v57 }
 0x4ae   : > { %v4706_v46 = vadd.f32 %v7876_v21, %v4630_v30  ;;  %v4632_v28 = vmul.f32 %v7871_v45, %v4430_v36  ;;  %v4432_v58 = vpop.f32.mrb[147].mxu0  ;;  %v4563_v30 = vunpack.c.h.bf16 %v4504_v57 }
 0x4af   : > { %5066 = vst [vmem:[%s7896_s12 + $0xa0] sm:$0xff] %v5786_v0  ;;  %v5787_v9 = vpack.c.bf16 %v4833_v22, %v4832_v14  ;;  %v4707_v24 = vadd.f32 %v7878_v19, %v4631_v26  ;;  %v4633_v62 = vmul.f32 %v7874_v38, %v4432_v58 }
 0x4b0   : > { %v4770_v54 = vadd.f32 %v4706_v46, %v4554_v32  ;;  %v4708_v51 = vadd.f32 %v7876_v21, %v4632_v28  ;;  %v4565_v28 = vunpack.c.h.bf16 %v4505_v43 }
 0x4b1   : > { %5067 = vst [vmem:[%s7896_s12 + $0xa8] sm:$0xff] %v5787_v9  ;;  %v4771_v60 = vadd.f32 %v4707_v24, %v4555_v10  ;;  %v4709_v33 = vadd.f32 %v7878_v19, %v4633_v62  ;;  %v4564_v10 = vunpack.c.l.bf16 %v4505_v43 }
 0x4b2   : > { %v4834_v1 = vmax.f32 %v4770_v54, 0.0  ;;  %v4772_v48 = vadd.f32 %v4708_v51, %v4556_v44  ;;  %v4506_v54 = vld [vmem:[%s6457_s22 + $0xe0] sm:$0xff] }
 0x4b3   : > { %v4835_v17 = vmax.f32 %v4771_v60, 0.0  ;;  %v4773_v25 = vadd.f32 %v4709_v33, %v4557_v27  ;;  %v4436_v42 = vpop.f32.mrb[148].mxu0 }
 0x4b4   : > { %v4836_v20 = vmax.f32 %v4772_v48, 0.0  ;;  %v4634_v6 = vmul.f32 %v7871_v45, %v4436_v42  ;;  %v4438_v31 = vpop.f32.mrb[149].mxu0  ;;  %v4507_v48 = vld [vmem:[%s6457_s22 + $0xe8] sm:$0xff] }
 0x4b5   : > { %v5788_v52 = vpack.c.bf16 %v4835_v17, %v4834_v1  ;;  %v4837_v2 = vmax.f32 %v4773_v25, 0.0  ;;  %v4635_v15 = vmul.f32 %v7874_v38, %v4438_v31  ;;  %v4440_v37 = vpop.f32.mrb[150].mxu0  ;;  %v4566_v25 = vunpack.c.l.bf16 %v4506_v54 }
 0x4b6   : > { %v4710_v3 = vadd.f32 %v7876_v21, %v4634_v6  ;;  %v4636_v11 = vmul.f32 %v7871_v45, %v4440_v37  ;;  %v4442_v41 = vpop.f32.mrb[151].mxu0  ;;  %v4567_v6 = vunpack.c.h.bf16 %v4506_v54 }
 0x4b7   : > { %5068 = vst [vmem:[%s7896_s12 + $0xb0] sm:$0xff] %v5788_v52  ;;  %v5789_v7 = vpack.c.bf16 %v4837_v2, %v4836_v20  ;;  %v4711_v18 = vadd.f32 %v7878_v19, %v4635_v15  ;;  %v4637_v50 = vmul.f32 %v7874_v38, %v4442_v41 }
 0x4b8   : > { %v4774_v49 = vadd.f32 %v4710_v3, %v4558_v53  ;;  %v4712_v34 = vadd.f32 %v7876_v21, %v4636_v11  ;;  %v4569_v11 = vunpack.c.h.bf16 %v4507_v48 }
 0x4b9   : > { %5069 = vst [vmem:[%s7896_s12 + $0xb8] sm:$0xff] %v5789_v7  ;;  %v4775_v61 = vadd.f32 %v4711_v18, %v4559_v5  ;;  %v4713_v12 = vadd.f32 %v7878_v19, %v4637_v50  ;;  %v4568_v5 = vunpack.c.l.bf16 %v4507_v48 }
 0x4ba   : > { %v4838_v16 = vmax.f32 %v4774_v49, 0.0  ;;  %v4776_v47 = vadd.f32 %v4712_v34, %v4560_v4  ;;  %v4508_v49 = vld [vmem:[%s6457_s22 + $0xf0] sm:$0xff] }
 0x4bb   : > { %v4839_v59 = vmax.f32 %v4775_v61, 0.0  ;;  %v4777_v40 = vadd.f32 %v4713_v12, %v4561_v55  ;;  %v4446_v63 = vpop.f32.mrb[152].mxu0 }
 0x4bc   : > { %v4840_v29 = vmax.f32 %v4776_v47, 0.0  ;;  %v4638_v39 = vmul.f32 %v7871_v45, %v4446_v63  ;;  %v4448_v13 = vpop.f32.mrb[153].mxu0  ;;  %v4509_v47 = vld [vmem:[%s6457_s22 + $0xf8] sm:$0xff] }
 0x4bd   : > { %v5790_v14 = vpack.c.bf16 %v4839_v59, %v4838_v16  ;;  %v4841_v32 = vmax.f32 %v4777_v40, 0.0  ;;  %v4639_v56 = vmul.f32 %v7874_v38, %v4448_v13  ;;  %v4450_v0 = vpop.f32.mrb[154].mxu0  ;;  %v4570_v40 = vunpack.c.l.bf16 %v4508_v49 }
 0x4be   : > { %v4714_v22 = vadd.f32 %v7876_v21, %v4638_v39  ;;  %v4640_v26 = vmul.f32 %v7871_v45, %v4450_v0  ;;  %v4452_v36 = vpop.f32.mrb[155].mxu0  ;;  %v4571_v39 = vunpack.c.h.bf16 %v4508_v49 }
 0x4bf   : > { %5070 = vst [vmem:[%s7896_s12 + $0xc0] sm:$0xff] %v5790_v14  ;;  %v5791_v46 = vpack.c.bf16 %v4841_v32, %v4840_v29  ;;  %v4715_v44 = vadd.f32 %v7878_v19, %v4639_v56  ;;  %v4641_v58 = vmul.f32 %v7874_v38, %v4452_v36 }
 0x4c0   : > { %v4778_v9 = vadd.f32 %v4714_v22, %v4562_v23  ;;  %v4716_v24 = vadd.f32 %v7876_v21, %v4640_v26  ;;  %v4573_v26 = vunpack.c.h.bf16 %v4509_v47 }
 0x4c1   : > { %5071 = vst [vmem:[%s7896_s12 + $0xc8] sm:$0xff] %v5791_v46  ;;  %v4779_v27 = vadd.f32 %v4715_v44, %v4563_v30  ;;  %v4717_v62 = vadd.f32 %v7878_v19, %v4641_v58  ;;  %v4572_v30 = vunpack.c.l.bf16 %v4509_v47 }
 0x4c2   : > { %v4842_v51 = vmax.f32 %v4778_v9, 0.0  ;;  %v4780_v60 = vadd.f32 %v4716_v24, %v4564_v10 }
 0x4c3   : > { %v4843_v33 = vmax.f32 %v4779_v27, 0.0  ;;  %v4781_v35 = vadd.f32 %v4717_v62, %v4565_v28  ;;  %v4456_v1 = vpop.f32.mrb[156].mxu0 }
 0x4c4   : > { %v4844_v17 = vmax.f32 %v4780_v60, 0.0  ;;  %v4642_v42 = vmul.f32 %v7871_v45, %v4456_v1  ;;  %v4458_v8 = vpop.f32.mrb[157].mxu0 }
 0x4c5   : > { %v5792_v20 = vpack.c.bf16 %v4843_v33, %v4842_v51  ;;  %v4845_v53 = vmax.f32 %v4781_v35, 0.0  ;;  %v4643_v31 = vmul.f32 %v7874_v38, %v4458_v8  ;;  %v4460_v52 = vpop.f32.mrb[158].mxu0 }
 0x4c6   : > { %v4718_v2 = vadd.f32 %v7876_v21, %v4642_v42  ;;  %v4644_v15 = vmul.f32 %v7871_v45, %v4460_v52  ;;  %v4462_v37 = vpop.f32.mrb[159].mxu0 }
 0x4c7   : > { %5072 = vst [vmem:[%s7896_s12 + $0xd0] sm:$0xff] %v5792_v20  ;;  %v5793_v3 = vpack.c.bf16 %v4845_v53, %v4844_v17  ;;  %v4719_v4 = vadd.f32 %v7878_v19, %v4643_v31  ;;  %v4645_v41 = vmul.f32 %v7874_v38, %v4462_v37 }
 0x4c8   : > { %v4782_v7 = vadd.f32 %v4718_v2, %v4566_v25  ;;  %v4720_v18 = vadd.f32 %v7876_v21, %v4644_v15 }
 0x4c9   : > { %5073 = vst [vmem:[%s7896_s12 + $0xd8] sm:$0xff] %v5793_v3  ;;  %v4783_v55 = vadd.f32 %v4719_v4, %v4567_v6  ;;  %v4721_v50 = vadd.f32 %v7878_v19, %v4645_v41 }
 0x4ca   : > { %v4846_v34 = vmax.f32 %v4782_v7, 0.0  ;;  %v4784_v61 = vadd.f32 %v4720_v18, %v4568_v5 }
 0x4cb   : > { %v4847_v12 = vmax.f32 %v4783_v55, 0.0  ;;  %v4785_v57 = vadd.f32 %v4721_v50, %v4569_v11  ;;  %v4466_v16 = vpop.f32.mrb[160].mxu0 }
 0x4cc   : > { %v4848_v59 = vmax.f32 %v4784_v61, 0.0  ;;  %v4646_v63 = vmul.f32 %v7871_v45, %v4466_v16  ;;  %v4468_v43 = vpop.f32.mrb[161].mxu0 }
 0x4cd   : > { %v5794_v29 = vpack.c.bf16 %v4847_v12, %v4846_v34  ;;  %v4849_v23 = vmax.f32 %v4785_v57, 0.0  ;;  %v4647_v13 = vmul.f32 %v7874_v38, %v4468_v43  ;;  %v4470_v14 = vpop.f32.mrb[162].mxu0 }
 0x4ce   : > { %v4722_v32 = vadd.f32 %v7876_v21, %v4646_v63  ;;  %v4648_v56 = vmul.f32 %v7871_v45, %v4470_v14  ;;  %v4472_v0 = vpop.f32.mrb[163].mxu0 }
 0x4cf   : > { %5074 = vst [vmem:[%s7896_s12 + $0xe0] sm:$0xff] %v5794_v29  ;;  %v5795_v22 = vpack.c.bf16 %v4849_v23, %v4848_v59  ;;  %v4723_v10 = vadd.f32 %v7878_v19, %v4647_v13  ;;  %v4649_v36 = vmul.f32 %v7874_v38, %v4472_v0 }
 0x4d0   : > { %v4786_v46 = vadd.f32 %v4722_v32, %v4570_v40  ;;  %v4724_v44 = vadd.f32 %v7876_v21, %v4648_v56 }
 0x4d1   : > { %5075 = vst [vmem:[%s7896_s12 + $0xe8] sm:$0xff] %v5795_v22  ;;  %v4787_v28 = vadd.f32 %v4723_v10, %v4571_v39  ;;  %v4725_v58 = vadd.f32 %v7878_v19, %v4649_v36 }
 0x4d2   : > { %v4850_v9 = vmax.f32 %v4786_v46, 0.0  ;;  %v4788_v24 = vadd.f32 %v4724_v44, %v4572_v30 }
 0x4d3   : > { %v4851_v45 = vmax.f32 %v4787_v28, 0.0  ;;  %v4789_v27 = vadd.f32 %v4725_v58, %v4573_v26 }
 0x4d4   : > { %v4852_v62 = vmax.f32 %v4788_v24, 0.0 }
 0x4d5   : > { %v5796_v54 = vpack.c.bf16 %v4851_v45, %v4850_v9  ;;  %v4853_v51 = vmax.f32 %v4789_v27, 0.0 }
 0x4d7   : > { %5076 = vst [vmem:[%s7896_s12 + $0xf0] sm:$0xff] %v5796_v54  ;;  %v5797_v60 = vpack.c.bf16 %v4853_v51, %v4852_v62 }
 0x4d9   : > { %5077 = vst [vmem:[%s7896_s12 + $0xf8] sm:$0xff] %v5797_v60 }
 0x4da PF: > { %s20_s15 = sadd.s32 1, %s6345_s15   ;;  %s8193_s13 = smov %s6341_s14 }
 0x4db   : > { %p17_p5 = scmp.ge.s32.totalorder %s20_s15, 4   ;;  %s8194_s14 = smov %s8196_s16 }
 0x4dd   :  { %19 = sbr.rel (!%p17_p5) target bundleno = 2 (0x2), region = 102 }

</bundles_post_ra>
